<compile_context>
chip_gen: v7x
topology: tpu7x:2x2x1
jax: 0.10.0
libtpu: 0.0.40
codegen_flags: <defaults>
</compile_context>

<pallas_src>
import functools

import numpy as np
import jax
import jax.numpy as jnp
from jax.experimental import pallas as pl
from jax.experimental.pallas import tpu as pltpu


def _round_up(x, m):
    return (x + m - 1) // m * m


# ----------------------------- Pallas kernels -------------------------------

def _gelu_tanh(x):
    # tanh-form GELU: the transcendental goes to the EUP (otherwise idle);
    # matches torch's erf-GELU to ~3e-4 abs, well inside the test tolerance.
    c = 0.7978845608028654  # sqrt(2/pi)
    return 0.5 * x * (1.0 + jnp.tanh(c * (x + 0.044715 * x * x * x)))


def _fused_timesblock_conv_kernel(x_ref, mask_ref, w1_ref, b1_ref, w2_ref,
                                  b2_ref, o_ref, mid_ref, *, k, wp, mo, off):
    """conv1 -> GELU -> conv2 for one batch element, fully in VMEM.

    x_ref   : (mf, c1)       bf16  zero-padded activation slab, flattened rows
    mask_ref: (mo, 1)        f32   1.0 on valid (non wrap-around) output rows
    w1_ref  : (k*k, c1, c2)  bf16  per-tap fused conv1 weight;  b1_ref: (1, c2)
    w2_ref  : (k*k, c2, c1)  bf16  per-tap fused conv2 weight;  b2_ref: (1, c1)
    o_ref   : (mo, c1)       bf16  conv2 pseudo-output (valid cols sliced in glue)
    mid_ref : (mf, c2)       bf16  VMEM scratch: re-padded GELU'd intermediate

    Row shift by kh*wp + kw on the flattened slab == 2-D tap (kh, kw); the
    wrap-around rows are zeroed by mask before re-padding and sliced in glue.
    """
    c2 = mid_ref.shape[-1]
    mf = mid_ref.shape[0]

    # ---- conv1: K^2 per-tap MXU matmuls accumulating in f32 (no im2col). ----
    acc1 = None
    t = 0
    for kh in range(k):
        for kw in range(k):
            d = kh * wp + kw
            contrib = jnp.dot(x_ref[d:d + mo, :], w1_ref[t],
                              preferred_element_type=jnp.float32)
            acc1 = contrib if acc1 is None else acc1 + contrib
            t += 1
    y1 = _gelu_tanh(acc1 + b1_ref[...]) * mask_ref[...]

    # ---- re-pad the GELU'd intermediate; only the halo rows need zeroing
    #      (body rows are fully overwritten every step; halo rows are never
    #      written, so zeroing them per step keeps this megacore-safe). ----
    tail = mf - off - mo
    if off > 0:
        mid_ref[0:off, :] = jnp.zeros((off, c2), mid_ref.dtype)
    if tail > 0:
        mid_ref[off + mo:, :] = jnp.zeros((tail, c2), mid_ref.dtype)
    mid_ref[off:off + mo, :] = y1.astype(mid_ref.dtype)

    # ---- conv2: same per-tap accumulation, reading the VMEM intermediate. ----
    acc2 = None
    t = 0
    for kh in range(k):
        for kw in range(k):
            d = kh * wp + kw
            contrib = jnp.dot(mid_ref[d:d + mo, :], w2_ref[t],
                              preferred_element_type=jnp.float32)
            acc2 = contrib if acc2 is None else acc2 + contrib
            t += 1
    o_ref[...] = (acc2 + b2_ref[...]).astype(o_ref.dtype)


@functools.lru_cache(maxsize=None)
def _build_conv_call(batch, mf, mo, wp, k, c1, c2):
    """One compiled fused-conv kernel per shape bucket (lru_cache keeps the
    Pallas calls compile-hit across repeated periods)."""
    p = k // 2
    off = p * wp + p
    kk = k * k
    kern = functools.partial(_fused_timesblock_conv_kernel,
                             k=k, wp=wp, mo=mo, off=off)
    call = pl.pallas_call(
        kern,
        out_shape=jax.ShapeDtypeStruct((batch, mo, c1), jnp.bfloat16),
        grid_spec=pltpu.PrefetchScalarGridSpec(
            num_scalar_prefetch=0,
            grid=(batch,),
            in_specs=[
                # per-batch activation slab (pipelined / double-buffered)
                pl.BlockSpec((None, mf, c1), lambda b: (b, 0, 0)),
                # resident small operands (block index constant across steps)
                pl.BlockSpec((mo, 1), lambda b: (0, 0)),
                pl.BlockSpec((kk, c1, c2), lambda b: (0, 0, 0)),
                pl.BlockSpec((1, c2), lambda b: (0, 0)),
                pl.BlockSpec((kk, c2, c1), lambda b: (0, 0, 0)),
                pl.BlockSpec((1, c1), lambda b: (0, 0)),
            ],
            out_specs=pl.BlockSpec((None, mo, c1), lambda b: (b, 0, 0)),
            scratch_shapes=[
                pltpu.VMEM((mf, c2), jnp.bfloat16),   # padded intermediate
            ],
        ),
        compiler_params=pltpu.CompilerParams(
            dimension_semantics=("parallel",),   # shards batch across TCs (v7x)
            vmem_limit_bytes=48 * 1024 * 1024,   # headroom under v7x's 64 MiB
        ),
    )
    # TODO(synk): for very large H*W slabs, add a second grid axis over mo
    # row-tiles with a haloed index_map (or manual DMA) both to fit VMEM and
    # to give each TensorCore >1 step so DMAs overlap compute.
    return jax.jit(call)


def _agg_kernel(w_ref, res_ref, x_ref, o_ref, *, topk, blocks_per_batch):
    # w_ref: (B, K) softmaxed period weights in SMEM
    # res_ref: (K, dblk); x_ref / o_ref: (1, dblk)
    # out = x + sum_k w[b, k] * res[k]   (vectorized over the lane-dense tile)
    bi = pl.program_id(0) // blocks_per_batch
    acc = x_ref[...]
    for ki in range(topk):
        acc = acc + res_ref[ki:ki + 1, :] * w_ref[bi, ki]
    o_ref[...] = acc


def weighted_residual_sum(w_soft, res_stack, x):
    k, b, t, n = res_stack.shape
    d = t * n
    dp = _round_up(d, 128)            # lane-dense flattened (T*N) per batch
    dblk = dp
    if dp > 8192:                     # cap tile width -> no vreg spills
        for cand in (8192, 4096, 2048, 1024, 512, 256, 128):
            if dp % cand == 0:
                dblk = cand
                break
    bpb = dp // dblk
    res2d = jnp.pad(res_stack.reshape(k, b, d).astype(jnp.float32),
                    ((0, 0), (0, 0), (0, dp - d))).reshape(k, b * dp)
    x2d = jnp.pad(x.reshape(b, d).astype(jnp.float32),
                  ((0, 0), (0, dp - d))).reshape(1, b * dp)
    kern = functools.partial(_agg_kernel, topk=k, blocks_per_batch=bpb)
    out2d = pl.pallas_call(
        kern,
        out_shape=jax.ShapeDtypeStruct((1, b * dp), jnp.float32),
        grid_spec=pltpu.PrefetchScalarGridSpec(
            num_scalar_prefetch=0,
            grid=(b * bpb,),
            in_specs=[
                pl.BlockSpec(memory_space=pltpu.MemorySpace.SMEM),
                pl.BlockSpec((k, dblk), lambda i: (0, i)),
                pl.BlockSpec((1, dblk), lambda i: (0, i)),
            ],
            out_specs=pl.BlockSpec((1, dblk), lambda i: (0, i)),
        ),
        input_output_aliases={2: 0},   # reuse the x buffer for the output
        compiler_params=pltpu.CompilerParams(
            dimension_semantics=("parallel",),
            vmem_limit_bytes=32 * 1024 * 1024,
        ),
    )(w_soft.astype(jnp.float32), res2d, x2d)
    return out2d.reshape(b, dp)[:, :d].reshape(b, t, n).astype(x.dtype)


# --------------------------------- glue --------------------------------------

def init_inception_params(key, in_ch, out_ch, num_kernels):
    """Deterministic kaiming_normal_(mode='fan_out', relu) weights, zero bias."""
    ws, bs = [], []
    for i in range(num_kernels):
        ksize = 2 * i + 1
        key, sub = jax.random.split(key)
        fan_out = out_ch * ksize * ksize
        std = float(np.sqrt(2.0 / fan_out))
        w = std * jax.random.normal(sub, (out_ch, in_ch, ksize, ksize),
                                    dtype=jnp.float32)
        b = jnp.zeros((out_ch,), jnp.float32)
        ws.append(w)
        bs.append(b)
    return ws, bs, key


def effective_pertap_weights(ws, bs):
    """mean_i conv(x, W_i) == conv(x, mean_i zero_pad(W_i)) by linearity.
    Pack per tap for the per-tap MXU accumulation: (Kmax*Kmax, Cin, Cout) bf16
    (no dead-channel padding)."""
    kmax = max(w.shape[-1] for w in ws)
    cout, cin = ws[0].shape[0], ws[0].shape[1]
    acc = jnp.zeros((kmax, kmax, cin, cout), jnp.float32)
    for w in ws:
        ksz = w.shape[-1]
        p0 = (kmax - ksz) // 2
        acc = acc.at[p0:p0 + ksz, p0:p0 + ksz].add(
            jnp.transpose(w, (2, 3, 1, 0)))
    acc = acc / len(ws)
    w_tap = acc.reshape(kmax * kmax, cin, cout).astype(jnp.bfloat16)
    b_eff = jnp.mean(jnp.stack(bs, axis=0), axis=0)
    b_eff = b_eff.reshape(1, cout).astype(jnp.float32)
    return w_tap, b_eff, kmax


def fft_for_period(x, k):
    # glue: rfft / top-k period selection has no Pallas equivalent.
    xf = jnp.fft.rfft(x, axis=1)
    amp = jnp.abs(xf)                          # (B, T//2+1, N)
    freq = amp.mean(axis=0).mean(axis=-1)      # (T//2+1,)
    freq = freq.at[0].set(0.0)
    _, top_idx = jax.lax.top_k(freq, k)
    period_weight = amp.mean(axis=-1)[:, top_idx]   # (B, k)
    return top_idx, period_weight


def _conv_for_period(xp, period, params):
    """Inception(d_model->d_ff) -> GELU -> Inception(d_ff->d_model), one period."""
    B, length, N = xp.shape
    k = params["kmax"]
    p = k // 2
    c1, c2 = params["c1"], params["c2"]            # real channel widths
    h, w = length // period, period
    hp, wp = h + 2 * p, w + 2 * p
    mo = h * wp                                    # pseudo-output rows
    mf = _round_up(hp * wp + 2 * p, 16)            # flattened slab rows (+ tail)

    # glue: build the zero-padded flattened slab (~1x data, bf16 MXU path).
    slab = xp.reshape(B, h, w, N)
    slab = jnp.pad(slab, ((0, 0), (p, p), (p, p), (0, 0)))
    flat = slab.reshape(B, hp * wp, c1)
    flat = jnp.pad(flat, ((0, 0), (0, mf - hp * wp), (0, 0)))
    flat = flat.astype(jnp.bfloat16)
    # TODO(synk): the wrap-row mask could be built in-kernel from an iota+mod
    # to drop this tiny operand, pending vector-int remainder lowering.
    mask = jnp.asarray(
        (np.arange(mo) % wp < w).astype(np.float32)).reshape(mo, 1)

    call = _build_conv_call(B, mf, mo, wp, k, c1, c2)
    y = call(flat, mask, params["w1"], params["b1"],
             params["w2"], params["b2"])
    # extract valid columns and fold back to (B, length, N); keep bf16 until
    # the f32-accumulating epilogue.
    y = y.reshape(B, h, wp, c1)[:, :, :w, :].reshape(B, length, N)
    return y


def times_block_forward(x, params, seq_len, pred_len, top_k):
    B, T, N = x.shape
    assert T == seq_len + pred_len
    top_idx, period_weight = fft_for_period(x, top_k)
    # TODO(synk): data-dependent periods are pulled to host (dynamic shapes);
    # real workloads should bucket periods to a fixed set so the cached Pallas
    # calls stay compile-hit and the device_get sync disappears.
    top_np = np.asarray(jax.device_get(top_idx))
    periods = [int(T // max(int(t), 1)) for t in top_np]

    res = []
    for period in periods:
        if T % period != 0:
            length = (T // period + 1) * period
            xp = jnp.concatenate(
                [x, jnp.zeros((B, length - T, N), x.dtype)], axis=1)
        else:
            xp = x
        y = _conv_for_period(xp, period, params)
        res.append(y[:, :T, :])

    res_stack = jnp.stack(res, axis=0)               # (k, B, T, N) bf16
    w_soft = jax.nn.softmax(period_weight, axis=1)   # (B, k)  tiny glue
    return weighted_residual_sum(w_soft, res_stack, x)


# --------------------------- pure-JAX reference ------------------------------

def _ref_inception(x_nchw, ws, bs):
    outs = []
    for w, b in zip(ws, bs):
        ksz = w.shape[-1]
        p = ksz // 2
        y = jax.lax.conv_general_dilated(
            x_nchw, w, window_strides=(1, 1), padding=[(p, p), (p, p)],
            dimension_numbers=("NCHW", "OIHW", "NCHW"),
            precision=jax.lax.Precision.HIGHEST)
        y = y + b[None, :, None, None]
        outs.append(y)
    return jnp.stack(outs, axis=-1).mean(axis=-1)


def reference_forward(x, raw_params, seq_len, pred_len, top_k):
    B, T, N = x.shape
    top_idx, period_weight = fft_for_period(x, top_k)
    top_np = np.asarray(jax.device_get(top_idx))
    periods = [int(T // max(int(t), 1)) for t in top_np]
    ws1, bs1, ws2, bs2 = raw_params
    res = []
    for period in periods:
        if T % period != 0:
            length = (T // period + 1) * period
            xp = jnp.concatenate(
                [x, jnp.zeros((B, length - T, N), x.dtype)], axis=1)
        else:
            length = T
            xp = x
        out = xp.reshape(B, length // period, period, N).transpose(0, 3, 1, 2)
        out = _ref_inception(out, ws1, bs1)
        out = 0.5 * out * (1.0 + jax.scipy.special.erf(out * 0.7071067811865476))
        out = _ref_inception(out, ws2, bs2)
        out = out.transpose(0, 2, 3, 1).reshape(B, length, N)[:, :T, :]
        res.append(out)
    res = jnp.stack(res, axis=-1)                    # (B, T, N, k)
    w = jax.nn.softmax(period_weight, axis=1)
    return jnp.sum(res * w[:, None, None, :], axis=-1) + x


# ----------------------------------- main ------------------------------------

if __name__ == "__main__":
    B = 2
    seq_len, pred_len = 12, 4
    d_model = 16
    d_ff = 16
    top_k = 2
    num_kernels = 3
    T = seq_len + pred_len

    key = jax.random.PRNGKey(0)
    kx, kp = jax.random.split(key)
    x = jax.random.normal(kx, (B, T, d_model), dtype=jnp.float32)

    ws1, bs1, kp = init_inception_params(kp, d_model, d_ff, num_kernels)
    ws2, bs2, kp = init_inception_params(kp, d_ff, d_model, num_kernels)

    w1, b1, kmax = effective_pertap_weights(ws1, bs1)
    w2, b2, kmax2 = effective_pertap_weights(ws2, bs2)
    assert kmax == kmax2
    params = dict(w1=w1, b1=b1, w2=w2, b2=b2, kmax=kmax, c1=d_model, c2=d_ff)

    out = times_block_forward(x, params, seq_len, pred_len, top_k)
    out = jax.block_until_ready(out)

    ref = reference_forward(x, (ws1, bs1, ws2, bs2), seq_len, pred_len, top_k)
    ref = jax.block_until_ready(ref)

    assert out.shape == (B, T, d_model)
    max_err = float(jnp.max(jnp.abs(out - ref)))
    assert np.allclose(np.asarray(out), np.asarray(ref),
                       rtol=5e-2, atol=5e-2), f"max abs err {max_err}"
    print("KERNEL_OK")
</pallas_src>

<mosaic_0001>
module attributes {stable_mosaic.version = 11 : i64} {
  func.func @_fused_timesblock_conv_kernel(%arg0: i32, %arg1: memref<1x80x16xbf16, #tpu.memory_space<vmem>>, %arg2: memref<48x1xf32, #tpu.memory_space<vmem>>, %arg3: memref<25x16x16xbf16, #tpu.memory_space<vmem>>, %arg4: memref<1x16xf32, #tpu.memory_space<vmem>>, %arg5: memref<25x16x16xbf16, #tpu.memory_space<vmem>>, %arg6: memref<1x16xf32, #tpu.memory_space<vmem>>, %arg7: memref<1x48x16xbf16, #tpu.memory_space<vmem>>, %arg8: memref<80x16xbf16, #tpu.memory_space<vmem>>) attributes {dimension_semantics = [#tpu.dimension_semantics<parallel>], iteration_bounds = array<i64: 2>, scalar_prefetch = 0 : i64, scratch_operands = 1 : i64, tpu.core_type = #tpu.core_type<tc>, window_params = [{transform_indices = @transform_0, window_bounds = array<i64: 1, 80, 16>}, {pipeline_mode = #tpu.pipeline_mode<synchronous>, transform_indices = @transform_1, window_bounds = array<i64: 48, 1>}, {pipeline_mode = #tpu.pipeline_mode<synchronous>, transform_indices = @transform_2, window_bounds = array<i64: 25, 16, 16>}, {pipeline_mode = #tpu.pipeline_mode<synchronous>, transform_indices = @transform_3, window_bounds = array<i64: 1, 16>}, {pipeline_mode = #tpu.pipeline_mode<synchronous>, transform_indices = @transform_4, window_bounds = array<i64: 25, 16, 16>}, {pipeline_mode = #tpu.pipeline_mode<synchronous>, transform_indices = @transform_5, window_bounds = array<i64: 1, 16>}, {transform_indices = @transform_6, window_bounds = array<i64: 1, 48, 16>}]} {
    %c0 = arith.constant 0 : index
    %c0_0 = arith.constant 0 : index
    %c0_1 = arith.constant 0 : index
    %0 = vector.load %arg1[%c0, %c0_0, %c0_1] : memref<1x80x16xbf16, #tpu.memory_space<vmem>>, vector<1x48x16xbf16>
    %1 = vector.shape_cast %0 : vector<1x48x16xbf16> to vector<48x16xbf16>
    %c0_2 = arith.constant 0 : index
    %c0_3 = arith.constant 0 : index
    %c0_4 = arith.constant 0 : index
    %2 = vector.load %arg3[%c0_2, %c0_3, %c0_4] : memref<25x16x16xbf16, #tpu.memory_space<vmem>>, vector<1x16x16xbf16>
    %3 = vector.shape_cast %2 : vector<1x16x16xbf16> to vector<16x16xbf16>
    %cst = arith.constant dense<0.000000e+00> : vector<48x16xf32>
    %4 = tpu.matmul %1, %3, %cst {dimension_numbers = #tpu.dot_dimension_numbers<[1], [0], [0], [1], [0, 0, 1, 1], [], []>} : vector<48x16xbf16>, vector<16x16xbf16>, vector<48x16xf32> -> vector<48x16xf32>
    %c0_5 = arith.constant 0 : index
    %c1 = arith.constant 1 : index
    %c0_6 = arith.constant 0 : index
    %5 = vector.load %arg1[%c0_5, %c1, %c0_6] : memref<1x80x16xbf16, #tpu.memory_space<vmem>>, vector<1x48x16xbf16>
    %6 = vector.shape_cast %5 : vector<1x48x16xbf16> to vector<48x16xbf16>
    %c1_7 = arith.constant 1 : index
    %c0_8 = arith.constant 0 : index
    %c0_9 = arith.constant 0 : index
    %7 = vector.load %arg3[%c1_7, %c0_8, %c0_9] : memref<25x16x16xbf16, #tpu.memory_space<vmem>>, vector<1x16x16xbf16>
    %8 = vector.shape_cast %7 : vector<1x16x16xbf16> to vector<16x16xbf16>
    %cst_10 = arith.constant dense<0.000000e+00> : vector<48x16xf32>
    %9 = tpu.matmul %6, %8, %cst_10 {dimension_numbers = #tpu.dot_dimension_numbers<[1], [0], [0], [1], [0, 0, 1, 1], [], []>} : vector<48x16xbf16>, vector<16x16xbf16>, vector<48x16xf32> -> vector<48x16xf32>
    %10 = arith.addf %4, %9 : vector<48x16xf32>
    %c0_11 = arith.constant 0 : index
    %c2 = arith.constant 2 : index
    %c0_12 = arith.constant 0 : index
    %11 = vector.load %arg1[%c0_11, %c2, %c0_12] : memref<1x80x16xbf16, #tpu.memory_space<vmem>>, vector<1x48x16xbf16>
    %12 = vector.shape_cast %11 : vector<1x48x16xbf16> to vector<48x16xbf16>
    %c2_13 = arith.constant 2 : index
    %c0_14 = arith.constant 0 : index
    %c0_15 = arith.constant 0 : index
    %13 = vector.load %arg3[%c2_13, %c0_14, %c0_15] : memref<25x16x16xbf16, #tpu.memory_space<vmem>>, vector<1x16x16xbf16>
    %14 = vector.shape_cast %13 : vector<1x16x16xbf16> to vector<16x16xbf16>
    %cst_16 = arith.constant dense<0.000000e+00> : vector<48x16xf32>
    %15 = tpu.matmul %12, %14, %cst_16 {dimension_numbers = #tpu.dot_dimension_numbers<[1], [0], [0], [1], [0, 0, 1, 1], [], []>} : vector<48x16xbf16>, vector<16x16xbf16>, vector<48x16xf32> -> vector<48x16xf32>
    %16 = arith.addf %10, %15 : vector<48x16xf32>
    %c0_17 = arith.constant 0 : index
    %c3 = arith.constant 3 : index
    %c0_18 = arith.constant 0 : index
    %17 = vector.load %arg1[%c0_17, %c3, %c0_18] : memref<1x80x16xbf16, #tpu.memory_space<vmem>>, vector<1x48x16xbf16>
    %18 = vector.shape_cast %17 : vector<1x48x16xbf16> to vector<48x16xbf16>
    %c3_19 = arith.constant 3 : index
    %c0_20 = arith.constant 0 : index
    %c0_21 = arith.constant 0 : index
    %19 = vector.load %arg3[%c3_19, %c0_20, %c0_21] : memref<25x16x16xbf16, #tpu.memory_space<vmem>>, vector<1x16x16xbf16>
    %20 = vector.shape_cast %19 : vector<1x16x16xbf16> to vector<16x16xbf16>
    %cst_22 = arith.constant dense<0.000000e+00> : vector<48x16xf32>
    %21 = tpu.matmul %18, %20, %cst_22 {dimension_numbers = #tpu.dot_dimension_numbers<[1], [0], [0], [1], [0, 0, 1, 1], [], []>} : vector<48x16xbf16>, vector<16x16xbf16>, vector<48x16xf32> -> vector<48x16xf32>
    %22 = arith.addf %16, %21 : vector<48x16xf32>
    %c0_23 = arith.constant 0 : index
    %c4 = arith.constant 4 : index
    %c0_24 = arith.constant 0 : index
    %23 = vector.load %arg1[%c0_23, %c4, %c0_24] : memref<1x80x16xbf16, #tpu.memory_space<vmem>>, vector<1x48x16xbf16>
    %24 = vector.shape_cast %23 : vector<1x48x16xbf16> to vector<48x16xbf16>
    %c4_25 = arith.constant 4 : index
    %c0_26 = arith.constant 0 : index
    %c0_27 = arith.constant 0 : index
    %25 = vector.load %arg3[%c4_25, %c0_26, %c0_27] : memref<25x16x16xbf16, #tpu.memory_space<vmem>>, vector<1x16x16xbf16>
    %26 = vector.shape_cast %25 : vector<1x16x16xbf16> to vector<16x16xbf16>
    %cst_28 = arith.constant dense<0.000000e+00> : vector<48x16xf32>
    %27 = tpu.matmul %24, %26, %cst_28 {dimension_numbers = #tpu.dot_dimension_numbers<[1], [0], [0], [1], [0, 0, 1, 1], [], []>} : vector<48x16xbf16>, vector<16x16xbf16>, vector<48x16xf32> -> vector<48x16xf32>
    %28 = arith.addf %22, %27 : vector<48x16xf32>
    %c0_29 = arith.constant 0 : index
    %c6 = arith.constant 6 : index
    %c0_30 = arith.constant 0 : index
    %29 = vector.load %arg1[%c0_29, %c6, %c0_30] : memref<1x80x16xbf16, #tpu.memory_space<vmem>>, vector<1x48x16xbf16>
    %30 = vector.shape_cast %29 : vector<1x48x16xbf16> to vector<48x16xbf16>
    %c5 = arith.constant 5 : index
    %c0_31 = arith.constant 0 : index
    %c0_32 = arith.constant 0 : index
    %31 = vector.load %arg3[%c5, %c0_31, %c0_32] : memref<25x16x16xbf16, #tpu.memory_space<vmem>>, vector<1x16x16xbf16>
    %32 = vector.shape_cast %31 : vector<1x16x16xbf16> to vector<16x16xbf16>
    %cst_33 = arith.constant dense<0.000000e+00> : vector<48x16xf32>
    %33 = tpu.matmul %30, %32, %cst_33 {dimension_numbers = #tpu.dot_dimension_numbers<[1], [0], [0], [1], [0, 0, 1, 1], [], []>} : vector<48x16xbf16>, vector<16x16xbf16>, vector<48x16xf32> -> vector<48x16xf32>
    %34 = arith.addf %28, %33 : vector<48x16xf32>
    %c0_34 = arith.constant 0 : index
    %c7 = arith.constant 7 : index
    %c0_35 = arith.constant 0 : index
    %35 = vector.load %arg1[%c0_34, %c7, %c0_35] : memref<1x80x16xbf16, #tpu.memory_space<vmem>>, vector<1x48x16xbf16>
    %36 = vector.shape_cast %35 : vector<1x48x16xbf16> to vector<48x16xbf16>
    %c6_36 = arith.constant 6 : index
    %c0_37 = arith.constant 0 : index
    %c0_38 = arith.constant 0 : index
    %37 = vector.load %arg3[%c6_36, %c0_37, %c0_38] : memref<25x16x16xbf16, #tpu.memory_space<vmem>>, vector<1x16x16xbf16>
    %38 = vector.shape_cast %37 : vector<1x16x16xbf16> to vector<16x16xbf16>
    %cst_39 = arith.constant dense<0.000000e+00> : vector<48x16xf32>
    %39 = tpu.matmul %36, %38, %cst_39 {dimension_numbers = #tpu.dot_dimension_numbers<[1], [0], [0], [1], [0, 0, 1, 1], [], []>} : vector<48x16xbf16>, vector<16x16xbf16>, vector<48x16xf32> -> vector<48x16xf32>
    %40 = arith.addf %34, %39 : vector<48x16xf32>
    %c0_40 = arith.constant 0 : index
    %c8 = arith.constant 8 : index
    %c0_41 = arith.constant 0 : index
    %41 = vector.load %arg1[%c0_40, %c8, %c0_41] : memref<1x80x16xbf16, #tpu.memory_space<vmem>>, vector<1x48x16xbf16>
    %42 = vector.shape_cast %41 : vector<1x48x16xbf16> to vector<48x16xbf16>
    %c7_42 = arith.constant 7 : index
    %c0_43 = arith.constant 0 : index
    %c0_44 = arith.constant 0 : index
    %43 = vector.load %arg3[%c7_42, %c0_43, %c0_44] : memref<25x16x16xbf16, #tpu.memory_space<vmem>>, vector<1x16x16xbf16>
    %44 = vector.shape_cast %43 : vector<1x16x16xbf16> to vector<16x16xbf16>
    %cst_45 = arith.constant dense<0.000000e+00> : vector<48x16xf32>
    %45 = tpu.matmul %42, %44, %cst_45 {dimension_numbers = #tpu.dot_dimension_numbers<[1], [0], [0], [1], [0, 0, 1, 1], [], []>} : vector<48x16xbf16>, vector<16x16xbf16>, vector<48x16xf32> -> vector<48x16xf32>
    %46 = arith.addf %40, %45 : vector<48x16xf32>
    %c0_46 = arith.constant 0 : index
    %c9 = arith.constant 9 : index
    %c0_47 = arith.constant 0 : index
    %47 = vector.load %arg1[%c0_46, %c9, %c0_47] : memref<1x80x16xbf16, #tpu.memory_space<vmem>>, vector<1x48x16xbf16>
    %48 = vector.shape_cast %47 : vector<1x48x16xbf16> to vector<48x16xbf16>
    %c8_48 = arith.constant 8 : index
    %c0_49 = arith.constant 0 : index
    %c0_50 = arith.constant 0 : index
    %49 = vector.load %arg3[%c8_48, %c0_49, %c0_50] : memref<25x16x16xbf16, #tpu.memory_space<vmem>>, vector<1x16x16xbf16>
    %50 = vector.shape_cast %49 : vector<1x16x16xbf16> to vector<16x16xbf16>
    %cst_51 = arith.constant dense<0.000000e+00> : vector<48x16xf32>
    %51 = tpu.matmul %48, %50, %cst_51 {dimension_numbers = #tpu.dot_dimension_numbers<[1], [0], [0], [1], [0, 0, 1, 1], [], []>} : vector<48x16xbf16>, vector<16x16xbf16>, vector<48x16xf32> -> vector<48x16xf32>
    %52 = arith.addf %46, %51 : vector<48x16xf32>
    %c0_52 = arith.constant 0 : index
    %c10 = arith.constant 10 : index
    %c0_53 = arith.constant 0 : index
    %53 = vector.load %arg1[%c0_52, %c10, %c0_53] : memref<1x80x16xbf16, #tpu.memory_space<vmem>>, vector<1x48x16xbf16>
    %54 = vector.shape_cast %53 : vector<1x48x16xbf16> to vector<48x16xbf16>
    %c9_54 = arith.constant 9 : index
    %c0_55 = arith.constant 0 : index
    %c0_56 = arith.constant 0 : index
    %55 = vector.load %arg3[%c9_54, %c0_55, %c0_56] : memref<25x16x16xbf16, #tpu.memory_space<vmem>>, vector<1x16x16xbf16>
    %56 = vector.shape_cast %55 : vector<1x16x16xbf16> to vector<16x16xbf16>
    %cst_57 = arith.constant dense<0.000000e+00> : vector<48x16xf32>
    %57 = tpu.matmul %54, %56, %cst_57 {dimension_numbers = #tpu.dot_dimension_numbers<[1], [0], [0], [1], [0, 0, 1, 1], [], []>} : vector<48x16xbf16>, vector<16x16xbf16>, vector<48x16xf32> -> vector<48x16xf32>
    %58 = arith.addf %52, %57 : vector<48x16xf32>
    %c0_58 = arith.constant 0 : index
    %c12 = arith.constant 12 : index
    %c0_59 = arith.constant 0 : index
    %59 = vector.load %arg1[%c0_58, %c12, %c0_59] : memref<1x80x16xbf16, #tpu.memory_space<vmem>>, vector<1x48x16xbf16>
    %60 = vector.shape_cast %59 : vector<1x48x16xbf16> to vector<48x16xbf16>
    %c10_60 = arith.constant 10 : index
    %c0_61 = arith.constant 0 : index
    %c0_62 = arith.constant 0 : index
    %61 = vector.load %arg3[%c10_60, %c0_61, %c0_62] : memref<25x16x16xbf16, #tpu.memory_space<vmem>>, vector<1x16x16xbf16>
    %62 = vector.shape_cast %61 : vector<1x16x16xbf16> to vector<16x16xbf16>
    %cst_63 = arith.constant dense<0.000000e+00> : vector<48x16xf32>
    %63 = tpu.matmul %60, %62, %cst_63 {dimension_numbers = #tpu.dot_dimension_numbers<[1], [0], [0], [1], [0, 0, 1, 1], [], []>} : vector<48x16xbf16>, vector<16x16xbf16>, vector<48x16xf32> -> vector<48x16xf32>
    %64 = arith.addf %58, %63 : vector<48x16xf32>
    %c0_64 = arith.constant 0 : index
    %c13 = arith.constant 13 : index
    %c0_65 = arith.constant 0 : index
    %65 = vector.load %arg1[%c0_64, %c13, %c0_65] : memref<1x80x16xbf16, #tpu.memory_space<vmem>>, vector<1x48x16xbf16>
    %66 = vector.shape_cast %65 : vector<1x48x16xbf16> to vector<48x16xbf16>
    %c11 = arith.constant 11 : index
    %c0_66 = arith.constant 0 : index
    %c0_67 = arith.constant 0 : index
    %67 = vector.load %arg3[%c11, %c0_66, %c0_67] : memref<25x16x16xbf16, #tpu.memory_space<vmem>>, vector<1x16x16xbf16>
    %68 = vector.shape_cast %67 : vector<1x16x16xbf16> to vector<16x16xbf16>
    %cst_68 = arith.constant dense<0.000000e+00> : vector<48x16xf32>
    %69 = tpu.matmul %66, %68, %cst_68 {dimension_numbers = #tpu.dot_dimension_numbers<[1], [0], [0], [1], [0, 0, 1, 1], [], []>} : vector<48x16xbf16>, vector<16x16xbf16>, vector<48x16xf32> -> vector<48x16xf32>
    %70 = arith.addf %64, %69 : vector<48x16xf32>
    %c0_69 = arith.constant 0 : index
    %c14 = arith.constant 14 : index
    %c0_70 = arith.constant 0 : index
    %71 = vector.load %arg1[%c0_69, %c14, %c0_70] : memref<1x80x16xbf16, #tpu.memory_space<vmem>>, vector<1x48x16xbf16>
    %72 = vector.shape_cast %71 : vector<1x48x16xbf16> to vector<48x16xbf16>
    %c12_71 = arith.constant 12 : index
    %c0_72 = arith.constant 0 : index
    %c0_73 = arith.constant 0 : index
    %73 = vector.load %arg3[%c12_71, %c0_72, %c0_73] : memref<25x16x16xbf16, #tpu.memory_space<vmem>>, vector<1x16x16xbf16>
    %74 = vector.shape_cast %73 : vector<1x16x16xbf16> to vector<16x16xbf16>
    %cst_74 = arith.constant dense<0.000000e+00> : vector<48x16xf32>
    %75 = tpu.matmul %72, %74, %cst_74 {dimension_numbers = #tpu.dot_dimension_numbers<[1], [0], [0], [1], [0, 0, 1, 1], [], []>} : vector<48x16xbf16>, vector<16x16xbf16>, vector<48x16xf32> -> vector<48x16xf32>
    %76 = arith.addf %70, %75 : vector<48x16xf32>
    %c0_75 = arith.constant 0 : index
    %c15 = arith.constant 15 : index
    %c0_76 = arith.constant 0 : index
    %77 = vector.load %arg1[%c0_75, %c15, %c0_76] : memref<1x80x16xbf16, #tpu.memory_space<vmem>>, vector<1x48x16xbf16>
    %78 = vector.shape_cast %77 : vector<1x48x16xbf16> to vector<48x16xbf16>
    %c13_77 = arith.constant 13 : index
    %c0_78 = arith.constant 0 : index
    %c0_79 = arith.constant 0 : index
    %79 = vector.load %arg3[%c13_77, %c0_78, %c0_79] : memref<25x16x16xbf16, #tpu.memory_space<vmem>>, vector<1x16x16xbf16>
    %80 = vector.shape_cast %79 : vector<1x16x16xbf16> to vector<16x16xbf16>
    %cst_80 = arith.constant dense<0.000000e+00> : vector<48x16xf32>
    %81 = tpu.matmul %78, %80, %cst_80 {dimension_numbers = #tpu.dot_dimension_numbers<[1], [0], [0], [1], [0, 0, 1, 1], [], []>} : vector<48x16xbf16>, vector<16x16xbf16>, vector<48x16xf32> -> vector<48x16xf32>
    %82 = arith.addf %76, %81 : vector<48x16xf32>
    %c0_81 = arith.constant 0 : index
    %c16 = arith.constant 16 : index
    %c0_82 = arith.constant 0 : index
    %83 = vector.load %arg1[%c0_81, %c16, %c0_82] : memref<1x80x16xbf16, #tpu.memory_space<vmem>>, vector<1x48x16xbf16>
    %84 = vector.shape_cast %83 : vector<1x48x16xbf16> to vector<48x16xbf16>
    %c14_83 = arith.constant 14 : index
    %c0_84 = arith.constant 0 : index
    %c0_85 = arith.constant 0 : index
    %85 = vector.load %arg3[%c14_83, %c0_84, %c0_85] : memref<25x16x16xbf16, #tpu.memory_space<vmem>>, vector<1x16x16xbf16>
    %86 = vector.shape_cast %85 : vector<1x16x16xbf16> to vector<16x16xbf16>
    %cst_86 = arith.constant dense<0.000000e+00> : vector<48x16xf32>
    %87 = tpu.matmul %84, %86, %cst_86 {dimension_numbers = #tpu.dot_dimension_numbers<[1], [0], [0], [1], [0, 0, 1, 1], [], []>} : vector<48x16xbf16>, vector<16x16xbf16>, vector<48x16xf32> -> vector<48x16xf32>
    %88 = arith.addf %82, %87 : vector<48x16xf32>
    %c0_87 = arith.constant 0 : index
    %c18 = arith.constant 18 : index
    %c0_88 = arith.constant 0 : index
    %89 = vector.load %arg1[%c0_87, %c18, %c0_88] : memref<1x80x16xbf16, #tpu.memory_space<vmem>>, vector<1x48x16xbf16>
    %90 = vector.shape_cast %89 : vector<1x48x16xbf16> to vector<48x16xbf16>
    %c15_89 = arith.constant 15 : index
    %c0_90 = arith.constant 0 : index
    %c0_91 = arith.constant 0 : index
    %91 = vector.load %arg3[%c15_89, %c0_90, %c0_91] : memref<25x16x16xbf16, #tpu.memory_space<vmem>>, vector<1x16x16xbf16>
    %92 = vector.shape_cast %91 : vector<1x16x16xbf16> to vector<16x16xbf16>
    %cst_92 = arith.constant dense<0.000000e+00> : vector<48x16xf32>
    %93 = tpu.matmul %90, %92, %cst_92 {dimension_numbers = #tpu.dot_dimension_numbers<[1], [0], [0], [1], [0, 0, 1, 1], [], []>} : vector<48x16xbf16>, vector<16x16xbf16>, vector<48x16xf32> -> vector<48x16xf32>
    %94 = arith.addf %88, %93 : vector<48x16xf32>
    %c0_93 = arith.constant 0 : index
    %c19 = arith.constant 19 : index
    %c0_94 = arith.constant 0 : index
    %95 = vector.load %arg1[%c0_93, %c19, %c0_94] : memref<1x80x16xbf16, #tpu.memory_space<vmem>>, vector<1x48x16xbf16>
    %96 = vector.shape_cast %95 : vector<1x48x16xbf16> to vector<48x16xbf16>
    %c16_95 = arith.constant 16 : index
    %c0_96 = arith.constant 0 : index
    %c0_97 = arith.constant 0 : index
    %97 = vector.load %arg3[%c16_95, %c0_96, %c0_97] : memref<25x16x16xbf16, #tpu.memory_space<vmem>>, vector<1x16x16xbf16>
    %98 = vector.shape_cast %97 : vector<1x16x16xbf16> to vector<16x16xbf16>
    %cst_98 = arith.constant dense<0.000000e+00> : vector<48x16xf32>
    %99 = tpu.matmul %96, %98, %cst_98 {dimension_numbers = #tpu.dot_dimension_numbers<[1], [0], [0], [1], [0, 0, 1, 1], [], []>} : vector<48x16xbf16>, vector<16x16xbf16>, vector<48x16xf32> -> vector<48x16xf32>
    %100 = arith.addf %94, %99 : vector<48x16xf32>
    %c0_99 = arith.constant 0 : index
    %c20 = arith.constant 20 : index
    %c0_100 = arith.constant 0 : index
    %101 = vector.load %arg1[%c0_99, %c20, %c0_100] : memref<1x80x16xbf16, #tpu.memory_space<vmem>>, vector<1x48x16xbf16>
    %102 = vector.shape_cast %101 : vector<1x48x16xbf16> to vector<48x16xbf16>
    %c17 = arith.constant 17 : index
    %c0_101 = arith.constant 0 : index
    %c0_102 = arith.constant 0 : index
    %103 = vector.load %arg3[%c17, %c0_101, %c0_102] : memref<25x16x16xbf16, #tpu.memory_space<vmem>>, vector<1x16x16xbf16>
    %104 = vector.shape_cast %103 : vector<1x16x16xbf16> to vector<16x16xbf16>
    %cst_103 = arith.constant dense<0.000000e+00> : vector<48x16xf32>
    %105 = tpu.matmul %102, %104, %cst_103 {dimension_numbers = #tpu.dot_dimension_numbers<[1], [0], [0], [1], [0, 0, 1, 1], [], []>} : vector<48x16xbf16>, vector<16x16xbf16>, vector<48x16xf32> -> vector<48x16xf32>
    %106 = arith.addf %100, %105 : vector<48x16xf32>
    %c0_104 = arith.constant 0 : index
    %c21 = arith.constant 21 : index
    %c0_105 = arith.constant 0 : index
    %107 = vector.load %arg1[%c0_104, %c21, %c0_105] : memref<1x80x16xbf16, #tpu.memory_space<vmem>>, vector<1x48x16xbf16>
    %108 = vector.shape_cast %107 : vector<1x48x16xbf16> to vector<48x16xbf16>
    %c18_106 = arith.constant 18 : index
    %c0_107 = arith.constant 0 : index
    %c0_108 = arith.constant 0 : index
    %109 = vector.load %arg3[%c18_106, %c0_107, %c0_108] : memref<25x16x16xbf16, #tpu.memory_space<vmem>>, vector<1x16x16xbf16>
    %110 = vector.shape_cast %109 : vector<1x16x16xbf16> to vector<16x16xbf16>
    %cst_109 = arith.constant dense<0.000000e+00> : vector<48x16xf32>
    %111 = tpu.matmul %108, %110, %cst_109 {dimension_numbers = #tpu.dot_dimension_numbers<[1], [0], [0], [1], [0, 0, 1, 1], [], []>} : vector<48x16xbf16>, vector<16x16xbf16>, vector<48x16xf32> -> vector<48x16xf32>
    %112 = arith.addf %106, %111 : vector<48x16xf32>
    %c0_110 = arith.constant 0 : index
    %c22 = arith.constant 22 : index
    %c0_111 = arith.constant 0 : index
    %113 = vector.load %arg1[%c0_110, %c22, %c0_111] : memref<1x80x16xbf16, #tpu.memory_space<vmem>>, vector<1x48x16xbf16>
    %114 = vector.shape_cast %113 : vector<1x48x16xbf16> to vector<48x16xbf16>
    %c19_112 = arith.constant 19 : index
    %c0_113 = arith.constant 0 : index
    %c0_114 = arith.constant 0 : index
    %115 = vector.load %arg3[%c19_112, %c0_113, %c0_114] : memref<25x16x16xbf16, #tpu.memory_space<vmem>>, vector<1x16x16xbf16>
    %116 = vector.shape_cast %115 : vector<1x16x16xbf16> to vector<16x16xbf16>
    %cst_115 = arith.constant dense<0.000000e+00> : vector<48x16xf32>
    %117 = tpu.matmul %114, %116, %cst_115 {dimension_numbers = #tpu.dot_dimension_numbers<[1], [0], [0], [1], [0, 0, 1, 1], [], []>} : vector<48x16xbf16>, vector<16x16xbf16>, vector<48x16xf32> -> vector<48x16xf32>
    %118 = arith.addf %112, %117 : vector<48x16xf32>
    %c0_116 = arith.constant 0 : index
    %c24 = arith.constant 24 : index
    %c0_117 = arith.constant 0 : index
    %119 = vector.load %arg1[%c0_116, %c24, %c0_117] : memref<1x80x16xbf16, #tpu.memory_space<vmem>>, vector<1x48x16xbf16>
    %120 = vector.shape_cast %119 : vector<1x48x16xbf16> to vector<48x16xbf16>
    %c20_118 = arith.constant 20 : index
    %c0_119 = arith.constant 0 : index
    %c0_120 = arith.constant 0 : index
    %121 = vector.load %arg3[%c20_118, %c0_119, %c0_120] : memref<25x16x16xbf16, #tpu.memory_space<vmem>>, vector<1x16x16xbf16>
    %122 = vector.shape_cast %121 : vector<1x16x16xbf16> to vector<16x16xbf16>
    %cst_121 = arith.constant dense<0.000000e+00> : vector<48x16xf32>
    %123 = tpu.matmul %120, %122, %cst_121 {dimension_numbers = #tpu.dot_dimension_numbers<[1], [0], [0], [1], [0, 0, 1, 1], [], []>} : vector<48x16xbf16>, vector<16x16xbf16>, vector<48x16xf32> -> vector<48x16xf32>
    %124 = arith.addf %118, %123 : vector<48x16xf32>
    %c0_122 = arith.constant 0 : index
    %c25 = arith.constant 25 : index
    %c0_123 = arith.constant 0 : index
    %125 = vector.load %arg1[%c0_122, %c25, %c0_123] : memref<1x80x16xbf16, #tpu.memory_space<vmem>>, vector<1x48x16xbf16>
    %126 = vector.shape_cast %125 : vector<1x48x16xbf16> to vector<48x16xbf16>
    %c21_124 = arith.constant 21 : index
    %c0_125 = arith.constant 0 : index
    %c0_126 = arith.constant 0 : index
    %127 = vector.load %arg3[%c21_124, %c0_125, %c0_126] : memref<25x16x16xbf16, #tpu.memory_space<vmem>>, vector<1x16x16xbf16>
    %128 = vector.shape_cast %127 : vector<1x16x16xbf16> to vector<16x16xbf16>
    %cst_127 = arith.constant dense<0.000000e+00> : vector<48x16xf32>
    %129 = tpu.matmul %126, %128, %cst_127 {dimension_numbers = #tpu.dot_dimension_numbers<[1], [0], [0], [1], [0, 0, 1, 1], [], []>} : vector<48x16xbf16>, vector<16x16xbf16>, vector<48x16xf32> -> vector<48x16xf32>
    %130 = arith.addf %124, %129 : vector<48x16xf32>
    %c0_128 = arith.constant 0 : index
    %c26 = arith.constant 26 : index
    %c0_129 = arith.constant 0 : index
    %131 = vector.load %arg1[%c0_128, %c26, %c0_129] : memref<1x80x16xbf16, #tpu.memory_space<vmem>>, vector<1x48x16xbf16>
    %132 = vector.shape_cast %131 : vector<1x48x16xbf16> to vector<48x16xbf16>
    %c22_130 = arith.constant 22 : index
    %c0_131 = arith.constant 0 : index
    %c0_132 = arith.constant 0 : index
    %133 = vector.load %arg3[%c22_130, %c0_131, %c0_132] : memref<25x16x16xbf16, #tpu.memory_space<vmem>>, vector<1x16x16xbf16>
    %134 = vector.shape_cast %133 : vector<1x16x16xbf16> to vector<16x16xbf16>
    %cst_133 = arith.constant dense<0.000000e+00> : vector<48x16xf32>
    %135 = tpu.matmul %132, %134, %cst_133 {dimension_numbers = #tpu.dot_dimension_numbers<[1], [0], [0], [1], [0, 0, 1, 1], [], []>} : vector<48x16xbf16>, vector<16x16xbf16>, vector<48x16xf32> -> vector<48x16xf32>
    %136 = arith.addf %130, %135 : vector<48x16xf32>
    %c0_134 = arith.constant 0 : index
    %c27 = arith.constant 27 : index
    %c0_135 = arith.constant 0 : index
    %137 = vector.load %arg1[%c0_134, %c27, %c0_135] : memref<1x80x16xbf16, #tpu.memory_space<vmem>>, vector<1x48x16xbf16>
    %138 = vector.shape_cast %137 : vector<1x48x16xbf16> to vector<48x16xbf16>
    %c23 = arith.constant 23 : index
    %c0_136 = arith.constant 0 : index
    %c0_137 = arith.constant 0 : index
    %139 = vector.load %arg3[%c23, %c0_136, %c0_137] : memref<25x16x16xbf16, #tpu.memory_space<vmem>>, vector<1x16x16xbf16>
    %140 = vector.shape_cast %139 : vector<1x16x16xbf16> to vector<16x16xbf16>
    %cst_138 = arith.constant dense<0.000000e+00> : vector<48x16xf32>
    %141 = tpu.matmul %138, %140, %cst_138 {dimension_numbers = #tpu.dot_dimension_numbers<[1], [0], [0], [1], [0, 0, 1, 1], [], []>} : vector<48x16xbf16>, vector<16x16xbf16>, vector<48x16xf32> -> vector<48x16xf32>
    %142 = arith.addf %136, %141 : vector<48x16xf32>
    %c0_139 = arith.constant 0 : index
    %c28 = arith.constant 28 : index
    %c0_140 = arith.constant 0 : index
    %143 = vector.load %arg1[%c0_139, %c28, %c0_140] : memref<1x80x16xbf16, #tpu.memory_space<vmem>>, vector<1x48x16xbf16>
    %144 = vector.shape_cast %143 : vector<1x48x16xbf16> to vector<48x16xbf16>
    %c24_141 = arith.constant 24 : index
    %c0_142 = arith.constant 0 : index
    %c0_143 = arith.constant 0 : index
    %145 = vector.load %arg3[%c24_141, %c0_142, %c0_143] : memref<25x16x16xbf16, #tpu.memory_space<vmem>>, vector<1x16x16xbf16>
    %146 = vector.shape_cast %145 : vector<1x16x16xbf16> to vector<16x16xbf16>
    %cst_144 = arith.constant dense<0.000000e+00> : vector<48x16xf32>
    %147 = tpu.matmul %144, %146, %cst_144 {dimension_numbers = #tpu.dot_dimension_numbers<[1], [0], [0], [1], [0, 0, 1, 1], [], []>} : vector<48x16xbf16>, vector<16x16xbf16>, vector<48x16xf32> -> vector<48x16xf32>
    %148 = arith.addf %142, %147 : vector<48x16xf32>
    %c0_145 = arith.constant 0 : index
    %c0_146 = arith.constant 0 : index
    %149 = vector.load %arg4[%c0_145, %c0_146] : memref<1x16xf32, #tpu.memory_space<vmem>>, vector<1x16xf32>
    %150 = vector.broadcast %149 : vector<1x16xf32> to vector<48x16xf32>
    %151 = arith.addf %148, %150 : vector<48x16xf32>
    %cst_147 = arith.constant 5.000000e-01 : f32
    %152 = vector.broadcast %cst_147 : f32 to vector<48x16xf32>
    %153 = arith.mulf %152, %151 : vector<48x16xf32>
    %cst_148 = arith.constant 4.471500e-02 : f32
    %154 = vector.broadcast %cst_148 : f32 to vector<48x16xf32>
    %155 = arith.mulf %154, %151 : vector<48x16xf32>
    %156 = arith.mulf %155, %151 : vector<48x16xf32>
    %157 = arith.mulf %156, %151 : vector<48x16xf32>
    %158 = arith.addf %151, %157 : vector<48x16xf32>
    %cst_149 = arith.constant 0.797884583 : f32
    %159 = vector.broadcast %cst_149 : f32 to vector<48x16xf32>
    %160 = arith.mulf %159, %158 : vector<48x16xf32>
    %161 = math.tanh %160 : vector<48x16xf32>
    %cst_150 = arith.constant 1.000000e+00 : f32
    %162 = vector.broadcast %cst_150 : f32 to vector<48x16xf32>
    %163 = arith.addf %162, %161 : vector<48x16xf32>
    %164 = arith.mulf %153, %163 : vector<48x16xf32>
    %c0_151 = arith.constant 0 : index
    %c0_152 = arith.constant 0 : index
    %165 = vector.load %arg2[%c0_151, %c0_152] : memref<48x1xf32, #tpu.memory_space<vmem>>, vector<48x1xf32>
    %166 = vector.broadcast %165 : vector<48x1xf32> to vector<48x16xf32>
    %167 = arith.mulf %164, %166 : vector<48x16xf32>
    %cst_153 = arith.constant 0.000000e+00 : bf16
    %168 = vector.broadcast %cst_153 : bf16 to vector<14x16xbf16>
    %c0_154 = arith.constant 0 : index
    %c0_155 = arith.constant 0 : index
    %169 = vector.load %arg8[%c0_154, %c0_155] : memref<80x16xbf16, #tpu.memory_space<vmem>>, vector<14x16xbf16>
    tpu.vector_store %arg8[%c0_154, %c0_155], %168 {strides = array<i32>} : memref<80x16xbf16, #tpu.memory_space<vmem>>, vector<14x16xbf16>,
    %cst_156 = arith.constant 0.000000e+00 : bf16
    %170 = vector.broadcast %cst_156 : bf16 to vector<18x16xbf16>
    %c62 = arith.constant 62 : index
    %c0_157 = arith.constant 0 : index
    %171 = vector.load %arg8[%c62, %c0_157] : memref<80x16xbf16, #tpu.memory_space<vmem>>, vector<18x16xbf16>
    tpu.vector_store %arg8[%c62, %c0_157], %170 {strides = array<i32>} : memref<80x16xbf16, #tpu.memory_space<vmem>>, vector<18x16xbf16>,
    %172 = arith.truncf %167 : vector<48x16xf32> to vector<48x16xbf16>
    %c14_158 = arith.constant 14 : index
    %c0_159 = arith.constant 0 : index
    %173 = vector.load %arg8[%c14_158, %c0_159] : memref<80x16xbf16, #tpu.memory_space<vmem>>, vector<48x16xbf16>
    tpu.vector_store %arg8[%c14_158, %c0_159], %172 {strides = array<i32>} : memref<80x16xbf16, #tpu.memory_space<vmem>>, vector<48x16xbf16>,
    %c0_160 = arith.constant 0 : index
    %c0_161 = arith.constant 0 : index
    %174 = vector.load %arg8[%c0_160, %c0_161] : memref<80x16xbf16, #tpu.memory_space<vmem>>, vector<48x16xbf16>
    %c0_162 = arith.constant 0 : index
    %c0_163 = arith.constant 0 : index
    %c0_164 = arith.constant 0 : index
    %175 = vector.load %arg5[%c0_162, %c0_163, %c0_164] : memref<25x16x16xbf16, #tpu.memory_space<vmem>>, vector<1x16x16xbf16>
    %176 = vector.shape_cast %175 : vector<1x16x16xbf16> to vector<16x16xbf16>
    %cst_165 = arith.constant dense<0.000000e+00> : vector<48x16xf32>
    %177 = tpu.matmul %174, %176, %cst_165 {dimension_numbers = #tpu.dot_dimension_numbers<[1], [0], [0], [1], [0, 0, 1, 1], [], []>} : vector<48x16xbf16>, vector<16x16xbf16>, vector<48x16xf32> -> vector<48x16xf32>
    %c1_166 = arith.constant 1 : index
    %c0_167 = arith.constant 0 : index
    %178 = vector.load %arg8[%c1_166, %c0_167] : memref<80x16xbf16, #tpu.memory_space<vmem>>, vector<48x16xbf16>
    %c1_168 = arith.constant 1 : index
    %c0_169 = arith.constant 0 : index
    %c0_170 = arith.constant 0 : index
    %179 = vector.load %arg5[%c1_168, %c0_169, %c0_170] : memref<25x16x16xbf16, #tpu.memory_space<vmem>>, vector<1x16x16xbf16>
    %180 = vector.shape_cast %179 : vector<1x16x16xbf16> to vector<16x16xbf16>
    %cst_171 = arith.constant dense<0.000000e+00> : vector<48x16xf32>
    %181 = tpu.matmul %178, %180, %cst_171 {dimension_numbers = #tpu.dot_dimension_numbers<[1], [0], [0], [1], [0, 0, 1, 1], [], []>} : vector<48x16xbf16>, vector<16x16xbf16>, vector<48x16xf32> -> vector<48x16xf32>
    %182 = arith.addf %177, %181 : vector<48x16xf32>
    %c2_172 = arith.constant 2 : index
    %c0_173 = arith.constant 0 : index
    %183 = vector.load %arg8[%c2_172, %c0_173] : memref<80x16xbf16, #tpu.memory_space<vmem>>, vector<48x16xbf16>
    %c2_174 = arith.constant 2 : index
    %c0_175 = arith.constant 0 : index
    %c0_176 = arith.constant 0 : index
    %184 = vector.load %arg5[%c2_174, %c0_175, %c0_176] : memref<25x16x16xbf16, #tpu.memory_space<vmem>>, vector<1x16x16xbf16>
    %185 = vector.shape_cast %184 : vector<1x16x16xbf16> to vector<16x16xbf16>
    %cst_177 = arith.constant dense<0.000000e+00> : vector<48x16xf32>
    %186 = tpu.matmul %183, %185, %cst_177 {dimension_numbers = #tpu.dot_dimension_numbers<[1], [0], [0], [1], [0, 0, 1, 1], [], []>} : vector<48x16xbf16>, vector<16x16xbf16>, vector<48x16xf32> -> vector<48x16xf32>
    %187 = arith.addf %182, %186 : vector<48x16xf32>
    %c3_178 = arith.constant 3 : index
    %c0_179 = arith.constant 0 : index
    %188 = vector.load %arg8[%c3_178, %c0_179] : memref<80x16xbf16, #tpu.memory_space<vmem>>, vector<48x16xbf16>
    %c3_180 = arith.constant 3 : index
    %c0_181 = arith.constant 0 : index
    %c0_182 = arith.constant 0 : index
    %189 = vector.load %arg5[%c3_180, %c0_181, %c0_182] : memref<25x16x16xbf16, #tpu.memory_space<vmem>>, vector<1x16x16xbf16>
    %190 = vector.shape_cast %189 : vector<1x16x16xbf16> to vector<16x16xbf16>
    %cst_183 = arith.constant dense<0.000000e+00> : vector<48x16xf32>
    %191 = tpu.matmul %188, %190, %cst_183 {dimension_numbers = #tpu.dot_dimension_numbers<[1], [0], [0], [1], [0, 0, 1, 1], [], []>} : vector<48x16xbf16>, vector<16x16xbf16>, vector<48x16xf32> -> vector<48x16xf32>
    %192 = arith.addf %187, %191 : vector<48x16xf32>
    %c4_184 = arith.constant 4 : index
    %c0_185 = arith.constant 0 : index
    %193 = vector.load %arg8[%c4_184, %c0_185] : memref<80x16xbf16, #tpu.memory_space<vmem>>, vector<48x16xbf16>
    %c4_186 = arith.constant 4 : index
    %c0_187 = arith.constant 0 : index
    %c0_188 = arith.constant 0 : index
    %194 = vector.load %arg5[%c4_186, %c0_187, %c0_188] : memref<25x16x16xbf16, #tpu.memory_space<vmem>>, vector<1x16x16xbf16>
    %195 = vector.shape_cast %194 : vector<1x16x16xbf16> to vector<16x16xbf16>
    %cst_189 = arith.constant dense<0.000000e+00> : vector<48x16xf32>
    %196 = tpu.matmul %193, %195, %cst_189 {dimension_numbers = #tpu.dot_dimension_numbers<[1], [0], [0], [1], [0, 0, 1, 1], [], []>} : vector<48x16xbf16>, vector<16x16xbf16>, vector<48x16xf32> -> vector<48x16xf32>
    %197 = arith.addf %192, %196 : vector<48x16xf32>
    %c6_190 = arith.constant 6 : index
    %c0_191 = arith.constant 0 : index
    %198 = vector.load %arg8[%c6_190, %c0_191] : memref<80x16xbf16, #tpu.memory_space<vmem>>, vector<48x16xbf16>
    %c5_192 = arith.constant 5 : index
    %c0_193 = arith.constant 0 : index
    %c0_194 = arith.constant 0 : index
    %199 = vector.load %arg5[%c5_192, %c0_193, %c0_194] : memref<25x16x16xbf16, #tpu.memory_space<vmem>>, vector<1x16x16xbf16>
    %200 = vector.shape_cast %199 : vector<1x16x16xbf16> to vector<16x16xbf16>
    %cst_195 = arith.constant dense<0.000000e+00> : vector<48x16xf32>
    %201 = tpu.matmul %198, %200, %cst_195 {dimension_numbers = #tpu.dot_dimension_numbers<[1], [0], [0], [1], [0, 0, 1, 1], [], []>} : vector<48x16xbf16>, vector<16x16xbf16>, vector<48x16xf32> -> vector<48x16xf32>
    %202 = arith.addf %197, %201 : vector<48x16xf32>
    %c7_196 = arith.constant 7 : index
    %c0_197 = arith.constant 0 : index
    %203 = vector.load %arg8[%c7_196, %c0_197] : memref<80x16xbf16, #tpu.memory_space<vmem>>, vector<48x16xbf16>
    %c6_198 = arith.constant 6 : index
    %c0_199 = arith.constant 0 : index
    %c0_200 = arith.constant 0 : index
    %204 = vector.load %arg5[%c6_198, %c0_199, %c0_200] : memref<25x16x16xbf16, #tpu.memory_space<vmem>>, vector<1x16x16xbf16>
    %205 = vector.shape_cast %204 : vector<1x16x16xbf16> to vector<16x16xbf16>
    %cst_201 = arith.constant dense<0.000000e+00> : vector<48x16xf32>
    %206 = tpu.matmul %203, %205, %cst_201 {dimension_numbers = #tpu.dot_dimension_numbers<[1], [0], [0], [1], [0, 0, 1, 1], [], []>} : vector<48x16xbf16>, vector<16x16xbf16>, vector<48x16xf32> -> vector<48x16xf32>
    %207 = arith.addf %202, %206 : vector<48x16xf32>
    %c8_202 = arith.constant 8 : index
    %c0_203 = arith.constant 0 : index
    %208 = vector.load %arg8[%c8_202, %c0_203] : memref<80x16xbf16, #tpu.memory_space<vmem>>, vector<48x16xbf16>
    %c7_204 = arith.constant 7 : index
    %c0_205 = arith.constant 0 : index
    %c0_206 = arith.constant 0 : index
    %209 = vector.load %arg5[%c7_204, %c0_205, %c0_206] : memref<25x16x16xbf16, #tpu.memory_space<vmem>>, vector<1x16x16xbf16>
    %210 = vector.shape_cast %209 : vector<1x16x16xbf16> to vector<16x16xbf16>
    %cst_207 = arith.constant dense<0.000000e+00> : vector<48x16xf32>
    %211 = tpu.matmul %208, %210, %cst_207 {dimension_numbers = #tpu.dot_dimension_numbers<[1], [0], [0], [1], [0, 0, 1, 1], [], []>} : vector<48x16xbf16>, vector<16x16xbf16>, vector<48x16xf32> -> vector<48x16xf32>
    %212 = arith.addf %207, %211 : vector<48x16xf32>
    %c9_208 = arith.constant 9 : index
    %c0_209 = arith.constant 0 : index
    %213 = vector.load %arg8[%c9_208, %c0_209] : memref<80x16xbf16, #tpu.memory_space<vmem>>, vector<48x16xbf16>
    %c8_210 = arith.constant 8 : index
    %c0_211 = arith.constant 0 : index
    %c0_212 = arith.constant 0 : index
    %214 = vector.load %arg5[%c8_210, %c0_211, %c0_212] : memref<25x16x16xbf16, #tpu.memory_space<vmem>>, vector<1x16x16xbf16>
    %215 = vector.shape_cast %214 : vector<1x16x16xbf16> to vector<16x16xbf16>
    %cst_213 = arith.constant dense<0.000000e+00> : vector<48x16xf32>
    %216 = tpu.matmul %213, %215, %cst_213 {dimension_numbers = #tpu.dot_dimension_numbers<[1], [0], [0], [1], [0, 0, 1, 1], [], []>} : vector<48x16xbf16>, vector<16x16xbf16>, vector<48x16xf32> -> vector<48x16xf32>
    %217 = arith.addf %212, %216 : vector<48x16xf32>
    %c10_214 = arith.constant 10 : index
    %c0_215 = arith.constant 0 : index
    %218 = vector.load %arg8[%c10_214, %c0_215] : memref<80x16xbf16, #tpu.memory_space<vmem>>, vector<48x16xbf16>
    %c9_216 = arith.constant 9 : index
    %c0_217 = arith.constant 0 : index
    %c0_218 = arith.constant 0 : index
    %219 = vector.load %arg5[%c9_216, %c0_217, %c0_218] : memref<25x16x16xbf16, #tpu.memory_space<vmem>>, vector<1x16x16xbf16>
    %220 = vector.shape_cast %219 : vector<1x16x16xbf16> to vector<16x16xbf16>
    %cst_219 = arith.constant dense<0.000000e+00> : vector<48x16xf32>
    %221 = tpu.matmul %218, %220, %cst_219 {dimension_numbers = #tpu.dot_dimension_numbers<[1], [0], [0], [1], [0, 0, 1, 1], [], []>} : vector<48x16xbf16>, vector<16x16xbf16>, vector<48x16xf32> -> vector<48x16xf32>
    %222 = arith.addf %217, %221 : vector<48x16xf32>
    %c12_220 = arith.constant 12 : index
    %c0_221 = arith.constant 0 : index
    %223 = vector.load %arg8[%c12_220, %c0_221] : memref<80x16xbf16, #tpu.memory_space<vmem>>, vector<48x16xbf16>
    %c10_222 = arith.constant 10 : index
    %c0_223 = arith.constant 0 : index
    %c0_224 = arith.constant 0 : index
    %224 = vector.load %arg5[%c10_222, %c0_223, %c0_224] : memref<25x16x16xbf16, #tpu.memory_space<vmem>>, vector<1x16x16xbf16>
    %225 = vector.shape_cast %224 : vector<1x16x16xbf16> to vector<16x16xbf16>
    %cst_225 = arith.constant dense<0.000000e+00> : vector<48x16xf32>
    %226 = tpu.matmul %223, %225, %cst_225 {dimension_numbers = #tpu.dot_dimension_numbers<[1], [0], [0], [1], [0, 0, 1, 1], [], []>} : vector<48x16xbf16>, vector<16x16xbf16>, vector<48x16xf32> -> vector<48x16xf32>
    %227 = arith.addf %222, %226 : vector<48x16xf32>
    %c13_226 = arith.constant 13 : index
    %c0_227 = arith.constant 0 : index
    %228 = vector.load %arg8[%c13_226, %c0_227] : memref<80x16xbf16, #tpu.memory_space<vmem>>, vector<48x16xbf16>
    %c11_228 = arith.constant 11 : index
    %c0_229 = arith.constant 0 : index
    %c0_230 = arith.constant 0 : index
    %229 = vector.load %arg5[%c11_228, %c0_229, %c0_230] : memref<25x16x16xbf16, #tpu.memory_space<vmem>>, vector<1x16x16xbf16>
    %230 = vector.shape_cast %229 : vector<1x16x16xbf16> to vector<16x16xbf16>
    %cst_231 = arith.constant dense<0.000000e+00> : vector<48x16xf32>
    %231 = tpu.matmul %228, %230, %cst_231 {dimension_numbers = #tpu.dot_dimension_numbers<[1], [0], [0], [1], [0, 0, 1, 1], [], []>} : vector<48x16xbf16>, vector<16x16xbf16>, vector<48x16xf32> -> vector<48x16xf32>
    %232 = arith.addf %227, %231 : vector<48x16xf32>
    %c14_232 = arith.constant 14 : index
    %c0_233 = arith.constant 0 : index
    %233 = vector.load %arg8[%c14_232, %c0_233] : memref<80x16xbf16, #tpu.memory_space<vmem>>, vector<48x16xbf16>
    %c12_234 = arith.constant 12 : index
    %c0_235 = arith.constant 0 : index
    %c0_236 = arith.constant 0 : index
    %234 = vector.load %arg5[%c12_234, %c0_235, %c0_236] : memref<25x16x16xbf16, #tpu.memory_space<vmem>>, vector<1x16x16xbf16>
    %235 = vector.shape_cast %234 : vector<1x16x16xbf16> to vector<16x16xbf16>
    %cst_237 = arith.constant dense<0.000000e+00> : vector<48x16xf32>
    %236 = tpu.matmul %233, %235, %cst_237 {dimension_numbers = #tpu.dot_dimension_numbers<[1], [0], [0], [1], [0, 0, 1, 1], [], []>} : vector<48x16xbf16>, vector<16x16xbf16>, vector<48x16xf32> -> vector<48x16xf32>
    %237 = arith.addf %232, %236 : vector<48x16xf32>
    %c15_238 = arith.constant 15 : index
    %c0_239 = arith.constant 0 : index
    %238 = vector.load %arg8[%c15_238, %c0_239] : memref<80x16xbf16, #tpu.memory_space<vmem>>, vector<48x16xbf16>
    %c13_240 = arith.constant 13 : index
    %c0_241 = arith.constant 0 : index
    %c0_242 = arith.constant 0 : index
    %239 = vector.load %arg5[%c13_240, %c0_241, %c0_242] : memref<25x16x16xbf16, #tpu.memory_space<vmem>>, vector<1x16x16xbf16>
    %240 = vector.shape_cast %239 : vector<1x16x16xbf16> to vector<16x16xbf16>
    %cst_243 = arith.constant dense<0.000000e+00> : vector<48x16xf32>
    %241 = tpu.matmul %238, %240, %cst_243 {dimension_numbers = #tpu.dot_dimension_numbers<[1], [0], [0], [1], [0, 0, 1, 1], [], []>} : vector<48x16xbf16>, vector<16x16xbf16>, vector<48x16xf32> -> vector<48x16xf32>
    %242 = arith.addf %237, %241 : vector<48x16xf32>
    %c16_244 = arith.constant 16 : index
    %c0_245 = arith.constant 0 : index
    %243 = vector.load %arg8[%c16_244, %c0_245] : memref<80x16xbf16, #tpu.memory_space<vmem>>, vector<48x16xbf16>
    %c14_246 = arith.constant 14 : index
    %c0_247 = arith.constant 0 : index
    %c0_248 = arith.constant 0 : index
    %244 = vector.load %arg5[%c14_246, %c0_247, %c0_248] : memref<25x16x16xbf16, #tpu.memory_space<vmem>>, vector<1x16x16xbf16>
    %245 = vector.shape_cast %244 : vector<1x16x16xbf16> to vector<16x16xbf16>
    %cst_249 = arith.constant dense<0.000000e+00> : vector<48x16xf32>
    %246 = tpu.matmul %243, %245, %cst_249 {dimension_numbers = #tpu.dot_dimension_numbers<[1], [0], [0], [1], [0, 0, 1, 1], [], []>} : vector<48x16xbf16>, vector<16x16xbf16>, vector<48x16xf32> -> vector<48x16xf32>
    %247 = arith.addf %242, %246 : vector<48x16xf32>
    %c18_250 = arith.constant 18 : index
    %c0_251 = arith.constant 0 : index
    %248 = vector.load %arg8[%c18_250, %c0_251] : memref<80x16xbf16, #tpu.memory_space<vmem>>, vector<48x16xbf16>
    %c15_252 = arith.constant 15 : index
    %c0_253 = arith.constant 0 : index
    %c0_254 = arith.constant 0 : index
    %249 = vector.load %arg5[%c15_252, %c0_253, %c0_254] : memref<25x16x16xbf16, #tpu.memory_space<vmem>>, vector<1x16x16xbf16>
    %250 = vector.shape_cast %249 : vector<1x16x16xbf16> to vector<16x16xbf16>
    %cst_255 = arith.constant dense<0.000000e+00> : vector<48x16xf32>
    %251 = tpu.matmul %248, %250, %cst_255 {dimension_numbers = #tpu.dot_dimension_numbers<[1], [0], [0], [1], [0, 0, 1, 1], [], []>} : vector<48x16xbf16>, vector<16x16xbf16>, vector<48x16xf32> -> vector<48x16xf32>
    %252 = arith.addf %247, %251 : vector<48x16xf32>
    %c19_256 = arith.constant 19 : index
    %c0_257 = arith.constant 0 : index
    %253 = vector.load %arg8[%c19_256, %c0_257] : memref<80x16xbf16, #tpu.memory_space<vmem>>, vector<48x16xbf16>
    %c16_258 = arith.constant 16 : index
    %c0_259 = arith.constant 0 : index
    %c0_260 = arith.constant 0 : index
    %254 = vector.load %arg5[%c16_258, %c0_259, %c0_260] : memref<25x16x16xbf16, #tpu.memory_space<vmem>>, vector<1x16x16xbf16>
    %255 = vector.shape_cast %254 : vector<1x16x16xbf16> to vector<16x16xbf16>
    %cst_261 = arith.constant dense<0.000000e+00> : vector<48x16xf32>
    %256 = tpu.matmul %253, %255, %cst_261 {dimension_numbers = #tpu.dot_dimension_numbers<[1], [0], [0], [1], [0, 0, 1, 1], [], []>} : vector<48x16xbf16>, vector<16x16xbf16>, vector<48x16xf32> -> vector<48x16xf32>
    %257 = arith.addf %252, %256 : vector<48x16xf32>
    %c20_262 = arith.constant 20 : index
    %c0_263 = arith.constant 0 : index
    %258 = vector.load %arg8[%c20_262, %c0_263] : memref<80x16xbf16, #tpu.memory_space<vmem>>, vector<48x16xbf16>
    %c17_264 = arith.constant 17 : index
    %c0_265 = arith.constant 0 : index
    %c0_266 = arith.constant 0 : index
    %259 = vector.load %arg5[%c17_264, %c0_265, %c0_266] : memref<25x16x16xbf16, #tpu.memory_space<vmem>>, vector<1x16x16xbf16>
    %260 = vector.shape_cast %259 : vector<1x16x16xbf16> to vector<16x16xbf16>
    %cst_267 = arith.constant dense<0.000000e+00> : vector<48x16xf32>
    %261 = tpu.matmul %258, %260, %cst_267 {dimension_numbers = #tpu.dot_dimension_numbers<[1], [0], [0], [1], [0, 0, 1, 1], [], []>} : vector<48x16xbf16>, vector<16x16xbf16>, vector<48x16xf32> -> vector<48x16xf32>
    %262 = arith.addf %257, %261 : vector<48x16xf32>
    %c21_268 = arith.constant 21 : index
    %c0_269 = arith.constant 0 : index
    %263 = vector.load %arg8[%c21_268, %c0_269] : memref<80x16xbf16, #tpu.memory_space<vmem>>, vector<48x16xbf16>
    %c18_270 = arith.constant 18 : index
    %c0_271 = arith.constant 0 : index
    %c0_272 = arith.constant 0 : index
    %264 = vector.load %arg5[%c18_270, %c0_271, %c0_272] : memref<25x16x16xbf16, #tpu.memory_space<vmem>>, vector<1x16x16xbf16>
    %265 = vector.shape_cast %264 : vector<1x16x16xbf16> to vector<16x16xbf16>
    %cst_273 = arith.constant dense<0.000000e+00> : vector<48x16xf32>
    %266 = tpu.matmul %263, %265, %cst_273 {dimension_numbers = #tpu.dot_dimension_numbers<[1], [0], [0], [1], [0, 0, 1, 1], [], []>} : vector<48x16xbf16>, vector<16x16xbf16>, vector<48x16xf32> -> vector<48x16xf32>
    %267 = arith.addf %262, %266 : vector<48x16xf32>
    %c22_274 = arith.constant 22 : index
    %c0_275 = arith.constant 0 : index
    %268 = vector.load %arg8[%c22_274, %c0_275] : memref<80x16xbf16, #tpu.memory_space<vmem>>, vector<48x16xbf16>
    %c19_276 = arith.constant 19 : index
    %c0_277 = arith.constant 0 : index
    %c0_278 = arith.constant 0 : index
    %269 = vector.load %arg5[%c19_276, %c0_277, %c0_278] : memref<25x16x16xbf16, #tpu.memory_space<vmem>>, vector<1x16x16xbf16>
    %270 = vector.shape_cast %269 : vector<1x16x16xbf16> to vector<16x16xbf16>
    %cst_279 = arith.constant dense<0.000000e+00> : vector<48x16xf32>
    %271 = tpu.matmul %268, %270, %cst_279 {dimension_numbers = #tpu.dot_dimension_numbers<[1], [0], [0], [1], [0, 0, 1, 1], [], []>} : vector<48x16xbf16>, vector<16x16xbf16>, vector<48x16xf32> -> vector<48x16xf32>
    %272 = arith.addf %267, %271 : vector<48x16xf32>
    %c24_280 = arith.constant 24 : index
    %c0_281 = arith.constant 0 : index
    %273 = vector.load %arg8[%c24_280, %c0_281] : memref<80x16xbf16, #tpu.memory_space<vmem>>, vector<48x16xbf16>
    %c20_282 = arith.constant 20 : index
    %c0_283 = arith.constant 0 : index
    %c0_284 = arith.constant 0 : index
    %274 = vector.load %arg5[%c20_282, %c0_283, %c0_284] : memref<25x16x16xbf16, #tpu.memory_space<vmem>>, vector<1x16x16xbf16>
    %275 = vector.shape_cast %274 : vector<1x16x16xbf16> to vector<16x16xbf16>
    %cst_285 = arith.constant dense<0.000000e+00> : vector<48x16xf32>
    %276 = tpu.matmul %273, %275, %cst_285 {dimension_numbers = #tpu.dot_dimension_numbers<[1], [0], [0], [1], [0, 0, 1, 1], [], []>} : vector<48x16xbf16>, vector<16x16xbf16>, vector<48x16xf32> -> vector<48x16xf32>
    %277 = arith.addf %272, %276 : vector<48x16xf32>
    %c25_286 = arith.constant 25 : index
    %c0_287 = arith.constant 0 : index
    %278 = vector.load %arg8[%c25_286, %c0_287] : memref<80x16xbf16, #tpu.memory_space<vmem>>, vector<48x16xbf16>
    %c21_288 = arith.constant 21 : index
    %c0_289 = arith.constant 0 : index
    %c0_290 = arith.constant 0 : index
    %279 = vector.load %arg5[%c21_288, %c0_289, %c0_290] : memref<25x16x16xbf16, #tpu.memory_space<vmem>>, vector<1x16x16xbf16>
    %280 = vector.shape_cast %279 : vector<1x16x16xbf16> to vector<16x16xbf16>
    %cst_291 = arith.constant dense<0.000000e+00> : vector<48x16xf32>
    %281 = tpu.matmul %278, %280, %cst_291 {dimension_numbers = #tpu.dot_dimension_numbers<[1], [0], [0], [1], [0, 0, 1, 1], [], []>} : vector<48x16xbf16>, vector<16x16xbf16>, vector<48x16xf32> -> vector<48x16xf32>
    %282 = arith.addf %277, %281 : vector<48x16xf32>
    %c26_292 = arith.constant 26 : index
    %c0_293 = arith.constant 0 : index
    %283 = vector.load %arg8[%c26_292, %c0_293] : memref<80x16xbf16, #tpu.memory_space<vmem>>, vector<48x16xbf16>
    %c22_294 = arith.constant 22 : index
    %c0_295 = arith.constant 0 : index
    %c0_296 = arith.constant 0 : index
    %284 = vector.load %arg5[%c22_294, %c0_295, %c0_296] : memref<25x16x16xbf16, #tpu.memory_space<vmem>>, vector<1x16x16xbf16>
    %285 = vector.shape_cast %284 : vector<1x16x16xbf16> to vector<16x16xbf16>
    %cst_297 = arith.constant dense<0.000000e+00> : vector<48x16xf32>
    %286 = tpu.matmul %283, %285, %cst_297 {dimension_numbers = #tpu.dot_dimension_numbers<[1], [0], [0], [1], [0, 0, 1, 1], [], []>} : vector<48x16xbf16>, vector<16x16xbf16>, vector<48x16xf32> -> vector<48x16xf32>
    %287 = arith.addf %282, %286 : vector<48x16xf32>
    %c27_298 = arith.constant 27 : index
    %c0_299 = arith.constant 0 : index
    %288 = vector.load %arg8[%c27_298, %c0_299] : memref<80x16xbf16, #tpu.memory_space<vmem>>, vector<48x16xbf16>
    %c23_300 = arith.constant 23 : index
    %c0_301 = arith.constant 0 : index
    %c0_302 = arith.constant 0 : index
    %289 = vector.load %arg5[%c23_300, %c0_301, %c0_302] : memref<25x16x16xbf16, #tpu.memory_space<vmem>>, vector<1x16x16xbf16>
    %290 = vector.shape_cast %289 : vector<1x16x16xbf16> to vector<16x16xbf16>
    %cst_303 = arith.constant dense<0.000000e+00> : vector<48x16xf32>
    %291 = tpu.matmul %288, %290, %cst_303 {dimension_numbers = #tpu.dot_dimension_numbers<[1], [0], [0], [1], [0, 0, 1, 1], [], []>} : vector<48x16xbf16>, vector<16x16xbf16>, vector<48x16xf32> -> vector<48x16xf32>
    %292 = arith.addf %287, %291 : vector<48x16xf32>
    %c28_304 = arith.constant 28 : index
    %c0_305 = arith.constant 0 : index
    %293 = vector.load %arg8[%c28_304, %c0_305] : memref<80x16xbf16, #tpu.memory_space<vmem>>, vector<48x16xbf16>
    %c24_306 = arith.constant 24 : index
    %c0_307 = arith.constant 0 : index
    %c0_308 = arith.constant 0 : index
    %294 = vector.load %arg5[%c24_306, %c0_307, %c0_308] : memref<25x16x16xbf16, #tpu.memory_space<vmem>>, vector<1x16x16xbf16>
    %295 = vector.shape_cast %294 : vector<1x16x16xbf16> to vector<16x16xbf16>
    %cst_309 = arith.constant dense<0.000000e+00> : vector<48x16xf32>
    %296 = tpu.matmul %293, %295, %cst_309 {dimension_numbers = #tpu.dot_dimension_numbers<[1], [0], [0], [1], [0, 0, 1, 1], [], []>} : vector<48x16xbf16>, vector<16x16xbf16>, vector<48x16xf32> -> vector<48x16xf32>
    %297 = arith.addf %292, %296 : vector<48x16xf32>
    %c0_310 = arith.constant 0 : index
    %c0_311 = arith.constant 0 : index
    %298 = vector.load %arg6[%c0_310, %c0_311] : memref<1x16xf32, #tpu.memory_space<vmem>>, vector<1x16xf32>
    %299 = vector.broadcast %298 : vector<1x16xf32> to vector<48x16xf32>
    %300 = arith.addf %297, %299 : vector<48x16xf32>
    %301 = arith.truncf %300 : vector<48x16xf32> to vector<48x16xbf16>
    %c0_312 = arith.constant 0 : index
    %c0_313 = arith.constant 0 : index
    %c0_314 = arith.constant 0 : index
    %302 = vector.load %arg7[%c0_312, %c0_313, %c0_314] : memref<1x48x16xbf16, #tpu.memory_space<vmem>>, vector<1x48x16xbf16>
    %303 = vector.shape_cast %302 : vector<1x48x16xbf16> to vector<48x16xbf16>
    %304 = vector.shape_cast %301 : vector<48x16xbf16> to vector<1x48x16xbf16>
    tpu.vector_store %arg7[%c0_312, %c0_313, %c0_314], %304 {strides = array<i32>} : memref<1x48x16xbf16, #tpu.memory_space<vmem>>, vector<1x48x16xbf16>,
    return
  }
  func.func @transform_0(%arg0: i32) -> (i32, i32, i32) {
    %c0_i32 = arith.constant 0 : i32
    %c0_i32_0 = arith.constant 0 : i32
    %c0_i32_1 = arith.constant 0 : i32
    return %arg0, %c0_i32, %c0_i32_0 : i32, i32, i32
  }
  func.func @transform_1(%arg0: i32) -> (i32, i32) {
    %c0_i32 = arith.constant 0 : i32
    %c0_i32_0 = arith.constant 0 : i32
    %c0_i32_1 = arith.constant 0 : i32
    return %c0_i32, %c0_i32_0 : i32, i32
  }
  func.func @transform_2(%arg0: i32) -> (i32, i32, i32) {
    %c0_i32 = arith.constant 0 : i32
    %c0_i32_0 = arith.constant 0 : i32
    %c0_i32_1 = arith.constant 0 : i32
    %c0_i32_2 = arith.constant 0 : i32
    return %c0_i32, %c0_i32_0, %c0_i32_1 : i32, i32, i32
  }
  func.func @transform_3(%arg0: i32) -> (i32, i32) {
    %c0_i32 = arith.constant 0 : i32
    %c0_i32_0 = arith.constant 0 : i32
    %c0_i32_1 = arith.constant 0 : i32
    return %c0_i32, %c0_i32_0 : i32, i32
  }
  func.func @transform_4(%arg0: i32) -> (i32, i32, i32) {
    %c0_i32 = arith.constant 0 : i32
    %c0_i32_0 = arith.constant 0 : i32
    %c0_i32_1 = arith.constant 0 : i32
    %c0_i32_2 = arith.constant 0 : i32
    return %c0_i32, %c0_i32_0, %c0_i32_1 : i32, i32, i32
  }
  func.func @transform_5(%arg0: i32) -> (i32, i32) {
    %c0_i32 = arith.constant 0 : i32
    %c0_i32_0 = arith.constant 0 : i32
    %c0_i32_1 = arith.constant 0 : i32
    return %c0_i32, %c0_i32_0 : i32, i32
  }
  func.func @transform_6(%arg0: i32) -> (i32, i32, i32) {
    %c0_i32 = arith.constant 0 : i32
    %c0_i32_0 = arith.constant 0 : i32
    %c0_i32_1 = arith.constant 0 : i32
    return %arg0, %c0_i32, %c0_i32_0 : i32, i32, i32
  }
}

</mosaic_0001>

<bundles_post_ra>
// kernel: tpu_custom_call.1
= control target key start
LH: loop header
LB: loop body
LE: loop exit
PB: predicated region body
PF: predicated region fallthrough
CT: control target
= control target key end

     0   :  { %s6885_s21 = smov 0   ;;  %s8323_s0 = inlined_call_operand.vmem [shape: bf16[2,80,16], index: 0, kind: input, shape index: {}]   ;;  %s8324_s1 = inlined_call_operand.vmem [shape: f32[48,1], index: 1, kind: input, shape index: {}]   ;;  %s8325_s2 = inlined_call_operand.vmem [shape: bf16[25,16,16], index: 2, kind: input, shape index: {}]   ;;  %s8326_s3 = inlined_call_operand.vmem [shape: f32[1,16], index: 3, kind: input, shape index: {}]   ;;  %s8327_s4 = inlined_call_operand.vmem [shape: bf16[25,16,16], index: 4, kind: input, shape index: {}]   ;;  %s8328_s5 = inlined_call_operand.vmem [shape: f32[1,16], index: 5, kind: input, shape index: {}]   ;;  %s8329_s6 = inlined_call_operand.vmem [shape: bf16[2,48,16], index: 6, kind: output, shape index: {}]  }
   0x1 LB: > { %s5455_s22 = sadd.s32 4294967295, %s6845_s21   ;;  %p5459_p0 = scmp.ge.s32.totalorder %s6845_s21, 1  ;;  %s6845_s21 = sphi %s6885_s21, %s16_s21  }
   0x2   : > { %p212_p1 = scmp.lt.s32.totalorder %s6845_s21, 3 }
   0x4   : > { %p213_p2 = pnand %p5459_p0, %p212_p1 }
   0x5   : > { %v6733_v0 = vld [vmem:[%s8325_s2 + $0x8] sm:$0xff] (!%p213_p2)   ;;  %v6847_v1 = vmov (!%p213_p2), 0.0   ;;  %v6734_v2 = vld [vmem:[%s8325_s2] sm:$0xff] (!%p213_p2)   ;;  %vm6848_vm0 = vmmov (!%p213_p2), 0   ;;  %p242_p3 = scmp.lt.s32.totalorder (!%p213_p2), %s5455_s22, 1  ;;  %vm318_vm1 = vcmask (!%p213_p2), 130048  }
   0x6   : > { %216 = sbr.rel (%p213_p2) target bundleno = 1111 (0x457), region = 44  ;;  %6018 = vmatprep.subr.bf16.mxu0 (!%p213_p2), %v6847_v1  ;;  %6032 = vmatprep.subr.bf16.mxu1 (!%p213_p2), %v6847_v1  ;;  %v6740_v3 = vld [vmem:[%s8325_s2 + $0x18] sm:$0xff] (!%p213_p2)   ;;  %vm283_vm2 = vsmask.f32 (!%p213_p2), 7424  ;;  %v6737_v22 = vld [vmem:[%s8325_s2 + $0x10] sm:$0xff] (!%p213_p2)   ;;  %v6744_v55 = vld [vmem:[%s8325_s2 + $0x28] sm:$0xff] (!%p213_p2)  }
   0x7   : > { %6019 = vmatpush3.bf16.msra.mxu0 (!%p213_p2), %v6733_v0  ;;  %6020 = vmatprep.mubr.msk.bf16.mxu0 (!%p213_p2), %vm6848_vm0, %v6847_v1  ;;  %vm554_vm3 = vsmask.f32 (!%p213_p2), 6400  ;;  %vm855_vm4 = vsmask.f32 (!%p213_p2), 4352  ;;  %vm461_vm5 = vcmask (!%p213_p2), 1046528   ;;  %v6742_v62 = vld [vmem:[%s8325_s2 + $0x20] sm:$0xff] (!%p213_p2)  }
   0x8   : > { %6033 = vmatpush3.bf16.msra.mxu1 (!%p213_p2), %v6734_v2  ;;  %6034 = vmatprep.mubr.msk.bf16.mxu1 (!%p213_p2), %vm6848_vm0, %v6847_v1  ;;  %vm762_vm6 = vcmask (!%p213_p2), 1044480   ;;  %vm665_vm7 = vcmask (!%p213_p2), 1045504   ;;  %vm1372_vm8 = vsmask.f32 (!%p213_p2), 5376  ;;  %vm2915_vm9 = vcmask (!%p213_p2), 130055  }
   0x9   : > { %6046 = vmatprep.subr.bf16.mxu0 (!%p213_p2), %v6847_v1  ;;  %6060 = vmatprep.subr.bf16.mxu1 (!%p213_p2), %v6847_v1  ;;  %vm2913_vm10 = vcmask (!%p213_p2), 129024   ;;  %vm3701_vm11 = vsmask.f32 (!%p213_p2), 3328  ;;  %vm3994_vm12 = vsmask.f32 (!%p213_p2), 1280  ;;  %vm3611_vm14 = vcmask (!%p213_p2), 1043456  }
   0xa   : > { %vm4194_vm13 = vsmask.f32 (!%p213_p2), 256  ;;  %vm3811_vm15 = vcmask (!%p213_p2), 1042432  }
   0xd   : > { %s8331_s22 = smov (!%p242_p3, %s5455_s22), 1 }
   0xe   : > { %s6718_s27 = smul.u32 40, %s8331_s22 }
   0xf   : > { %s6719_s9 = smul.u32 24, %s8331_s22 }
  0x10   : > { %s6913_s30 = scalar_lea.vmem %s8323_s0, %s6718_s27 }
  0x11   : > { %v253_v4 = vld [vmem:[%s6913_s30] sm:$0xf]  ;;  %v6920_v5 = vld [vmem:[%s6913_s30 + $0x4] sm:$0xf]  ;;  %v6923_v6 = vld [vmem:[%s6913_s30 + $0x8] sm:$0xf]  ;;  %s251_s14 = scalar_lea.vmem %s8329_s6, %s6719_s9 }
  0x12   : > { %v6926_v7 = vld [vmem:[%s6913_s30 + $0xc] sm:$0xf]  ;;  %v5464_v8 = vcombine.low %v253_v4, %v6920_v5  ;;  %v6930_v9 = vld [vmem:[%s6913_s30 + $0x10] sm:$0xf]  ;;  %v6933_v10 = vld [vmem:[%s6913_s30 + $0x14] sm:$0xf]  ;;  %v5514_v11 = vcombine.low %v6920_v5, %v6923_v6 }
  0x13   : > { %v6939_v12 = vcombine.low %v6923_v6, %v6926_v7  ;;  %v5515_v13 = vcombine.low %v6926_v7, %v6930_v9  ;;  %v6946_v16 = vcombine.low %v6930_v9, %v6933_v10  ;;  %v454_v20 = vld [vmem:[%s6913_s30] sm:$0xe]  ;;  %v6960_v26 = vld [vmem:[%s6913_s30 + $0x18] ss:$0 sps:$4 sm:$0x11]  }
  0x14   : > { %v285_v14 = vshrl.u32 %v5464_v8, 16  ;;  %v287_v15 = vshll.u32 %v5464_v8, 16  ;;  %6035 = vmatmul.mubr.msk.bf16.vlgmr.msra.gmra.mrb[0].mxu1 %vm318_vm1, %v5464_v8  ;;  %v5478_v27 = vcombine.low %v454_v20, %v6920_v5  ;;  %v308_v32 = vshll.u32 %v6960_v26, 16  ;;  %v6993_v54 = vld [vmem:[%s6913_s30 + $0x18] ss:$0 sps:$4 sm:$0x33]  }
  0x15   : > { %v292_v17 = vshll.u32 %v6939_v12, 16  ;;  %6038 = vmatprep.mubr.msk.bf16.mxu1 %vm6848_vm0, %v6847_v1  ;;  %6061 = vmatpush3.bf16.msra.mxu1 %v6740_v3  ;;  %v296_v23 = vshrl.u32 %v6939_v12, 16  ;;  %v300_v24 = vshll.u32 %v6946_v16, 16  ;;  %v304_v34 = vshrl.u32 %v6946_v16, 16  ;;  %v751_v8 = vld [vmem:[%s6913_s30] sm:$0x8] }
  0x16   : > { %v289_v18 = vrot.slane %v287_v15, 1  ;;  %6088 = vmatprep.subr.bf16.mxu1 %v6847_v1  ;;  %v556_v30 = vshrl.u32 %v5478_v27, 16  ;;  %v559_v31 = vshll.u32 %v5478_v27, 16  ;;  %v310_v39 = vrot.slane %v308_v32, 1  ;;  %v7028_v20 = vld [vmem:[%s6913_s30 + $0x8] sm:$0xf] }
  0x17   : > { %v294_v19 = vrot.slane %v292_v17, 1  ;;  %v302_v29 = vrot.slane %v300_v24, 1  ;;  %v563_v35 = vrot.slane %v296_v23, 1  ;;  %v564_v36 = vrot.slane %v292_v17, 2 }
  0x18   : > { %v290_v21 = vor.u32 %v289_v18, %v285_v14  ;;  %v558_v37 = vrot.slane %v556_v30, 1  ;;  %v561_v38 = vrot.slane %v559_v31, 2  ;;  %v864_v41 = vrot.slane %v296_v23, 3 }
  0x19   : > { %v298_v28 = vor.u32 %v296_v23, %v294_v19  ;;  %v306_v40 = vor.u32 %v304_v34, %v302_v29  ;;  %v865_v42 = vrot.slane %v292_v17, 4  ;;  %v868_v43 = vrot.slane %v304_v34, 3  ;;  %v658_v17 = vld [vmem:[%s6913_s30] sm:$0xc] }
  0x1a   : > { %v295_v25 = vsel %vm283_vm2, %v290_v21, %v294_v19  ;;  %v869_v44 = vrot.slane %v300_v24, 4  ;;  %v562_v45 = vor.u32 %v561_v38, %v558_v37  ;;  %v565_v46 = vor.u32 %v564_v36, %v563_v35  ;;  %v7032_v21 = vld [vmem:[%s6913_s30 + $0xc] sm:$0xf]  ;;  %v6746_v35 = vld [vmem:[%s8325_s2 + $0x30] sm:$0xff]  }
  0x1b   : > { %6021 = vmatmul.mubr.msk.bf16.vlgmr.msra.gmra.mrb[0].mxu0 %vm318_vm1, %v295_v25  ;;  %v303_v33 = vsel %vm283_vm2, %v298_v28, %v302_v29  ;;  %v6981_v47 = vor.u32 %v865_v42, %v864_v41  ;;  %v311_v49 = vsel %vm283_vm2, %v306_v40, %v310_v39  ;;  %v567_v52 = vrot.slane %v304_v34, 1  ;;  %v6749_v28 = vld [vmem:[%s8325_s2 + $0x38] sm:$0xff]   ;;  %v7049_v29 = vld [vmem:[%s6913_s30 + $0x10] sm:$0xf] }
  0x1c   : > { %6047 = vmatpush3.bf16.msra.mxu0 %v6737_v22  ;;  %6024 = vmatprep.mubr.msk.bf16.mxu0 %vm6848_vm0, %v6847_v1  ;;  %v6983_v48 = vor.u32 %v869_v44, %v868_v43  ;;  %v566_v51 = vsel %vm554_vm3, %v562_v45, %v565_v46  ;;  %v568_v53 = vrot.slane %v300_v24, 2  ;;  %v462_v56 = vrot.slane %v5478_v27, 1  ;;  %v6748_v34 = vld [vmem:[%s6913_s30 + $0x18] ss:$0 sps:$4 sm:$0x77]  }
  0x1d   : > { %6039 = vmatmul.mubr.msk.bf16.gmra.mrb[4].mxu1 %vm318_vm1, %v6939_v12  ;;  %6074 = vmatprep.subr.bf16.mxu0 %v6847_v1  ;;  %v463_v57 = vrot.slane %v6939_v12, 1  ;;  %v572_v59 = vshrl.u32 %v6993_v54, 16  ;;  %v575_v60 = vshll.u32 %v6993_v54, 16  ;;  %v465_v3 = vrot.slane %v6946_v16, 1 }
  0x1e   : > { %6042 = vmatprep.mubr.msk.bf16.mxu1 %vm6848_vm0, %v6847_v1  ;;  %v6989_v50 = vsel %vm855_vm4, %v6981_v47, %v6983_v48  ;;  %v569_v58 = vor.u32 %v568_v53, %v567_v52  ;;  %v467_v15 = vrot.slane %v6960_v26, 1  ;;  %v5499_v18 = vcombine.low %v751_v8, %v6920_v5  ;;  %v848_v52 = vld [vmem:[%s6913_s30 + $0x18] sm:$0xf] }
  0x1f   : > { %v464_v61 = vsel %vm461_vm5, %v462_v56, %v463_v57  ;;  %v574_v0 = vrot.slane %v572_v59, 1  ;;  %v577_v2 = vrot.slane %v575_v60, 2  ;;  %v466_v14 = vsel %vm461_vm5, %v463_v57, %v465_v3 }
  0x20   : > { %v570_v63 = vsel %vm554_vm3, %v565_v46, %v569_v58  ;;  %v5569_v22 = vcombine.low %v7028_v20, %v7032_v21  ;;  %v763_v23 = vrot.slane %v5499_v18, 3  ;;  %v764_v24 = vrot.slane %v6939_v12, 3 }
  0x21   : > { %v578_v4 = vor.u32 %v577_v2, %v574_v0  ;;  %v5492_v25 = vcombine.low %v658_v17, %v6920_v5  ;;  %v468_v26 = vsel %vm461_vm5, %v465_v3, %v467_v15  ;;  %v667_v27 = vrot.slane %v6939_v12, 2  ;;  %v7141_v2 = vld [vmem:[%s6913_s30 + $0x18] sm:$0xf]  ;;  %v1269_v17 = vld [vmem:[%s6913_s30 + $0x4] sm:$0xc] }
  0x22   : > { %v765_v31 = vsel %vm762_vm6, %v763_v23, %v764_v24  ;;  %v766_v32 = vrot.slane %v6946_v16, 3  ;;  %v669_v37 = vrot.slane %v6946_v16, 2  ;;  %v768_v39 = vrot.slane %v6748_v34, 3 }
  0x23   : > { %6025 = vmatmul.mubr.msk.bf16.gmra.mrb[4].mxu0 %vm318_vm1, %v303_v33  ;;  %v579_v19 = vsel %vm554_vm3, %v569_v58, %v578_v4  ;;  %v666_v30 = vrot.slane %v5492_v25, 2  ;;  %v7055_v33 = vld [vmem:[%s6913_s30 + $0x14] sm:$0xf]  ;;  %v671_v41 = vrot.slane %v6993_v54, 2  ;;  %v857_v42 = vshrl.u32 %v5499_v18, 16  ;;  %v6750_v54 = vld [vmem:[%s8325_s2 + $0x40] sm:$0xff]  }
  0x24   : > { %6028 = vmatprep.mubr.msk.bf16.mxu0 %vm6848_vm0, %v6847_v1  ;;  %v5570_v12 = vcombine.low %v7049_v29, %v7055_v33  ;;  %v767_v38 = vsel %vm762_vm6, %v764_v24, %v766_v32  ;;  %v670_v40 = vsel %vm665_vm7, %v667_v27, %v669_v37  ;;  %v860_v43 = vshll.u32 %v5499_v18, 16  ;;  %v6762_v4 = vld [vmem:[%s8325_s2 + $0x58] sm:$0xff]  }
  0x25   : > { %6043 = vmatmul.mubr.msk.bf16.gmra.mrb[8].mxu1 %vm318_vm1, %v6946_v16  ;;  %v668_v36 = vsel %vm665_vm7, %v666_v30, %v667_v27  ;;  %v769_v16 = vsel %vm762_vm6, %v766_v32, %v768_v39  ;;  %v672_v44 = vsel %vm665_vm7, %v669_v37, %v671_v41  ;;  %v859_v45 = vrot.slane %v857_v42, 3  ;;  %v6761_v27 = vld [vmem:[%s6913_s30 + $0x1c] ss:$0 sps:$4 sm:$0x11]  }
  0x26   : > { %6062 = vmatprep.mubr.msk.bf16.mxu1 %vm6848_vm0, %v6847_v1  ;;  %v862_v46 = vrot.slane %v860_v43, 4  ;;  %v5516_v59 = vcombine.low %v6933_v10, %v848_v52  ;;  %v7129_v9 = vcombine.low %v7032_v21, %v7049_v29  ;;  %v1095_v37 = vshll.u32 %v6761_v27, 16 }
  0x28   : > { %v7138_v0 = vshll.u32 %v7129_v9, 16  ;;  %v7166_v23 = vshrl.u32 %v7129_v9, 16  ;;  %v1097_v43 = vrot.slane %v1095_v37, 1 }
  0x2a   : > { %v1081_v8 = vrot.slane %v7138_v0, 1  ;;  %v1382_v41 = vrot.slane %v7138_v0, 3 }
  0x2b   : > { %6029 = vmatmul.mubr.msk.bf16.gmra.mrb[8].mxu0 %vm318_vm1, %v311_v49  ;;  %v6755_v49 = vld [vmem:[%s8325_s2 + $0x48] sm:$0xff]  }
  0x2c   : > { %6048 = vmatprep.mubr.msk.bf16.mxu0 %vm6848_vm0, %v6847_v1 }
  0x2d   : > { %6063 = vmatmul.mubr.msk.bf16.vlgmr.msra.gmra.mrb[12].mxu1 %vm318_vm1, %v566_v51  ;;  %v863_v51 = vor.u32 %v862_v46, %v859_v45 }
  0x2e   : > { %6066 = vmatprep.mubr.msk.bf16.mxu1 %vm6848_vm0, %v6847_v1  ;;  %6089 = vmatpush3.bf16.msra.mxu1 %v6744_v55  ;;  %v5507_v55 = vcombine.low %v848_v52, %v848_v52 }
  0x2f   : > { %6116 = vmatprep.subr.bf16.mxu1 %v6847_v1  ;;  %v867_v53 = vsel %vm855_vm4, %v863_v51, %v6981_v47  ;;  %v1177_v47 = vld [vmem:[%s6913_s30 + $0x4] sm:$0xe] }
  0x30   : > { %v873_v5 = vshrl.u32 %v5507_v55, 16  ;;  %v876_v6 = vshll.u32 %v5507_v55, 16  ;;  %v5533_v60 = vcombine.low %v1177_v47, %v7028_v20 }
  0x32   : > { %v875_v56 = vrot.slane %v873_v5, 3  ;;  %v878_v57 = vrot.slane %v876_v6, 4  ;;  %v1184_v10 = vrot.slane %v5533_v60, 1  ;;  %v1281_v5 = vrot.slane %v7129_v9, 2 }
  0x33   : > { %6049 = vmatmul.mubr.msk.bf16.vlgmr.msra.gmra.mrb[12].mxu0 %vm318_vm1, %v464_v61  ;;  %v1185_v61 = vrot.slane %v7129_v9, 1 }
  0x34   : > { %6075 = vmatpush3.bf16.msra.mxu0 %v6742_v62  ;;  %6052 = vmatprep.mubr.msk.bf16.mxu0 %vm6848_vm0, %v6847_v1  ;;  %v879_v7 = vor.u32 %v878_v57, %v875_v56  ;;  %v1476_v56 = vld [vmem:[%s6913_s30 + $0x4] sm:$0x8] }
  0x35   : > { %6067 = vmatmul.mubr.msk.bf16.gmra.mrb[16].mxu1 %vm318_vm1, %v570_v63  ;;  %6102 = vmatprep.subr.bf16.mxu0 %v6847_v1  ;;  %v1186_v3 = vsel %vm461_vm5, %v1184_v10, %v1185_v61 }
  0x36   : > { %6070 = vmatprep.mubr.msk.bf16.mxu1 %vm6848_vm0, %v6847_v1 }
  0x3b   : > { %6053 = vmatmul.mubr.msk.bf16.gmra.mrb[16].mxu0 %vm318_vm1, %v466_v14  ;;  %v7153_v14 = vcombine.low %v7055_v33, %v7141_v2 }
  0x3c   : > { %6056 = vmatprep.mubr.msk.bf16.mxu0 %vm6848_vm0, %v6847_v1 }
  0x3d   : > { %6071 = vmatmul.mubr.msk.bf16.gmra.mrb[20].mxu1 %vm318_vm1, %v579_v19  ;;  %v1187_v15 = vrot.slane %v7153_v14, 1  ;;  %v6758_v19 = vld [vmem:[%s8325_s2 + $0x50] sm:$0xff]   ;;  %v7169_v24 = vshll.u32 %v7153_v14, 16  ;;  %v1283_v10 = vrot.slane %v7153_v14, 2 }
  0x3e   : > { %6090 = vmatprep.mubr.msk.bf16.mxu1 %vm6848_vm0, %v6847_v1 }
  0x3f   : > { %v1188_v25 = vsel %vm461_vm5, %v1185_v61, %v1187_v15  ;;  %v1089_v30 = vrot.slane %v7169_v24, 1  ;;  %v1386_v52 = vrot.slane %v7169_v24, 3 }
  0x43   : > { %6057 = vmatmul.mubr.msk.bf16.gmra.mrb[20].mxu0 %vm318_vm1, %v468_v26  ;;  %v5540_v26 = vcombine.low %v1269_v17, %v7028_v20  ;;  %v1584_v17 = vrot.slane %v7138_v0, 4 }
  0x44   : > { %6076 = vmatprep.mubr.msk.bf16.mxu0 %vm6848_vm0, %v6847_v1 }
  0x45   : > { %6091 = vmatmul.mubr.msk.bf16.vlgmr.msra.gmra.mrb[24].mxu1 %vm318_vm1, %v765_v31  ;;  %v1189_v31 = vrot.slane %v6761_v27, 1  ;;  %v1374_v32 = vshrl.u32 %v5540_v26, 16  ;;  %v1377_v34 = vshll.u32 %v5540_v26, 16  ;;  %v1280_v55 = vrot.slane %v5540_v26, 2 }
  0x46   : > { %6094 = vmatprep.mubr.msk.bf16.mxu1 %vm6848_vm0, %v6847_v1  ;;  %6117 = vmatpush3.bf16.msra.mxu1 %v6749_v28  ;;  %v1085_v28 = vor.u32 %v7166_v23, %v1081_v8 }
  0x47   : > { %6144 = vmatprep.subr.bf16.mxu1 %v6847_v1  ;;  %v1376_v39 = vrot.slane %v1374_v32, 2  ;;  %v1282_v57 = vsel %vm665_vm7, %v1280_v55, %v1281_v5 }
  0x4b   : > { %6077 = vmatmul.mubr.msk.bf16.vlgmr.msra.gmra.mrb[24].mxu0 %vm318_vm1, %v668_v36  ;;  %v7185_v36 = vshrl.u32 %v7153_v14, 16 }
  0x4c   : > { %6103 = vmatpush3.bf16.msra.mxu0 %v6746_v35  ;;  %6080 = vmatprep.mubr.msk.bf16.mxu0 %vm6848_vm0, %v6847_v1  ;;  %v1090_v35 = vsel %vm283_vm2, %v1085_v28, %v1089_v30  ;;  %v1588_v28 = vrot.slane %v7169_v24, 4 }
  0x4d   : > { %6095 = vmatmul.mubr.msk.bf16.gmra.mrb[28].mxu1 %vm318_vm1, %v767_v38  ;;  %6130 = vmatprep.subr.bf16.mxu0 %v6847_v1  ;;  %v1190_v38 = vsel %vm461_vm5, %v1187_v15, %v1189_v31  ;;  %v1093_v42 = vor.u32 %v7185_v36, %v1089_v30  ;;  %v1385_v51 = vrot.slane %v7185_v36, 2  ;;  %v1587_v0 = vrot.slane %v7185_v36, 3  ;;  %v6771_v31 = vld [vmem:[%s8325_s2 + $0x78] sm:$0xff]  }
  0x4e   : > { %6098 = vmatprep.mubr.msk.bf16.mxu1 %vm6848_vm0, %v6847_v1 }
  0x4f   : > { %v1098_v46 = vsel %vm283_vm2, %v1093_v42, %v1097_v43  ;;  %v1387_v6 = vor.u32 %v1386_v52, %v1385_v51  ;;  %v1589_v24 = vor.u32 %v1588_v28, %v1587_v0  ;;  %v1762_v42 = vld [vmem:[%s6913_s30 + $0x8] sm:$0xe]  ;;  %v7278_v43 = vld [vmem:[%s6913_s30 + $0xc] sm:$0xf] }
  0x53   : > { %6081 = vmatmul.mubr.msk.bf16.gmra.mrb[28].mxu0 %vm318_vm1, %v670_v40  ;;  %v1379_v40 = vrot.slane %v1377_v34, 3  ;;  %v1484_v34 = vrot.slane %v7129_v9, 3  ;;  %v6769_v9 = vld [vmem:[%s8325_s2 + $0x70] sm:$0xff]  }
  0x54   : > { %6084 = vmatprep.mubr.msk.bf16.mxu0 %vm6848_vm0, %v6847_v1 }
  0x55   : > { %6099 = vmatmul.mubr.msk.bf16.gmra.mrb[32].mxu1 %vm318_vm1, %v769_v16  ;;  %v1381_v16 = vrot.slane %v7166_v23, 2 }
  0x56   : > { %6118 = vmatprep.mubr.msk.bf16.mxu1 %vm6848_vm0, %v6847_v1 }
  0x57   : > { %v1383_v45 = vor.u32 %v1382_v41, %v1381_v16  ;;  %v1486_v16 = vrot.slane %v7153_v14, 3 }
  0x5b   : > { %6085 = vmatmul.mubr.msk.bf16.gmra.mrb[32].mxu0 %vm318_vm1, %v672_v44  ;;  %v1380_v44 = vor.u32 %v1379_v40, %v1376_v39 }
  0x5c   : > { %6104 = vmatprep.mubr.msk.bf16.mxu0 %vm6848_vm0, %v6847_v1 }
  0x5d   : > { %6119 = vmatmul.mubr.msk.bf16.vlgmr.msra.gmra.mrb[36].mxu1 %vm318_vm1, %v5514_v11  ;;  %v1043_v11 = vld [vmem:[%s6913_s30 + $0x4] sm:$0xf] }
  0x5e   : > { %6122 = vmatprep.mubr.msk.bf16.mxu1 %vm6848_vm0, %v6847_v1  ;;  %6145 = vmatpush3.bf16.msra.mxu1 %v6755_v49  ;;  %v5523_v58 = vcombine.low %v1043_v11, %v7028_v20  ;;  %v1384_v49 = vsel %vm1372_vm8, %v1380_v44, %v1383_v45  ;;  %v7281_v44 = vld [vmem:[%s6913_s30 + $0x10] sm:$0xf] }
  0x5f   : > { %6172 = vmatprep.subr.bf16.mxu1 %v6847_v1 }
  0x60   : > { %v1072_v62 = vshrl.u32 %v5523_v58, 16 }
  0x63   : > { %6105 = vmatmul.mubr.msk.bf16.vlgmr.msra.gmra.mrb[36].mxu0 %vm318_vm1, %v867_v53  ;;  %v7202_v53 = vld [vmem:[%s6913_s30 + $0x1c] ss:$0 sps:$4 sm:$0x77]  }
  0x64   : > { %6131 = vmatpush3.bf16.msra.mxu0 %v6750_v54  ;;  %6108 = vmatprep.mubr.msk.bf16.mxu0 %vm6848_vm0, %v6847_v1  ;;  %v6767_v54 = vld [vmem:[%s8325_s2 + $0x68] sm:$0xff]   ;;  %v1390_v11 = vshrl.u32 %v7202_v53, 16  ;;  %v1393_v47 = vshll.u32 %v7202_v53, 16  ;;  %v1488_v52 = vrot.slane %v7202_v53, 3 }
  0x65   : > { %6123 = vmatmul.mubr.msk.bf16.gmra.mrb[40].mxu1 %vm318_vm1, %v5515_v13  ;;  %6158 = vmatprep.subr.bf16.mxu0 %v6847_v1  ;;  %v1074_v13 = vshll.u32 %v5523_v58, 16  ;;  %v6764_v58 = vld [vmem:[%s8325_s2 + $0x60] sm:$0xff]  }
  0x66   : > { %6126 = vmatprep.mubr.msk.bf16.mxu1 %vm6848_vm0, %v6847_v1  ;;  %v1392_v60 = vrot.slane %v1390_v11, 2  ;;  %v1489_v11 = vsel %vm762_vm6, %v1486_v16, %v1488_v52 }
  0x67   : > { %v1076_v63 = vrot.slane %v1074_v13, 1  ;;  %v5555_v13 = vcombine.low %v1476_v56, %v7028_v20  ;;  %v6780_v56 = vld [vmem:[%s8325_s2 + $0x88] sm:$0xff]  }
  0x69   : > { %v1483_v32 = vrot.slane %v5555_v13, 3 }
  0x6b   : > { %6109 = vmatmul.mubr.msk.bf16.gmra.mrb[40].mxu0 %vm318_vm1, %v6989_v50  ;;  %v880_v50 = vsel %vm855_vm4, %v6983_v48, %v879_v7  ;;  %v1077_v48 = vor.u32 %v1076_v63, %v1072_v62  ;;  %v1395_v7 = vrot.slane %v1393_v47, 3  ;;  %v1579_v62 = vshll.u32 %v5555_v13, 16 }
  0x6c   : > { %6112 = vmatprep.mubr.msk.bf16.mxu0 %vm6848_vm0, %v6847_v1  ;;  %v1284_v63 = vsel %vm665_vm7, %v1281_v5, %v1283_v10  ;;  %v1485_v37 = vsel %vm762_vm6, %v1483_v32, %v1484_v34  ;;  %v7302_v5 = vld [vmem:[%s6913_s30 + $0x18] sm:$0xf] }
  0x6d   : > { %6127 = vmatmul.mubr.msk.bf16.gmra.mrb[44].mxu1 %vm318_vm1, %v5516_v59  ;;  %v1082_v18 = vsel %vm283_vm2, %v1077_v48, %v1081_v8  ;;  %v1388_v59 = vsel %vm1372_vm8, %v1383_v45, %v1387_v6  ;;  %v1396_v61 = vor.u32 %v1395_v7, %v1392_v60  ;;  %v1581_v15 = vrot.slane %v1579_v62, 4  ;;  %v7284_v45 = vld [vmem:[%s6913_s30 + $0x14] sm:$0xf]  ;;  %v6779_v60 = vld [vmem:[%s6913_s30 + $0x20] ss:$0 sps:$4 sm:$0x11]  }
  0x6e   : > { %6146 = vmatprep.mubr.msk.bf16.mxu1 %vm6848_vm0, %v6847_v1  ;;  %v7291_v51 = vcombine.low %v7281_v44, %v7284_v45  ;;  %v1795_v7 = vrot.slane %v6779_v60, 1 }
  0x6f   : > { %v1397_v48 = vsel %vm1372_vm8, %v1387_v6, %v1396_v61  ;;  %v7305_v6 = vld [vmem:[%s6913_s30 + $0x1c] sm:$0xf] }
  0x70   : > { %v1791_v55 = vrot.slane %v7291_v51, 1  ;;  %v7311_v53 = vcombine.low %v7302_v5, %v7305_v6  ;;  %v2003_v29 = vrot.slane %v7291_v51, 2 }
  0x73   : > { %6113 = vmatmul.mubr.msk.bf16.gmra.mrb[44].mxu0 %vm318_vm1, %v880_v50  ;;  %v1576_v50 = vshrl.u32 %v5555_v13, 16  ;;  %v1995_v13 = vld [vmem:[%s6913_s30 + $0x8] sm:$0xc] }
  0x74   : > { %6132 = vmatprep.mubr.msk.bf16.mxu0 %vm6848_vm0, %v6847_v1  ;;  %v7342_v61 = vcombine.low %v1995_v13, %v7278_v43  ;;  %v2207_v13 = vrot.slane %v7311_v53, 3 }
  0x75   : > { %6147 = vmatmul.mubr.msk.bf16.vlgmr.msra.gmra.mrb[48].mxu1 %vm318_vm1, %v1186_v3  ;;  %v6765_v3 = vld [vmem:[%s6913_s30 + $0x1c] ss:$0 sps:$4 sm:$0x33]   ;;  %v1578_v8 = vrot.slane %v1576_v50, 3  ;;  %v1894_v50 = vshll.u32 %v7291_v51, 16 }
  0x76   : > { %6150 = vmatprep.mubr.msk.bf16.mxu1 %vm6848_vm0, %v6847_v1  ;;  %6173 = vmatpush3.bf16.msra.mxu1 %v6762_v4  ;;  %v1583_v4 = vrot.slane %v7166_v23, 3  ;;  %v7244_v23 = vld [vmem:[%s6913_s30 + $0x1c] sm:$0xf]  ;;  %v2002_v62 = vrot.slane %v7342_v61, 2 }
  0x77   : > { %6200 = vmatprep.subr.bf16.mxu1 %v6847_v1  ;;  %v5562_v30 = vcombine.low %v7244_v23, %v7244_v23  ;;  %v5571_v33 = vcombine.low %v7141_v2, %v7244_v23  ;;  %v1900_v2 = vshrl.u32 %v7311_v53, 16 }
  0x79   : > { %v1595_v36 = vshll.u32 %v5562_v30, 16 }
  0x7b   : > { %6133 = vmatmul.mubr.msk.bf16.vlgmr.msra.gmra.mrb[48].mxu0 %vm318_vm1, %v1082_v18  ;;  %v1285_v18 = vrot.slane %v6765_v3, 2  ;;  %v1597_v40 = vrot.slane %v1595_v36, 4  ;;  %v2197_v36 = vld [vmem:[%s6913_s30 + $0x8] sm:$0x8] }
  0x7c   : > { %6159 = vmatpush3.bf16.msra.mxu0 %v6758_v19  ;;  %6136 = vmatprep.mubr.msk.bf16.mxu0 %vm6848_vm0, %v6847_v1  ;;  %v1582_v19 = vor.u32 %v1581_v15, %v1578_v8  ;;  %v6784_v8 = vld [vmem:[%s8325_s2 + $0x98] sm:$0xff]  }
  0x7d   : > { %6151 = vmatmul.mubr.msk.bf16.gmra.mrb[52].mxu1 %vm318_vm1, %v1188_v25  ;;  %6186 = vmatprep.subr.bf16.mxu0 %v6847_v1  ;;  %v1585_v25 = vor.u32 %v1584_v17, %v1583_v4  ;;  %v1286_v26 = vsel %vm665_vm7, %v1283_v10, %v1285_v18  ;;  %v1896_v4 = vrot.slane %v1894_v50, 2  ;;  %v1903_v18 = vshll.u32 %v7311_v53, 16 }
  0x7e   : > { %6154 = vmatprep.mubr.msk.bf16.mxu1 %vm6848_vm0, %v6847_v1 }
  0x7f   : > { %v1586_v27 = vsel %vm855_vm4, %v1582_v19, %v1585_v25  ;;  %v2005_v19 = vrot.slane %v7311_v53, 2  ;;  %v1905_v0 = vrot.slane %v1903_v18, 2 }
  0x81   : > { %v2006_v28 = vsel %vm665_vm7, %v2003_v29, %v2005_v19 }
  0x83   : > { %6137 = vmatmul.mubr.msk.bf16.gmra.mrb[52].mxu0 %vm318_vm1, %v1090_v35  ;;  %v1592_v35 = vshrl.u32 %v5562_v30, 16 }
  0x84   : > { %6140 = vmatprep.mubr.msk.bf16.mxu0 %vm6848_vm0, %v6847_v1 }
  0x85   : > { %6155 = vmatmul.mubr.msk.bf16.gmra.mrb[56].mxu1 %vm318_vm1, %v1190_v38  ;;  %v1590_v38 = vsel %vm855_vm4, %v1585_v25, %v1589_v24  ;;  %v1594_v39 = vrot.slane %v1592_v35, 3  ;;  %v6783_v25 = vld [vmem:[%s6913_s30 + $0x20] ss:$0 sps:$4 sm:$0x33]  }
  0x86   : > { %6174 = vmatprep.mubr.msk.bf16.mxu1 %vm6848_vm0, %v6847_v1  ;;  %v1909_v30 = vshrl.u32 %v6783_v25, 16 }
  0x87   : > { %v1598_v41 = vor.u32 %v1597_v40, %v1594_v39  ;;  %v2095_v40 = vshrl.u32 %v7342_v61, 16 }
  0x89   : > { %v1599_v14 = vsel %vm855_vm4, %v1589_v24, %v1598_v41  ;;  %v1911_v24 = vrot.slane %v1909_v30, 1  ;;  %v2097_v52 = vrot.slane %v2095_v40, 2 }
  0x8b   : > { %6141 = vmatmul.mubr.msk.bf16.gmra.mrb[56].mxu0 %vm318_vm1, %v1098_v46  ;;  %v1487_v46 = vsel %vm762_vm6, %v1484_v34, %v1486_v16  ;;  %v2007_v34 = vrot.slane %v6783_v25, 2  ;;  %v2098_v16 = vshll.u32 %v7342_v61, 16 }
  0x8c   : > { %6160 = vmatprep.mubr.msk.bf16.mxu0 %vm6848_vm0, %v6847_v1 }
  0x8d   : > { %6175 = vmatmul.mubr.msk.bf16.vlgmr.msra.gmra.mrb[60].mxu1 %vm318_vm1, %v1384_v49  ;;  %v5578_v49 = vcombine.low %v1762_v42, %v7278_v43  ;;  %v2205_v42 = vrot.slane %v7291_v51, 3 }
  0x8e   : > { %6178 = vmatprep.mubr.msk.bf16.mxu1 %vm6848_vm0, %v6847_v1  ;;  %6201 = vmatpush3.bf16.msra.mxu1 %v6767_v54 }
  0x8f   : > { %6228 = vmatprep.subr.bf16.mxu1 %v6847_v1  ;;  %v1790_v54 = vrot.slane %v5578_v49, 1  ;;  %v1883_v20 = vshrl.u32 %v5578_v49, 16  ;;  %v1886_v21 = vshll.u32 %v5578_v49, 16 }
  0x91   : > { %v1792_v47 = vsel %vm461_vm5, %v1790_v54, %v1791_v55  ;;  %v2100_v54 = vrot.slane %v2098_v16, 3 }
  0x93   : > { %6161 = vmatmul.mubr.msk.bf16.vlgmr.msra.gmra.mrb[60].mxu0 %vm318_vm1, %v1282_v57  ;;  %v1793_v57 = vrot.slane %v7311_v53, 1 }
  0x94   : > { %6187 = vmatpush3.bf16.msra.mxu0 %v6764_v58  ;;  %6164 = vmatprep.mubr.msk.bf16.mxu0 %vm6848_vm0, %v6847_v1  ;;  %v6773_v58 = vld [vmem:[%s8325_s2 + $0x80] sm:$0xff]  }
  0x95   : > { %6179 = vmatmul.mubr.msk.bf16.gmra.mrb[64].mxu1 %vm318_vm1, %v1388_v59  ;;  %6214 = vmatprep.subr.bf16.mxu0 %v6847_v1  ;;  %v1794_v59 = vsel %vm461_vm5, %v1791_v55, %v1793_v57  ;;  %v1796_v10 = vsel %vm461_vm5, %v1793_v57, %v1795_v7  ;;  %v6785_v7 = vld [vmem:[%s8325_s2 + $0xa0] sm:$0xff]  }
  0x96   : > { %6182 = vmatprep.mubr.msk.bf16.mxu1 %vm6848_vm0, %v6847_v1 }
  0x9b   : > { %6165 = vmatmul.mubr.msk.bf16.gmra.mrb[64].mxu0 %vm318_vm1, %v1284_v63  ;;  %v1888_v63 = vrot.slane %v1886_v21, 2  ;;  %v2376_v21 = vld [vmem:[%s6913_s30 + $0xc] sm:$0xf] }
  0x9c   : > { %6168 = vmatprep.mubr.msk.bf16.mxu0 %vm6848_vm0, %v6847_v1 }
  0x9d   : > { %6183 = vmatmul.mubr.msk.bf16.gmra.mrb[68].mxu1 %vm318_vm1, %v1397_v48  ;;  %v2004_v48 = vsel %vm665_vm7, %v2002_v62, %v2003_v29 }
  0x9e   : > { %6202 = vmatprep.mubr.msk.bf16.mxu1 %vm6848_vm0, %v6847_v1 }
  0xa3   : > { %6169 = vmatmul.mubr.msk.bf16.gmra.mrb[68].mxu0 %vm318_vm1, %v1286_v26  ;;  %v6781_v26 = vld [vmem:[%s8325_s2 + $0x90] sm:$0xff]  }
  0xa4   : > { %6188 = vmatprep.mubr.msk.bf16.mxu0 %vm6848_vm0, %v6847_v1 }
  0xa5   : > { %6203 = vmatmul.mubr.msk.bf16.vlgmr.msra.gmra.mrb[72].mxu1 %vm318_vm1, %v1586_v27  ;;  %v1902_v27 = vrot.slane %v1900_v2, 1 }
  0xa6   : > { %6206 = vmatprep.mubr.msk.bf16.mxu1 %vm6848_vm0, %v6847_v1  ;;  %6229 = vmatpush3.bf16.msra.mxu1 %v6771_v31  ;;  %v1912_v31 = vshll.u32 %v6783_v25, 16 }
  0xa7   : > { %6256 = vmatprep.subr.bf16.mxu1 %v6847_v1  ;;  %v1906_v32 = vor.u32 %v1905_v0, %v1902_v27 }
  0xa8   : > { %v1914_v35 = vrot.slane %v1912_v31, 2 }
  0xaa   : > { %v1915_v39 = vor.u32 %v1914_v35, %v1911_v24 }
  0xab   : > { %6189 = vmatmul.mubr.msk.bf16.vlgmr.msra.gmra.mrb[72].mxu0 %vm318_vm1, %v1485_v37 }
  0xac   : > { %6215 = vmatpush3.bf16.msra.mxu0 %v6769_v9  ;;  %6192 = vmatprep.mubr.msk.bf16.mxu0 %vm6848_vm0, %v6847_v1  ;;  %v2008_v9 = vsel %vm665_vm7, %v2005_v19, %v2007_v34 }
  0xad   : > { %6207 = vmatmul.mubr.msk.bf16.gmra.mrb[76].mxu1 %vm318_vm1, %v1590_v38  ;;  %6242 = vmatprep.subr.bf16.mxu0 %v6847_v1  ;;  %v5609_v38 = vcombine.low %v2197_v36, %v7278_v43 }
  0xae   : > { %6210 = vmatprep.mubr.msk.bf16.mxu1 %vm6848_vm0, %v6847_v1 }
  0xaf   : > { %v2204_v41 = vrot.slane %v5609_v38, 3 }
  0xb1   : > { %v2206_v57 = vsel %vm762_vm6, %v2204_v41, %v2205_v42 }
  0xb3   : > { %6193 = vmatmul.mubr.msk.bf16.gmra.mrb[76].mxu0 %vm318_vm1, %v1487_v46  ;;  %v1916_v46 = vsel %vm554_vm3, %v1906_v32, %v1915_v39 }
  0xb4   : > { %6196 = vmatprep.mubr.msk.bf16.mxu0 %vm6848_vm0, %v6847_v1 }
  0xb5   : > { %6211 = vmatmul.mubr.msk.bf16.gmra.mrb[80].mxu1 %vm318_vm1, %v1599_v14 }
  0xb6   : > { %6230 = vmatprep.mubr.msk.bf16.mxu1 %vm6848_vm0, %v6847_v1 }
  0xbb   : > { %6197 = vmatmul.mubr.msk.bf16.gmra.mrb[80].mxu0 %vm318_vm1, %v1489_v11  ;;  %v2103_v11 = vrot.slane %v1894_v50, 3 }
  0xbc   : > { %6216 = vmatprep.mubr.msk.bf16.mxu0 %vm6848_vm0, %v6847_v1 }
  0xbd   : > { %6231 = vmatmul.mubr.msk.bf16.vlgmr.msra.gmra.mrb[84].mxu1 %vm318_vm1, %v1792_v47 }
  0xbe   : > { %6234 = vmatprep.mubr.msk.bf16.mxu1 %vm6848_vm0, %v6847_v1  ;;  %6257 = vmatpush3.bf16.msra.mxu1 %v6780_v56 }
  0xbf   : > { %6284 = vmatprep.subr.bf16.mxu1 %v6847_v1 }
  0xc3   : > { %6217 = vmatmul.mubr.msk.bf16.vlgmr.msra.gmra.mrb[84].mxu0 %vm318_vm1, %v5569_v22  ;;  %v1891_v22 = vshrl.u32 %v7291_v51, 16  ;;  %v2101_v51 = vor.u32 %v2100_v54, %v2097_v52 }
  0xc4   : > { %6243 = vmatpush3.bf16.msra.mxu0 %v6773_v58  ;;  %6220 = vmatprep.mubr.msk.bf16.mxu0 %vm6848_vm0, %v6847_v1  ;;  %v6788_v58 = vld [vmem:[%s8325_s2 + $0xa8] sm:$0xff]  }
  0xc5   : > { %6235 = vmatmul.mubr.msk.bf16.gmra.mrb[88].mxu1 %vm318_vm1, %v1794_v59  ;;  %6270 = vmatprep.subr.bf16.mxu0 %v6847_v1  ;;  %v1893_v3 = vrot.slane %v1891_v22, 1  ;;  %v2102_v55 = vrot.slane %v1891_v22, 2  ;;  %v7420_v22 = vld [vmem:[%s6913_s30 + $0x10] sm:$0xf] }
  0xc6   : > { %6238 = vmatprep.mubr.msk.bf16.mxu1 %vm6848_vm0, %v6847_v1 }
  0xc7   : > { %v1897_v17 = vor.u32 %v1896_v4, %v1893_v3  ;;  %v2104_v59 = vor.u32 %v2103_v11, %v2102_v55 }
  0xc9   : > { %v1907_v37 = vsel %vm554_vm3, %v1897_v17, %v1906_v32  ;;  %v2105_v62 = vsel %vm1372_vm8, %v2101_v51, %v2104_v59 }
  0xcb   : > { %6221 = vmatmul.mubr.msk.bf16.gmra.mrb[88].mxu0 %vm318_vm1, %v5570_v12  ;;  %v1885_v12 = vrot.slane %v1883_v20, 1  ;;  %v2106_v20 = vrot.slane %v1900_v2, 2 }
  0xcc   : > { %6224 = vmatprep.mubr.msk.bf16.mxu0 %vm6848_vm0, %v6847_v1 }
  0xcd   : > { %6239 = vmatmul.mubr.msk.bf16.gmra.mrb[92].mxu1 %vm318_vm1, %v1796_v10  ;;  %v1889_v15 = vor.u32 %v1888_v63, %v1885_v12  ;;  %v6787_v12 = vld [vmem:[%s6913_s30 + $0x20] ss:$0 sps:$4 sm:$0x77]  }
  0xce   : > { %6258 = vmatprep.mubr.msk.bf16.mxu1 %vm6848_vm0, %v6847_v1  ;;  %v2111_v2 = vshrl.u32 %v6787_v12, 16  ;;  %v2209_v25 = vrot.slane %v6787_v12, 3 }
  0xcf   : > { %v1898_v23 = vsel %vm554_vm3, %v1889_v15, %v1897_v17  ;;  %v5625_v15 = vcombine.low %v2376_v21, %v7420_v22 }
  0xd0   : > { %v2113_v32 = vrot.slane %v2111_v2, 2 }
  0xd1   : > { %v2405_v38 = vshrl.u32 %v5625_v15, 16 }
  0xd3   : > { %6225 = vmatmul.mubr.msk.bf16.gmra.mrb[92].mxu0 %vm318_vm1, %v5571_v33  ;;  %v2107_v33 = vrot.slane %v1903_v18, 3  ;;  %v2114_v18 = vshll.u32 %v6787_v12, 16  ;;  %v5616_v12 = vcombine.low %v7278_v43, %v7281_v44 }
  0xd4   : > { %6244 = vmatprep.mubr.msk.bf16.mxu0 %vm6848_vm0, %v6847_v1 }
  0xd5   : > { %6259 = vmatmul.mubr.msk.bf16.vlgmr.msra.gmra.mrb[96].mxu1 %vm318_vm1, %v2004_v48  ;;  %v2108_v53 = vor.u32 %v2107_v33, %v2106_v20  ;;  %v2116_v34 = vrot.slane %v2114_v18, 3 }
  0xd6   : > { %6262 = vmatprep.mubr.msk.bf16.mxu1 %vm6848_vm0, %v6847_v1  ;;  %6285 = vmatpush3.bf16.msra.mxu1 %v6784_v8  ;;  %v2208_v8 = vsel %vm762_vm6, %v2205_v42, %v2207_v13 }
  0xd7   : > { %6312 = vmatprep.subr.bf16.mxu1 %v6847_v1  ;;  %v2109_v30 = vsel %vm1372_vm8, %v2104_v59, %v2108_v53  ;;  %v2117_v41 = vor.u32 %v2116_v34, %v2113_v32 }
  0xd9   : > { %v2118_v11 = vsel %vm1372_vm8, %v2108_v53, %v2117_v41 }
  0xdb   : > { %6245 = vmatmul.mubr.msk.bf16.vlgmr.msra.gmra.mrb[96].mxu0 %vm318_vm1, %v1898_v23  ;;  %v7439_v23 = vld [vmem:[%s6913_s30 + $0x14] sm:$0xff]  }
  0xdc   : > { %6271 = vmatpush3.bf16.msra.mxu0 %v6781_v26  ;;  %6248 = vmatprep.mubr.msk.bf16.mxu0 %vm6848_vm0, %v6847_v1  ;;  %v2407_v26 = vshll.u32 %v5625_v15, 16  ;;  %v2412_v40 = vshll.u32 %v7439_v23, 16 }
  0xdd   : > { %6263 = vmatmul.mubr.msk.bf16.gmra.mrb[100].mxu1 %vm318_vm1, %v2006_v28  ;;  %6298 = vmatprep.subr.bf16.mxu0 %v6847_v1 }
  0xde   : > { %6266 = vmatprep.mubr.msk.bf16.mxu1 %vm6848_vm0, %v6847_v1  ;;  %v2409_v39 = vrot.slane %v2407_v26, 1 }
  0xe3   : > { %6249 = vmatmul.mubr.msk.bf16.gmra.mrb[100].mxu0 %vm318_vm1, %v1907_v37 }
  0xe4   : > { %6252 = vmatprep.mubr.msk.bf16.mxu0 %vm6848_vm0, %v6847_v1 }
  0xe5   : > { %6267 = vmatmul.mubr.msk.bf16.gmra.mrb[104].mxu1 %vm318_vm1, %v2008_v9  ;;  %v2210_v9 = vsel %vm762_vm6, %v2207_v13, %v2209_v25  ;;  %v6797_v13 = vld [vmem:[%s8325_s2 + $0xb8] sm:$0xff]  }
  0xe6   : > { %6286 = vmatprep.mubr.msk.bf16.mxu1 %vm6848_vm0, %v6847_v1 }
  0xe7   : > { %v431_v14 = vpop.f32.mrb[0].mxu1 }
  0xe8   : > { %v6036_v49 = vpop.f32.mrb[1].mxu1 }
  0xe9   : > { %v434_v47 = vpop.f32.mrb[2].mxu1  ;;  %v7457_v49 = vld [vmem:[%s6913_s30 + $0x1c] sm:$0xff]  }
  0xea   : > { %v6037_v56 = vpop.f32.mrb[3].mxu1  ;;  %v2424_v43 = vshrl.u32 %v7457_v49, 16 }
  0xeb   : > { %6253 = vmatmul.mubr.msk.bf16.gmra.mrb[104].mxu0 %vm318_vm1, %v1916_v46  ;;  %v2410_v46 = vor.u32 %v2409_v39, %v2405_v38 }
  0xec   : > { %6272 = vmatprep.mubr.msk.bf16.mxu0 %vm6848_vm0, %v6847_v1 }
  0xed   : > { %6287 = vmatmul.mubr.msk.bf16.vlgmr.msra.gmra.mrb[108].mxu1 %vm318_vm1, %v2206_v57 }
  0xee   : > { %v362_v60 = vpop.f32.mrb[0].mxu0  ;;  %6290 = vmatprep.mubr.msk.bf16.mxu1 %vm6848_vm0, %v6847_v1  ;;  %6313 = vmatpush3.bf16.msra.mxu1 %v6788_v58 }
  0xef   : > { %v7416_v10 = vadd.f32 %v431_v14, %v362_v60  ;;  %v6022_v61 = vpop.f32.mrb[1].mxu0  ;;  %6340 = vmatprep.subr.bf16.mxu1 %v6847_v1  ;;  %v2414_v14 = vrot.slane %v2412_v40, 1  ;;  %v2416_v60 = vshrl.u32 %v7439_v23, 16 }
  0xf0   : > { %v365_v50 = vpop.f32.mrb[2].mxu0  ;;  %v439_v29 = vpop.f32.mrb[4].mxu1 }
  0xf1   : > { %v7427_v63 = vadd.f32 %v434_v47, %v365_v50  ;;  %v6023_v3 = vpop.f32.mrb[3].mxu0  ;;  %v6040_v4 = vpop.f32.mrb[5].mxu1  ;;  %v2415_v59 = vsel %vm283_vm2, %v2410_v46, %v2414_v14  ;;  %v2418_v21 = vor.u32 %v2416_v60, %v2414_v14 }
  0xf2   : > { %v442_v48 = vpop.f32.mrb[6].mxu1  ;;  %v2510_v3 = vld [vmem:[%s6913_s30 + $0xc] sm:$0xe] }
  0xf3   : > { %6273 = vmatmul.mubr.msk.bf16.vlgmr.msra.gmra.mrb[108].mxu0 %vm318_vm1, %v2105_v62  ;;  %v6041_v17 = vpop.f32.mrb[7].mxu1  ;;  %v7479_v62 = vld [vmem:[%s6913_s30 + $0x24] ss:$0 sps:$4 sm:$0x11]  }
  0xf4   : > { %6299 = vmatpush3.bf16.msra.mxu0 %v6785_v7  ;;  %6276 = vmatprep.mubr.msk.bf16.mxu0 %vm6848_vm0, %v6847_v1  ;;  %v2420_v7 = vshll.u32 %v7457_v49, 16  ;;  %v2428_v44 = vshll.u32 %v7479_v62, 16 }
  0xf5   : > { %6291 = vmatmul.mubr.msk.bf16.gmra.mrb[112].mxu1 %vm318_vm1, %v2208_v8  ;;  %6326 = vmatprep.subr.bf16.mxu0 %v6847_v1 }
  0xf6   : > { %v370_v19 = vpop.f32.mrb[4].mxu0  ;;  %6294 = vmatprep.mubr.msk.bf16.mxu1 %vm6848_vm0, %v6847_v1  ;;  %v2422_v50 = vrot.slane %v2420_v7, 1 }
  0xf7   : > { %v7441_v27 = vadd.f32 %v439_v29, %v370_v19  ;;  %v6026_v0 = vpop.f32.mrb[5].mxu0  ;;  %v7496_v19 = vcombine.low %v2510_v3, %v7420_v22  ;;  %v2518_v3 = vrot.slane %v7439_v23, 1 }
  0xf8   : > { %v373_v28 = vpop.f32.mrb[6].mxu0  ;;  %v447_v31 = vpop.f32.mrb[8].mxu1  ;;  %v2423_v18 = vsel %vm283_vm2, %v2418_v21, %v2422_v50  ;;  %v2426_v0 = vor.u32 %v2424_v43, %v2422_v50 }
  0xf9   : > { %v7444_v24 = vadd.f32 %v442_v48, %v373_v28  ;;  %v6027_v35 = vpop.f32.mrb[7].mxu0  ;;  %v6044_v36 = vpop.f32.mrb[9].mxu1  ;;  %v6790_v48 = vld [vmem:[%s8325_s2 + $0xb0] sm:$0xff]   ;;  %v2430_v28 = vrot.slane %v2428_v44, 1 }
  0xfa   : > { %v450_v37 = vpop.f32.mrb[10].mxu1  ;;  %v5617_v35 = vcombine.low %v7284_v45, %v7302_v5  ;;  %v2289_v5 = vld [vmem:[%s6913_s30 + $0x20] sm:$0xf] }
  0xfb   : > { %6277 = vmatmul.mubr.msk.bf16.gmra.mrb[112].mxu0 %vm318_vm1, %v2109_v30  ;;  %v6045_v16 = vpop.f32.mrb[11].mxu1  ;;  %v2610_v30 = vshrl.u32 %v7496_v19, 16  ;;  %v2431_v46 = vsel %vm283_vm2, %v2426_v0, %v2430_v28 }
  0xfc   : > { %6280 = vmatprep.mubr.msk.bf16.mxu0 %vm6848_vm0, %v6847_v1  ;;  %v2617_v16 = vrot.slane %v2416_v60, 1 }
  0xfd   : > { %6295 = vmatmul.mubr.msk.bf16.gmra.mrb[116].mxu1 %vm318_vm1, %v2210_v9  ;;  %v2612_v14 = vrot.slane %v2610_v30, 1 }
  0xfe   : > { %v378_v42 = vpop.f32.mrb[8].mxu0  ;;  %6314 = vmatprep.mubr.msk.bf16.mxu1 %vm6848_vm0, %v6847_v1 }
  0xff   : > { %v7459_v52 = vadd.f32 %v447_v31, %v378_v42  ;;  %v6030_v54 = vpop.f32.mrb[9].mxu0  ;;  %v2613_v31 = vshll.u32 %v7496_v19, 16 }
 0x100   : > { %v381_v55 = vpop.f32.mrb[10].mxu0  ;;  %v629_v47 = vpop.f32.mrb[12].mxu1 }
 0x101   : > { %v7462_v56 = vadd.f32 %v450_v37, %v381_v55  ;;  %v6031_v57 = vpop.f32.mrb[11].mxu0  ;;  %v6064_v58 = vpop.f32.mrb[13].mxu1  ;;  %v2615_v54 = vrot.slane %v2613_v31, 2 }
 0x102   : > { %v632_v51 = vpop.f32.mrb[14].mxu1  ;;  %v5618_v58 = vcombine.low %v7305_v6, %v2289_v5 }
 0x103   : > { %6281 = vmatmul.mubr.msk.bf16.gmra.mrb[116].mxu0 %vm318_vm1, %v2118_v11  ;;  %v6065_v61 = vpop.f32.mrb[15].mxu1  ;;  %v2616_v11 = vor.u32 %v2615_v54, %v2612_v14 }
 0x104   : > { %6300 = vmatprep.mubr.msk.bf16.mxu0 %vm6848_vm0, %v6847_v1 }
 0x105   : > { %6315 = vmatmul.mubr.msk.bf16.vlgmr.msra.gmra.mrb[120].mxu1 %vm318_vm1, %v2415_v59 }
 0x106   : > { %v518_v20 = vpop.f32.mrb[12].mxu0  ;;  %6318 = vmatprep.mubr.msk.bf16.mxu1 %vm6848_vm0, %v6847_v1  ;;  %6341 = vmatpush3.bf16.msra.mxu1 %v6797_v13 }
 0x107   : > { %v541_v29 = vadd.f32 %v518_v20, %v7416_v10  ;;  %v6050_v33 = vpop.f32.mrb[13].mxu0  ;;  %6368 = vmatprep.subr.bf16.mxu1 %v6847_v1 }
 0x108   : > { %v521_v4 = vpop.f32.mrb[14].mxu0  ;;  %v637_v8 = vpop.f32.mrb[16].mxu1  ;;  %v2622_v33 = vrot.slane %v2420_v7, 2 }
 0x109   : > { %v542_v15 = vadd.f32 %v521_v4, %v7427_v63  ;;  %v7490_v17 = vadd.f32 %v629_v47, %v541_v29  ;;  %v6051_v53 = vpop.f32.mrb[15].mxu0  ;;  %v6068_v2 = vpop.f32.mrb[17].mxu1  ;;  %v2621_v29 = vrot.slane %v2424_v43, 1 }
 0x10a   : > { %v640_v10 = vpop.f32.mrb[18].mxu1 }
 0x10b   : > { %v7498_v25 = vadd.f32 %v632_v51, %v542_v15  ;;  %6301 = vmatmul.mubr.msk.bf16.vlgmr.msra.gmra.mrb[120].mxu0 %vm318_vm1, %v5616_v12  ;;  %v6069_v26 = vpop.f32.mrb[19].mxu1  ;;  %v7536_v12 = vld [vmem:[%s6913_s30 + $0x24] ss:$0 sps:$4 sm:$0x33]   ;;  %v2623_v7 = vor.u32 %v2622_v33, %v2621_v29 }
 0x10c   : > { %6327 = vmatpush3.bf16.msra.mxu0 %v6790_v48  ;;  %6304 = vmatprep.mubr.msk.bf16.mxu0 %vm6848_vm0, %v6847_v1  ;;  %v2626_v48 = vshrl.u32 %v7536_v12, 16 }
 0x10d   : > { %6319 = vmatmul.mubr.msk.bf16.gmra.mrb[124].mxu1 %vm318_vm1, %v2423_v18  ;;  %6354 = vmatprep.subr.bf16.mxu0 %v6847_v1  ;;  %v6799_v18 = vld [vmem:[%s8325_s2 + $0xc0] sm:$0xff]  }
 0x10e   : > { %v526_v63 = vpop.f32.mrb[16].mxu0  ;;  %6322 = vmatprep.mubr.msk.bf16.mxu1 %vm6848_vm0, %v6847_v1  ;;  %v2628_v30 = vrot.slane %v2626_v48, 1 }
 0x10f   : > { %v543_v32 = vadd.f32 %v526_v63, %v7441_v27  ;;  %v6054_v34 = vpop.f32.mrb[17].mxu0  ;;  %v2618_v27 = vrot.slane %v2412_v40, 2 }
 0x110   : > { %v529_v36 = vpop.f32.mrb[18].mxu0  ;;  %v645_v37 = vpop.f32.mrb[20].mxu1 }
 0x111   : > { %v544_v9 = vadd.f32 %v529_v36, %v7444_v24  ;;  %v7513_v38 = vadd.f32 %v637_v8, %v543_v32  ;;  %v6055_v39 = vpop.f32.mrb[19].mxu0  ;;  %v6072_v41 = vpop.f32.mrb[21].mxu1  ;;  %v2619_v47 = vor.u32 %v2618_v27, %v2617_v16  ;;  %v2629_v8 = vshll.u32 %v7536_v12, 16  ;;  %v2873_v27 = vld [vmem:[%s8324_s1 + $0x10] sm:$0xff] }
 0x112   : > { %v648_v42 = vpop.f32.mrb[22].mxu1  ;;  %v6849_v41 = vmov 0  }
 0x113   : > { %v7518_v55 = vadd.f32 %v640_v10, %v544_v9  ;;  %6305 = vmatmul.mubr.msk.bf16.gmra.mrb[124].mxu0 %vm318_vm1, %v5617_v35  ;;  %v6073_v45 = vpop.f32.mrb[23].mxu1  ;;  %v2620_v50 = vsel %vm554_vm3, %v2616_v11, %v2619_v47  ;;  %v2624_v28 = vsel %vm554_vm3, %v2619_v47, %v2623_v7  ;;  %6731 = vset.pattern.permute.xlu0 %v6849_v41  ;;  %v2874_v47 = vld [vmem:[%s8324_s1 + $0x18] sm:$0xff] }
 0x114   : > { %6308 = vmatprep.mubr.msk.bf16.mxu0 %vm6848_vm0, %v6847_v1  ;;  %2917 = vst.msk [vmem:[#allocation2 + $0x20] sm:$0xff] %vm318_vm1, %v6849_v41  ;;  %6732 = vset.pattern.permute.xlu1 %v6849_v41 }
 0x115   : > { %6323 = vmatmul.mubr.msk.bf16.gmra.mrb[128].mxu1 %vm318_vm1, %v2431_v46  ;;  %2889 = vperm.xlu1 %6732, %v2873_v27   ;;  %2916 = vst.msk [vmem:[#allocation2 + $0x18] sm:$0x80] %vm2915_vm9, %v6849_v41 }
 0x116   : > { %v534_v24 = vpop.f32.mrb[20].mxu0  ;;  %6342 = vmatprep.mubr.msk.bf16.mxu1 %vm6848_vm0, %v6847_v1  ;;  %2914 = vst.msk [vmem:[#allocation2] sm:$0x7f] %vm2913_vm10, %v6849_v41 }
 0x117   : > { %v545_v40 = vadd.f32 %v534_v24, %v7459_v52  ;;  %v6058_v57 = vpop.f32.mrb[21].mxu0 }
 0x118   : > { %v537_v51 = vpop.f32.mrb[22].mxu0  ;;  %v819_v59 = vpop.f32.mrb[24].mxu1  ;;  %v2712_v57 = vld [vmem:[%s6913_s30 + $0xc] sm:$0xc] }
 0x119   : > { %v546_v60 = vadd.f32 %v537_v51, %v7462_v56  ;;  %v7530_v13 = vadd.f32 %v645_v37, %v545_v40  ;;  %v6059_v61 = vpop.f32.mrb[23].mxu0  ;;  %v6092_v20 = vpop.f32.mrb[25].mxu1  ;;  %v2517_v56 = vrot.slane %v7496_v19, 1  ;;  %v2522_v40 = vrot.slane %v7479_v62, 1  ;;  %2894 = vperm.xlu1 %6732, %v2874_v47   ;;  %v2875_v62 = vld [vmem:[%s8324_s1 + $0x20] sm:$0xff] }
 0x11a   : > { %v822_v21 = vpop.f32.mrb[26].mxu1 }
 0x11b   : > { %v7538_v52 = vadd.f32 %v648_v42, %v546_v60  ;;  %6309 = vmatmul.mubr.msk.bf16.gmra.mrb[128].mxu0 %vm318_vm1, %v5618_v58  ;;  %v6093_v6 = vpop.f32.mrb[27].mxu1  ;;  %v2519_v10 = vsel %vm461_vm5, %v2517_v56, %v2518_v3  ;;  %v2871_v42 = vld [vmem:[%s8324_s1] sm:$0xff] }
 0x11c   : > { %6328 = vmatprep.mubr.msk.bf16.mxu0 %vm6848_vm0, %v6847_v1  ;;  %2879 = vperm.xlu0 %6731, %v2871_v42  }
 0x11d   : > { %6343 = vmatmul.mubr.msk.bf16.vlgmr.msra.gmra.mrb[132].mxu1 %vm318_vm1, %v2620_v50 }
 0x11e   : > { %v722_v4 = vpop.f32.mrb[24].mxu0  ;;  %6346 = vmatprep.mubr.msk.bf16.mxu1 %vm6848_vm0, %v6847_v1 }
 0x11f   : > { %v745_v15 = vadd.f32 %v722_v4, %v7490_v17  ;;  %v6078_v53 = vpop.f32.mrb[25].mxu0  ;;  %v2631_v17 = vrot.slane %v2629_v8, 2 }
 0x120   : > { %v725_v2 = vpop.f32.mrb[26].mxu0  ;;  %v827_v43 = vpop.f32.mrb[28].mxu1 }
 0x121   : > { %v746_v44 = vadd.f32 %v725_v2, %v7498_v25  ;;  %v7556_v19 = vadd.f32 %v819_v59, %v745_v15  ;;  %v6079_v26 = vpop.f32.mrb[27].mxu0  ;;  %v6096_v63 = vpop.f32.mrb[29].mxu1  ;;  %v2520_v25 = vrot.slane %v7457_v49, 1  ;;  %v2632_v35 = vor.u32 %v2631_v17, %v2628_v30 }
 0x122   : > { %v830_v0 = vpop.f32.mrb[30].mxu1 }
 0x123   : > { %v7559_v31 = vadd.f32 %v822_v21, %v746_v44  ;;  %6329 = vmatmul.mubr.msk.bf16.vlgmr.msra.gmra.mrb[132].mxu0 %vm318_vm1, %v2519_v10  ;;  %v6097_v32 = vpop.f32.mrb[31].mxu1  ;;  %v2521_v39 = vsel %vm461_vm5, %v2518_v3, %v2520_v25  ;;  %v2633_v5 = vsel %vm554_vm3, %v2623_v7, %v2632_v35  ;;  %v2523_v61 = vsel %vm461_vm5, %v2520_v25, %v2522_v40 }
 0x124   : > { %6355 = vmatpush3.bf16.msra.mxu0 %v6799_v18  ;;  %6332 = vmatprep.mubr.msk.bf16.mxu0 %vm6848_vm0, %v6847_v1  ;;  %v5649_v21 = vcombine.low %v2712_v57, %v7420_v22 }
 0x125   : > { %6347 = vmatmul.mubr.msk.bf16.gmra.mrb[136].mxu1 %vm318_vm1, %v2624_v28  ;;  %6382 = vmatprep.subr.bf16.mxu0 %v6847_v1 }
 0x126   : > { %v730_v34 = vpop.f32.mrb[28].mxu0  ;;  %6350 = vmatprep.mubr.msk.bf16.mxu1 %vm6848_vm0, %v6847_v1  ;;  %v2719_v4 = vrot.slane %v5649_v21, 2 }
 0x127   : > { %v747_v36 = vadd.f32 %v730_v34, %v7513_v38  ;;  %v6082_v37 = vpop.f32.mrb[29].mxu0 }
 0x128   : > { %v733_v9 = vpop.f32.mrb[30].mxu0  ;;  %v835_v16 = vpop.f32.mrb[32].mxu1 }
 0x129   : > { %v748_v46 = vadd.f32 %v733_v9, %v7518_v55  ;;  %v844_v38 = vadd.f32 %v827_v43, %v747_v36  ;;  %v6083_v14 = vpop.f32.mrb[31].mxu0  ;;  %v6100_v54 = vpop.f32.mrb[33].mxu1  ;;  %v2872_v55 = vld [vmem:[%s8324_s1 + $0x8] sm:$0xff] }
 0x12a   : > { %v838_v45 = vpop.f32.mrb[34].mxu1  ;;  %2884 = vperm.xlu0 %6731, %v2872_v55  }
 0x12b   : > { %v845_v24 = vadd.f32 %v830_v0, %v748_v46  ;;  %6333 = vmatmul.mubr.msk.bf16.gmra.mrb[136].mxu0 %vm318_vm1, %v2521_v39  ;;  %v6101_v11 = vpop.f32.mrb[35].mxu1 }
 0x12c   : > { %6336 = vmatprep.mubr.msk.bf16.mxu0 %vm6848_vm0, %v6847_v1 }
 0x12d   : > { %6351 = vmatmul.mubr.msk.bf16.gmra.mrb[140].mxu1 %vm318_vm1, %v2633_v5 }
 0x12e   : > { %v738_v58 = vpop.f32.mrb[32].mxu0  ;;  %6370 = vmatprep.mubr.msk.bf16.mxu1 %vm6848_vm0, %v6847_v1  ;;  %2899 = vperm.xlu0 %6731, %v2875_v62  }
 0x12f   : > { %v749_v51 = vadd.f32 %v738_v58, %v7530_v13  ;;  %v6086_v59 = vpop.f32.mrb[33].mxu0  ;;  %v2876_v13 = vld [vmem:[%s8324_s1 + $0x28] sm:$0xff] }
 0x130   : > { %v741_v60 = vpop.f32.mrb[34].mxu0  ;;  %v1014_v20 = vpop.f32.mrb[36].mxu1  ;;  %2904 = vperm.xlu1 %6732, %v2876_v13  }
 0x131   : > { %v750_v50 = vadd.f32 %v741_v60, %v7538_v52  ;;  %v6087_v29 = vpop.f32.mrb[35].mxu0  ;;  %v6120_v33 = vpop.f32.mrb[37].mxu1  ;;  %v846_v6 = vadd.f32 %v835_v16, %v749_v51  ;;  %v2720_v52 = vrot.slane %v7439_v23, 2  ;;  %v2722_v23 = vrot.slane %v7457_v49, 2 }
 0x132   : > { %v1017_v56 = vpop.f32.mrb[38].mxu1  ;;  %v2724_v49 = vrot.slane %v7536_v12, 2 }
 0x133   : > { %6337 = vmatmul.mubr.msk.bf16.gmra.mrb[140].mxu0 %vm318_vm1, %v2523_v61  ;;  %v6121_v3 = vpop.f32.mrb[39].mxu1  ;;  %v847_v22 = vadd.f32 %v838_v45, %v750_v50  ;;  %v2721_v53 = vsel %vm665_vm7, %v2719_v4, %v2720_v52  ;;  %v2723_v32 = vsel %vm665_vm7, %v2720_v52, %v2722_v23 }
 0x134   : > { %6356 = vmatprep.mubr.msk.bf16.mxu0 %vm6848_vm0, %v6847_v1  ;;  %v2725_v14 = vsel %vm665_vm7, %v2722_v23, %v2724_v49 }
 0x136   : > { %v930_v7 = vpop.f32.mrb[36].mxu0 }
 0x137   : > { %v953_v48 = vadd.f32 %v930_v7, %v7556_v19  ;;  %v6106_v8 = vpop.f32.mrb[37].mxu0 }
 0x138   : > { %v933_v15 = vpop.f32.mrb[38].mxu0  ;;  %v1022_v2 = vpop.f32.mrb[40].mxu1 }
 0x139   : > { %v954_v10 = vadd.f32 %v933_v15, %v7559_v31  ;;  %v6107_v18 = vpop.f32.mrb[39].mxu0  ;;  %v6124_v43 = vpop.f32.mrb[41].mxu1  ;;  %v1037_v44 = vadd.f32 %v1014_v20, %v953_v48 }
 0x13a   : > { %v1025_v26 = vpop.f32.mrb[42].mxu1 }
 0x13b   : > { %6357 = vmatmul.mubr.msk.bf16.vlgmr.msra.gmra.mrb[144].mxu0 %vm318_vm1, %v2721_v53  ;;  %v6125_v63 = vpop.f32.mrb[43].mxu1  ;;  %v1038_v0 = vadd.f32 %v1017_v56, %v954_v10 }
 0x13c   : > { %6360 = vmatprep.mubr.msk.bf16.mxu0 %vm6848_vm0, %v6847_v1 }
 0x13e   : > { %v938_v19 = vpop.f32.mrb[40].mxu0 }
 0x13f   : > { %v955_v28 = vadd.f32 %v938_v19, %v844_v38  ;;  %v6110_v30 = vpop.f32.mrb[41].mxu0 }
 0x140   : > { %v941_v17 = vpop.f32.mrb[42].mxu0  ;;  %v1030_v31 = vpop.f32.mrb[44].mxu1 }
 0x141   : > { %v956_v25 = vadd.f32 %v941_v17, %v845_v24  ;;  %v6111_v34 = vpop.f32.mrb[43].mxu0  ;;  %v6128_v35 = vpop.f32.mrb[45].mxu1  ;;  %v1039_v36 = vadd.f32 %v1022_v2, %v955_v28 }
 0x142   : > { %v1033_v37 = vpop.f32.mrb[46].mxu1 }
 0x143   : > { %6361 = vmatmul.mubr.msk.bf16.gmra.mrb[148].mxu0 %vm318_vm1, %v2723_v32  ;;  %v6129_v9 = vpop.f32.mrb[47].mxu1  ;;  %v1040_v39 = vadd.f32 %v1025_v26, %v956_v25 }
 0x144   : > { %6364 = vmatprep.mubr.msk.bf16.mxu0 %vm6848_vm0, %v6847_v1 }
 0x146   : > { %v946_v16 = vpop.f32.mrb[44].mxu0 }
 0x147   : > { %v957_v42 = vadd.f32 %v946_v16, %v846_v6  ;;  %v6114_v46 = vpop.f32.mrb[45].mxu0 }
 0x148   : > { %v949_v38 = vpop.f32.mrb[46].mxu0  ;;  %v1240_v54 = vpop.f32.mrb[48].mxu1 }
 0x149   : > { %v958_v27 = vadd.f32 %v949_v38, %v847_v22  ;;  %v1041_v45 = vadd.f32 %v1030_v31, %v957_v42  ;;  %v6115_v5 = vpop.f32.mrb[47].mxu0  ;;  %v6148_v24 = vpop.f32.mrb[49].mxu1 }
 0x14a   : > { %v1243_v11 = vpop.f32.mrb[50].mxu1 }
 0x14b   : > { %v1042_v55 = vadd.f32 %v1033_v37, %v958_v27  ;;  %6365 = vmatmul.mubr.msk.bf16.gmra.mrb[152].mxu0 %vm318_vm1, %v2725_v14  ;;  %v6149_v47 = vpop.f32.mrb[51].mxu1 }
 0x14c   : > { %6384 = vmatprep.mubr.msk.bf16.mxu0 %vm6848_vm0, %v6847_v1 }
 0x14e   : > { %v1148_v12 = vpop.f32.mrb[48].mxu0 }
 0x14f   : > { %v1171_v40 = vadd.f32 %v1148_v12, %v1037_v44  ;;  %v6134_v57 = vpop.f32.mrb[49].mxu0 }
 0x150   : > { %v1151_v58 = vpop.f32.mrb[50].mxu0  ;;  %v1248_v51 = vpop.f32.mrb[52].mxu1 }
 0x151   : > { %v1172_v59 = vadd.f32 %v1151_v58, %v1038_v0  ;;  %v1263_v60 = vadd.f32 %v1240_v54, %v1171_v40  ;;  %v6135_v61 = vpop.f32.mrb[51].mxu0  ;;  %v6152_v20 = vpop.f32.mrb[53].mxu1 }
 0x152   : > { %v1251_v21 = vpop.f32.mrb[54].mxu1 }
 0x153   : > { %v1264_v62 = vadd.f32 %v1243_v11, %v1172_v59  ;;  %v6153_v50 = vpop.f32.mrb[55].mxu1 }
 0x156   : > { %v1156_v29 = vpop.f32.mrb[52].mxu0 }
 0x157   : > { %v1173_v33 = vadd.f32 %v1156_v29, %v1039_v36  ;;  %v6138_v6 = vpop.f32.mrb[53].mxu0 }
 0x158   : > { %v1159_v13 = vpop.f32.mrb[54].mxu0  ;;  %v1256_v56 = vpop.f32.mrb[56].mxu1 }
 0x159   : > { %v1174_v3 = vadd.f32 %v1159_v13, %v1040_v39  ;;  %v1265_v22 = vadd.f32 %v1248_v51, %v1173_v33  ;;  %v6139_v4 = vpop.f32.mrb[55].mxu0  ;;  %v6156_v52 = vpop.f32.mrb[57].mxu1 }
 0x15a   : > { %v1259_v7 = vpop.f32.mrb[58].mxu1 }
 0x15b   : > { %v1266_v48 = vadd.f32 %v1251_v21, %v1174_v3  ;;  %v6157_v8 = vpop.f32.mrb[59].mxu1 }
 0x15e   : > { %v1164_v15 = vpop.f32.mrb[56].mxu0 }
 0x15f   : > { %v1175_v53 = vadd.f32 %v1164_v15, %v1041_v45  ;;  %v6142_v2 = vpop.f32.mrb[57].mxu0 }
 0x160   : > { %v1167_v10 = vpop.f32.mrb[58].mxu0  ;;  %v1447_v18 = vpop.f32.mrb[60].mxu1 }
 0x161   : > { %v1176_v43 = vadd.f32 %v1167_v10, %v1042_v55  ;;  %v1267_v44 = vadd.f32 %v1256_v56, %v1175_v53  ;;  %v6143_v26 = vpop.f32.mrb[59].mxu0  ;;  %v6176_v63 = vpop.f32.mrb[61].mxu1 }
 0x162   : > { %v1450_v0 = vpop.f32.mrb[62].mxu1 }
 0x163   : > { %v1268_v23 = vadd.f32 %v1259_v7, %v1176_v43  ;;  %v6177_v19 = vpop.f32.mrb[63].mxu1 }
 0x166   : > { %v1336_v28 = vpop.f32.mrb[60].mxu0 }
 0x167   : > { %v1359_v30 = vadd.f32 %v1336_v28, %v1263_v60  ;;  %v6162_v17 = vpop.f32.mrb[61].mxu0 }
 0x168   : > { %v1339_v32 = vpop.f32.mrb[62].mxu0  ;;  %v1455_v31 = vpop.f32.mrb[64].mxu1 }
 0x169   : > { %v1360_v25 = vadd.f32 %v1339_v32, %v1264_v62  ;;  %v1470_v34 = vadd.f32 %v1447_v18, %v1359_v30  ;;  %v6163_v35 = vpop.f32.mrb[63].mxu0  ;;  %v6180_v36 = vpop.f32.mrb[65].mxu1 }
 0x16a   : > { %v1458_v37 = vpop.f32.mrb[66].mxu1 }
 0x16b   : > { %v1471_v9 = vadd.f32 %v1450_v0, %v1360_v25  ;;  %v6181_v39 = vpop.f32.mrb[67].mxu1 }
 0x16e   : > { %v1344_v49 = vpop.f32.mrb[64].mxu0 }
 0x16f   : > { %v1361_v16 = vadd.f32 %v1344_v49, %v1265_v22  ;;  %v6166_v42 = vpop.f32.mrb[65].mxu0 }
 0x170   : > { %v1347_v46 = vpop.f32.mrb[66].mxu0  ;;  %v1463_v38 = vpop.f32.mrb[68].mxu1 }
 0x171   : > { %v1362_v14 = vadd.f32 %v1347_v46, %v1266_v48  ;;  %v1472_v54 = vadd.f32 %v1455_v31, %v1361_v16  ;;  %v6167_v27 = vpop.f32.mrb[67].mxu0  ;;  %v6184_v45 = vpop.f32.mrb[69].mxu1 }
 0x172   : > { %v1466_v5 = vpop.f32.mrb[70].mxu1 }
 0x173   : > { %v1473_v24 = vadd.f32 %v1458_v37, %v1362_v14  ;;  %v6185_v11 = vpop.f32.mrb[71].mxu1 }
 0x176   : > { %v1352_v55 = vpop.f32.mrb[68].mxu0 }
 0x177   : > { %v1363_v47 = vadd.f32 %v1352_v55, %v1267_v44  ;;  %v6170_v12 = vpop.f32.mrb[69].mxu0 }
 0x178   : > { %v1355_v40 = vpop.f32.mrb[70].mxu0  ;;  %v1649_v57 = vpop.f32.mrb[72].mxu1 }
 0x179   : > { %v1364_v58 = vadd.f32 %v1355_v40, %v1268_v23  ;;  %v1474_v51 = vadd.f32 %v1463_v38, %v1363_v47  ;;  %v6171_v59 = vpop.f32.mrb[71].mxu0  ;;  %v6204_v60 = vpop.f32.mrb[73].mxu1 }
 0x17a   : > { %v1652_v61 = vpop.f32.mrb[74].mxu1 }
 0x17b   : > { %v1475_v20 = vadd.f32 %v1466_v5, %v1364_v58  ;;  %v6205_v21 = vpop.f32.mrb[75].mxu1 }
 0x17e   : > { %v1539_v62 = vpop.f32.mrb[72].mxu0 }
 0x17f   : > { %v1562_v50 = vadd.f32 %v1539_v62, %v1470_v34  ;;  %v6190_v29 = vpop.f32.mrb[73].mxu0 }
 0x180   : > { %v1542_v33 = vpop.f32.mrb[74].mxu0  ;;  %v1657_v6 = vpop.f32.mrb[76].mxu1 }
 0x181   : > { %v1563_v13 = vadd.f32 %v1542_v33, %v1471_v9  ;;  %v1672_v56 = vadd.f32 %v1649_v57, %v1562_v50  ;;  %v6191_v3 = vpop.f32.mrb[75].mxu0  ;;  %v6208_v22 = vpop.f32.mrb[77].mxu1 }
 0x182   : > { %v1660_v4 = vpop.f32.mrb[78].mxu1 }
 0x183   : > { %v1673_v52 = vadd.f32 %v1652_v61, %v1563_v13  ;;  %v6209_v7 = vpop.f32.mrb[79].mxu1 }
 0x186   : > { %v1547_v48 = vpop.f32.mrb[76].mxu0 }
 0x187   : > { %v1564_v8 = vadd.f32 %v1547_v48, %v1472_v54  ;;  %v6194_v15 = vpop.f32.mrb[77].mxu0 }
 0x188   : > { %v1550_v53 = vpop.f32.mrb[78].mxu0  ;;  %v1665_v2 = vpop.f32.mrb[80].mxu1 }
 0x189   : > { %v1565_v10 = vadd.f32 %v1550_v53, %v1473_v24  ;;  %v1674_v18 = vadd.f32 %v1657_v6, %v1564_v8  ;;  %v6195_v43 = vpop.f32.mrb[79].mxu0  ;;  %v6212_v44 = vpop.f32.mrb[81].mxu1 }
 0x18a   : > { %v1668_v26 = vpop.f32.mrb[82].mxu1 }
 0x18b   : > { %v1675_v63 = vadd.f32 %v1660_v4, %v1565_v10  ;;  %v6213_v0 = vpop.f32.mrb[83].mxu1 }
 0x18e   : > { %v1555_v23 = vpop.f32.mrb[80].mxu0 }
 0x18f   : > { %v1566_v19 = vadd.f32 %v1555_v23, %v1474_v51  ;;  %v6198_v28 = vpop.f32.mrb[81].mxu0 }
 0x190   : > { %v1558_v30 = vpop.f32.mrb[82].mxu0  ;;  %v1846_v17 = vpop.f32.mrb[84].mxu1 }
 0x191   : > { %v1567_v32 = vadd.f32 %v1558_v30, %v1475_v20  ;;  %v1676_v31 = vadd.f32 %v1665_v2, %v1566_v19  ;;  %v6199_v25 = vpop.f32.mrb[83].mxu0  ;;  %v6232_v34 = vpop.f32.mrb[85].mxu1  ;;  %v6803_v30 = vld [vmem:[%s8327_s4] sm:$0xff]  }
 0x192   : > { %v1849_v35 = vpop.f32.mrb[86].mxu1  ;;  %6383 = vmatpush3.bf16.msra.mxu0 %v6803_v30 }
 0x193   : > { %v1677_v36 = vadd.f32 %v1668_v26, %v1567_v32  ;;  %v6233_v37 = vpop.f32.mrb[87].mxu1  ;;  %6410 = vmatprep.subr.bf16.mxu0 %v6847_v1 }
 0x196   : > { %v1733_v9 = vpop.f32.mrb[84].mxu0 }
 0x197   : > { %v1756_v39 = vadd.f32 %v1733_v9, %v1672_v56  ;;  %v6218_v49 = vpop.f32.mrb[85].mxu0 }
 0x198   : > { %v1736_v16 = vpop.f32.mrb[86].mxu0  ;;  %v1854_v42 = vpop.f32.mrb[88].mxu1 }
 0x199   : > { %v1757_v46 = vadd.f32 %v1736_v16, %v1673_v52  ;;  %v1869_v38 = vadd.f32 %v1846_v17, %v1756_v39  ;;  %v6219_v14 = vpop.f32.mrb[87].mxu0  ;;  %v6236_v54 = vpop.f32.mrb[89].mxu1 }
 0x19a   : > { %v1857_v27 = vpop.f32.mrb[90].mxu1 }
 0x19b   : > { %v1870_v45 = vadd.f32 %v1849_v35, %v1757_v46  ;;  %v6237_v5 = vpop.f32.mrb[91].mxu1 }
 0x19e   : > { %v1741_v24 = vpop.f32.mrb[88].mxu0 }
 0x19f   : > { %v1758_v11 = vadd.f32 %v1741_v24, %v1674_v18  ;;  %v6222_v55 = vpop.f32.mrb[89].mxu0 }
 0x1a0   : > { %v1744_v47 = vpop.f32.mrb[90].mxu0  ;;  %v1862_v12 = vpop.f32.mrb[92].mxu1 }
 0x1a1   : > { %v1759_v40 = vadd.f32 %v1744_v47, %v1675_v63  ;;  %v1871_v57 = vadd.f32 %v1854_v42, %v1758_v11  ;;  %v6223_v58 = vpop.f32.mrb[91].mxu0  ;;  %v6240_v51 = vpop.f32.mrb[93].mxu1 }
 0x1a2   : > { %v1865_v59 = vpop.f32.mrb[94].mxu1 }
 0x1a3   : > { %v1872_v60 = vadd.f32 %v1857_v27, %v1759_v40  ;;  %v6241_v61 = vpop.f32.mrb[95].mxu1 }
 0x1a6   : > { %v1749_v20 = vpop.f32.mrb[92].mxu0 }
 0x1a7   : > { %v1760_v21 = vadd.f32 %v1749_v20, %v1676_v31  ;;  %v6226_v62 = vpop.f32.mrb[93].mxu0 }
 0x1a8   : > { %v1752_v50 = vpop.f32.mrb[94].mxu0  ;;  %v2058_v29 = vpop.f32.mrb[96].mxu1 }
 0x1a9   : > { %v1761_v33 = vadd.f32 %v1752_v50, %v1677_v36  ;;  %v1873_v6 = vadd.f32 %v1862_v12, %v1760_v21  ;;  %v6227_v13 = vpop.f32.mrb[95].mxu0  ;;  %v6260_v56 = vpop.f32.mrb[97].mxu1 }
 0x1aa   : > { %v2061_v3 = vpop.f32.mrb[98].mxu1 }
 0x1ab   : > { %v1874_v22 = vadd.f32 %v1865_v59, %v1761_v33  ;;  %v6261_v4 = vpop.f32.mrb[99].mxu1 }
 0x1ae   : > { %v1966_v52 = vpop.f32.mrb[96].mxu0 }
 0x1af   : > { %v1989_v7 = vadd.f32 %v1966_v52, %v1869_v38  ;;  %v6246_v48 = vpop.f32.mrb[97].mxu0 }
 0x1b0   : > { %v1969_v8 = vpop.f32.mrb[98].mxu0  ;;  %v2066_v15 = vpop.f32.mrb[100].mxu1 }
 0x1b1   : > { %v1990_v53 = vadd.f32 %v1969_v8, %v1870_v45  ;;  %v2081_v2 = vadd.f32 %v2058_v29, %v1989_v7  ;;  %v6247_v10 = vpop.f32.mrb[99].mxu0  ;;  %v6264_v18 = vpop.f32.mrb[101].mxu1  ;;  %v6802_v45 = vld [vmem:[%s8327_s4 + $0x8] sm:$0xff]  }
 0x1b2   : > { %v2069_v43 = vpop.f32.mrb[102].mxu1  ;;  %6369 = vmatpush3.bf16.msra.mxu1 %v6802_v45 }
 0x1b3   : > { %v2082_v44 = vadd.f32 %v2061_v3, %v1990_v53  ;;  %v6265_v26 = vpop.f32.mrb[103].mxu1  ;;  %6396 = vmatprep.subr.bf16.mxu1 %v6847_v1 }
 0x1b6   : > { %v1974_v63 = vpop.f32.mrb[100].mxu0 }
 0x1b7   : > { %v1991_v0 = vadd.f32 %v1974_v63, %v1871_v57  ;;  %v6250_v23 = vpop.f32.mrb[101].mxu0 }
 0x1b8   : > { %v1977_v19 = vpop.f32.mrb[102].mxu0  ;;  %v2074_v28 = vpop.f32.mrb[104].mxu1 }
 0x1b9   : > { %v1992_v17 = vadd.f32 %v1977_v19, %v1872_v60  ;;  %v2083_v32 = vadd.f32 %v2066_v15, %v1991_v0  ;;  %v6251_v31 = vpop.f32.mrb[103].mxu0  ;;  %v6268_v25 = vpop.f32.mrb[105].mxu1 }
 0x1ba   : > { %v2077_v34 = vpop.f32.mrb[106].mxu1 }
 0x1bb   : > { %v2084_v35 = vadd.f32 %v2069_v43, %v1992_v17  ;;  %v6269_v36 = vpop.f32.mrb[107].mxu1 }
 0x1be   : > { %v1982_v41 = vpop.f32.mrb[104].mxu0 }
 0x1bf   : > { %v1993_v37 = vadd.f32 %v1982_v41, %v1873_v6  ;;  %v6254_v9 = vpop.f32.mrb[105].mxu0 }
 0x1c0   : > { %v1985_v39 = vpop.f32.mrb[106].mxu0  ;;  %v2260_v49 = vpop.f32.mrb[108].mxu1 }
 0x1c1   : > { %v1994_v16 = vadd.f32 %v1985_v39, %v1874_v22  ;;  %v2085_v42 = vadd.f32 %v2074_v28, %v1993_v37  ;;  %v6255_v46 = vpop.f32.mrb[107].mxu0  ;;  %v6288_v38 = vpop.f32.mrb[109].mxu1 }
 0x1c2   : > { %v2263_v14 = vpop.f32.mrb[110].mxu1 }
 0x1c3   : > { %v2086_v54 = vadd.f32 %v2077_v34, %v1994_v16  ;;  %v6289_v27 = vpop.f32.mrb[111].mxu1 }
 0x1c6   : > { %v2168_v5 = vpop.f32.mrb[108].mxu0 }
 0x1c7   : > { %v2191_v24 = vadd.f32 %v2168_v5, %v2081_v2  ;;  %v6274_v11 = vpop.f32.mrb[109].mxu0 }
 0x1c8   : > { %v2171_v55 = vpop.f32.mrb[110].mxu0  ;;  %v2268_v47 = vpop.f32.mrb[112].mxu1 }
 0x1c9   : > { %v2192_v12 = vadd.f32 %v2171_v55, %v2082_v44  ;;  %v2283_v40 = vadd.f32 %v2260_v49, %v2191_v24  ;;  %v6275_v57 = vpop.f32.mrb[111].mxu0  ;;  %v6292_v58 = vpop.f32.mrb[113].mxu1 }
 0x1ca   : > { %v2271_v51 = vpop.f32.mrb[114].mxu1 }
 0x1cb   : > { %v2284_v59 = vadd.f32 %v2263_v14, %v2192_v12  ;;  %v6293_v60 = vpop.f32.mrb[115].mxu1 }
 0x1ce   : > { %v2176_v61 = vpop.f32.mrb[112].mxu0 }
 0x1cf   : > { %v2193_v20 = vadd.f32 %v2176_v61, %v2083_v32  ;;  %v6278_v21 = vpop.f32.mrb[113].mxu0 }
 0x1d0   : > { %v2179_v62 = vpop.f32.mrb[114].mxu0  ;;  %v2276_v50 = vpop.f32.mrb[116].mxu1 }
 0x1d1   : > { %v2194_v29 = vadd.f32 %v2179_v62, %v2084_v35  ;;  %v2285_v33 = vadd.f32 %v2268_v47, %v2193_v20  ;;  %v6279_v6 = vpop.f32.mrb[115].mxu0  ;;  %v6296_v13 = vpop.f32.mrb[117].mxu1 }
 0x1d2   : > { %v2279_v56 = vpop.f32.mrb[118].mxu1 }
 0x1d3   : > { %v2286_v3 = vadd.f32 %v2271_v51, %v2194_v29  ;;  %v6297_v22 = vpop.f32.mrb[119].mxu1 }
 0x1d6   : > { %v2184_v4 = vpop.f32.mrb[116].mxu0 }
 0x1d7   : > { %v2195_v52 = vadd.f32 %v2184_v4, %v2085_v42  ;;  %v6282_v7 = vpop.f32.mrb[117].mxu0 }
 0x1d8   : > { %v2187_v48 = vpop.f32.mrb[118].mxu0  ;;  %v2481_v8 = vpop.f32.mrb[120].mxu1 }
 0x1d9   : > { %v2196_v15 = vadd.f32 %v2187_v48, %v2086_v54  ;;  %v2287_v53 = vadd.f32 %v2276_v50, %v2195_v52  ;;  %v6283_v2 = vpop.f32.mrb[119].mxu0  ;;  %v6316_v10 = vpop.f32.mrb[121].mxu1 }
 0x1da   : > { %v2484_v18 = vpop.f32.mrb[122].mxu1 }
 0x1db   : > { %v2288_v43 = vadd.f32 %v2279_v56, %v2196_v15  ;;  %v6317_v44 = vpop.f32.mrb[123].mxu1 }
 0x1de   : > { %v2347_v26 = vpop.f32.mrb[120].mxu0 }
 0x1df   : > { %v2370_v63 = vadd.f32 %v2347_v26, %v2283_v40  ;;  %v6302_v0 = vpop.f32.mrb[121].mxu0 }
 0x1e0   : > { %v2350_v23 = vpop.f32.mrb[122].mxu0  ;;  %v2489_v19 = vpop.f32.mrb[124].mxu1 }
 0x1e1   : > { %v2371_v28 = vadd.f32 %v2350_v23, %v2284_v59  ;;  %v2504_v30 = vadd.f32 %v2481_v8, %v2370_v63  ;;  %v6303_v17 = vpop.f32.mrb[123].mxu0  ;;  %v6320_v32 = vpop.f32.mrb[125].mxu1 }
 0x1e2   : > { %v2492_v31 = vpop.f32.mrb[126].mxu1 }
 0x1e3   : > { %v2505_v25 = vadd.f32 %v2484_v18, %v2371_v28  ;;  %v6321_v34 = vpop.f32.mrb[127].mxu1 }
 0x1e6   : > { %v2355_v35 = vpop.f32.mrb[124].mxu0 }
 0x1e7   : > { %v2372_v36 = vadd.f32 %v2355_v35, %v2285_v33  ;;  %v6306_v41 = vpop.f32.mrb[125].mxu0 }
 0x1e8   : > { %v2358_v37 = vpop.f32.mrb[126].mxu0  ;;  %v2497_v9 = vpop.f32.mrb[128].mxu1 }
 0x1e9   : > { %v2373_v39 = vadd.f32 %v2358_v37, %v2286_v3  ;;  %v2506_v49 = vadd.f32 %v2489_v19, %v2372_v36  ;;  %v6307_v16 = vpop.f32.mrb[127].mxu0  ;;  %v6324_v42 = vpop.f32.mrb[129].mxu1 }
 0x1ea   : > { %v2500_v46 = vpop.f32.mrb[130].mxu1 }
 0x1eb   : > { %v2507_v38 = vadd.f32 %v2492_v31, %v2373_v39  ;;  %v6325_v14 = vpop.f32.mrb[131].mxu1 }
 0x1ee   : > { %v2363_v54 = vpop.f32.mrb[128].mxu0 }
 0x1ef   : > { %v2374_v27 = vadd.f32 %v2363_v54, %v2287_v53  ;;  %v6310_v45 = vpop.f32.mrb[129].mxu0 }
 0x1f0   : > { %v2366_v5 = vpop.f32.mrb[130].mxu0  ;;  %v2683_v24 = vpop.f32.mrb[132].mxu1 }
 0x1f1   : > { %v2375_v11 = vadd.f32 %v2366_v5, %v2288_v43  ;;  %v2508_v55 = vadd.f32 %v2497_v9, %v2374_v27  ;;  %v6311_v47 = vpop.f32.mrb[131].mxu0  ;;  %v6344_v12 = vpop.f32.mrb[133].mxu1 }
 0x1f2   : > { %v2686_v40 = vpop.f32.mrb[134].mxu1 }
 0x1f3   : > { %v2509_v57 = vadd.f32 %v2500_v46, %v2375_v11  ;;  %v6345_v58 = vpop.f32.mrb[135].mxu1 }
 0x1f6   : > { %v2573_v51 = vpop.f32.mrb[132].mxu0 }
 0x1f7   : > { %v2596_v59 = vadd.f32 %v2573_v51, %v2504_v30  ;;  %v6330_v60 = vpop.f32.mrb[133].mxu0  ;;  %v5654_v30 = vld [vmem:[%s8326_s3] ss:$0 sm:$0xff] }
 0x1f8   : > { %v2576_v61 = vpop.f32.mrb[134].mxu0  ;;  %v2691_v20 = vpop.f32.mrb[136].mxu1 }
 0x1f9   : > { %v2597_v21 = vadd.f32 %v2576_v61, %v2505_v25  ;;  %v2706_v62 = vadd.f32 %v2683_v24, %v2596_v59  ;;  %v6331_v50 = vpop.f32.mrb[135].mxu0  ;;  %v6348_v29 = vpop.f32.mrb[137].mxu1 }
 0x1fa   : > { %v2694_v33 = vpop.f32.mrb[138].mxu1 }
 0x1fb   : > { %v2707_v6 = vadd.f32 %v2686_v40, %v2597_v21  ;;  %v6349_v13 = vpop.f32.mrb[139].mxu1 }
 0x1fe   : > { %v2581_v56 = vpop.f32.mrb[136].mxu0 }
 0x1ff   : > { %v2598_v3 = vadd.f32 %v2581_v56, %v2506_v49  ;;  %v6334_v22 = vpop.f32.mrb[137].mxu0 }
 0x200   : > { %v2584_v4 = vpop.f32.mrb[138].mxu0  ;;  %v2699_v52 = vpop.f32.mrb[140].mxu1 }
 0x201   : > { %v2599_v7 = vadd.f32 %v2584_v4, %v2507_v38  ;;  %v2708_v48 = vadd.f32 %v2691_v20, %v2598_v3  ;;  %v6335_v8 = vpop.f32.mrb[139].mxu0  ;;  %v6352_v15 = vpop.f32.mrb[141].mxu1 }
 0x202   : > { %v2702_v53 = vpop.f32.mrb[142].mxu1 }
 0x203   : > { %v2709_v2 = vadd.f32 %v2694_v33, %v2599_v7  ;;  %v6353_v10 = vpop.f32.mrb[143].mxu1 }
 0x206   : > { %v2589_v18 = vpop.f32.mrb[140].mxu0 }
 0x207   : > { %v2600_v43 = vadd.f32 %v2589_v18, %v2508_v55  ;;  %v6338_v44 = vpop.f32.mrb[141].mxu0 }
 0x208   : > { %v2592_v26 = vpop.f32.mrb[142].mxu0 }
 0x209   : > { %v2601_v63 = vadd.f32 %v2592_v26, %v2509_v57  ;;  %v2710_v0 = vadd.f32 %v2699_v52, %v2600_v43  ;;  %v6339_v23 = vpop.f32.mrb[143].mxu0  ;;  %v2880_v52 = vpop.permute.xlu0 %2879 }
 0x20b   : > { %v2711_v19 = vadd.f32 %v2702_v53, %v2601_v63 }
 0x20d   : > { %v2885_v23 = vpop.permute.xlu0 %2884 }
 0x20e   : > { %v2775_v28 = vpop.f32.mrb[144].mxu0 }
 0x20f   : > { %v2798_v17 = vadd.f32 %v2775_v28, %v2706_v62  ;;  %v6358_v32 = vpop.f32.mrb[145].mxu0 }
 0x210   : > { %v2778_v31 = vpop.f32.mrb[146].mxu0 }
 0x211   : > { %v2811_v25 = vadd.f32 %v5654_v30, %v2798_v17  ;;  %v2799_v34 = vadd.f32 %v2778_v31, %v2707_v6  ;;  %v6359_v35 = vpop.f32.mrb[147].mxu0  ;;  %v2890_v31 = vpop.permute.xlu1 %2889 }
 0x213   : > { %v2812_v36 = vadd.f32 %v5654_v30, %v2799_v34  ;;  %v2823_v41 = vmul.f32 0.044715, %v2811_v25 }
 0x215   : > { %v2829_v37 = vmul.f32 %v2823_v41, %v2811_v25  ;;  %v2824_v9 = vmul.f32 0.044715, %v2812_v36  ;;  %v2818_v26 = vmul.f32 0.5, %v2812_v36 }
 0x216   : > { %v2783_v39 = vpop.f32.mrb[148].mxu0 }
 0x217   : > { %v2800_v49 = vadd.f32 %v2783_v39, %v2708_v48  ;;  %v6362_v16 = vpop.f32.mrb[149].mxu0  ;;  %v2835_v42 = vmul.f32 %v2829_v37, %v2811_v25  ;;  %v2830_v46 = vmul.f32 %v2824_v9, %v2812_v36 }
 0x218   : > { %v2786_v38 = vpop.f32.mrb[150].mxu0 }
 0x219   : > { %v2813_v14 = vadd.f32 %v5654_v30, %v2800_v49  ;;  %v2801_v54 = vadd.f32 %v2786_v38, %v2709_v2  ;;  %v6363_v27 = vpop.f32.mrb[151].mxu0  ;;  %v2841_v45 = vadd.f32 %v2835_v42, %v2811_v25  ;;  %v2836_v5 = vmul.f32 %v2830_v46, %v2812_v36  ;;  %v2895_v42 = vpop.permute.xlu1 %2894 }
 0x21a   : > { %v2817_v2 = vmul.f32 0.5, %v2811_v25 }
 0x21b   : > { %v2814_v24 = vadd.f32 %v5654_v30, %v2801_v54  ;;  %v2847_v11 = vmul.f32 0.7978846, %v2841_v45  ;;  %v2825_v55 = vmul.f32 0.044715, %v2813_v14  ;;  %v2842_v47 = vadd.f32 %v2836_v5, %v2812_v36 }
 0x21c   : > { %v2819_v35 = vmul.f32 0.5, %v2813_v14 }
 0x21d   : > { %6827 = vtanh.f32 %v2847_v11  ;;  %v2831_v12 = vmul.f32 %v2825_v55, %v2813_v14  ;;  %v2826_v40 = vmul.f32 0.044715, %v2814_v24  ;;  %v2848_v58 = vmul.f32 0.7978846, %v2842_v47 }
 0x21e   : > { %v2791_v57 = vpop.f32.mrb[152].mxu0  ;;  %v2820_v39 = vmul.f32 0.5, %v2814_v24 }
 0x21f   : > { %v2802_v51 = vadd.f32 %v2791_v57, %v2710_v0  ;;  %v6366_v59 = vpop.f32.mrb[153].mxu0  ;;  %v2837_v60 = vmul.f32 %v2831_v12, %v2813_v14  ;;  %v2832_v61 = vmul.f32 %v2826_v40, %v2814_v24  ;;  %6829 = vtanh.f32 %v2848_v58 }
 0x220   : > { %v2794_v20 = vpop.f32.mrb[154].mxu0  ;;  %v2905_v59 = vpop.permute.xlu1 %2904 }
 0x221   : > { %v2815_v21 = vadd.f32 %v5654_v30, %v2802_v51  ;;  %v2803_v62 = vadd.f32 %v2794_v20, %v2711_v19  ;;  %v6367_v50 = vpop.f32.mrb[155].mxu0  ;;  %v2843_v29 = vadd.f32 %v2837_v60, %v2813_v14  ;;  %v2838_v33 = vmul.f32 %v2832_v61, %v2814_v24  ;;  %v2900_v51 = vpop.permute.xlu0 %2899 }
 0x223   : > { %v2816_v6 = vadd.f32 %v5654_v30, %v2803_v62  ;;  %v2849_v13 = vmul.f32 0.7978846, %v2843_v29  ;;  %v2844_v56 = vadd.f32 %v2838_v33, %v2814_v24  ;;  %v2827_v3 = vmul.f32 0.044715, %v2815_v21  ;;  %v6805_v24 = vld [vmem:[%s8327_s4 + $0x18] sm:$0xff]  }
 0x224   : > { %v2821_v5 = vmul.f32 0.5, %v2815_v21 }
 0x225   : > { %6831 = vtanh.f32 %v2849_v13  ;;  %v2850_v22 = vmul.f32 0.7978846, %v2844_v56  ;;  %v2828_v4 = vmul.f32 0.044715, %v2816_v6  ;;  %v2833_v7 = vmul.f32 %v2827_v3, %v2815_v21 }
 0x226   : > { %v2822_v14 = vmul.f32 0.5, %v2816_v6 }
 0x227   : > { %v6828_v48 = vpop.eup %6827  ;;  %6833 = vtanh.f32 %v2850_v22  ;;  %v2834_v8 = vmul.f32 %v2828_v4, %v2816_v6  ;;  %v2839_v53 = vmul.f32 %v2833_v7, %v2815_v21  ;;  %v6804_v22 = vld [vmem:[%s8327_s4 + $0x10] sm:$0xff]  }
 0x228   : > { %v2859_v15 = vadd.f32 1.0, %v6828_v48 }
 0x229   : > { %v2840_v10 = vmul.f32 %v2834_v8, %v2816_v6  ;;  %v6830_v18 = vpop.eup %6829  ;;  %v2845_v43 = vadd.f32 %v2839_v53, %v2815_v21 }
 0x22a   : > { %v2865_v44 = vmul.f32 %v2859_v15, %v2817_v2  ;;  %v2860_v63 = vadd.f32 1.0, %v6830_v18 }
 0x22b   : > { %v2846_v0 = vadd.f32 %v2840_v10, %v2816_v6  ;;  %v2851_v19 = vmul.f32 0.7978846, %v2845_v43 }
 0x22c   : > { %v2866_v28 = vmul.f32 %v2860_v63, %v2818_v26  ;;  %v2907_v32 = vmul.f32 %v2880_v52, %v2865_v44 }
 0x22d   : > { %v2852_v30 = vmul.f32 0.7978846, %v2846_v0  ;;  %6835 = vtanh.f32 %v2851_v19 }
 0x22e   : > { %v2908_v34 = vmul.f32 %v2885_v23, %v2866_v28 }
 0x22f   : > { %v6832_v17 = vpop.eup %6831  ;;  %6837 = vtanh.f32 %v2852_v30  ;;  %v6807_v30 = vld [vmem:[%s8327_s4 + $0x28] sm:$0xff]  }
 0x230   : > { %v2861_v41 = vadd.f32 1.0, %v6832_v17  ;;  %v2918_v37 = vpack.c.bf16 %v2908_v34, %v2907_v32 }
 0x231   : > { %v6834_v25 = vpop.eup %6833 }
 0x232   : > { %v2867_v9 = vmul.f32 %v2861_v41, %v2819_v35  ;;  %v2862_v49 = vadd.f32 1.0, %v6834_v25  ;;  %v2924_v36 = vrot.slane %v2918_v37, 1 }
 0x234   : > { %v2868_v16 = vmul.f32 %v2862_v49, %v2820_v39  ;;  %2933 = vst.msk [vmem:[#allocation2] sm:$0x80] %vm2915_vm9, %v2924_v36  ;;  %v2909_v46 = vmul.f32 %v2890_v31, %v2867_v9  ;;  %vm5161_vm9 = vsmask.f32 2304 }
 0x236   : > { %v2910_v38 = vmul.f32 %v2895_v42, %v2868_v16 }
 0x237   : > { %v6836_v54 = vpop.eup %6835 }
 0x238   : > { %v2919_v27 = vpack.c.bf16 %v2910_v38, %v2909_v46  ;;  %v2863_v11 = vadd.f32 1.0, %v6836_v54 }
 0x239   : > { %v6838_v45 = vpop.eup %6837 }
 0x23a   : > { %v2925_v55 = vrot.slane %v2919_v27, 1  ;;  %v2864_v47 = vadd.f32 1.0, %v6838_v45  ;;  %v2869_v12 = vmul.f32 %v2863_v11, %v2821_v5 }
 0x23b   : > { %v2937_v58 = vld [vmem:[#allocation2] sm:$0xff] }
 0x23c   : > { %v2926_v40 = vsel %vm461_vm5, %v2924_v36, %v2925_v55  ;;  %v2870_v57 = vmul.f32 %v2864_v47, %v2822_v14  ;;  %6385 = vmatmul.mubr.msk.bf16.vlgmr.msra.gmra.mrb[156].mxu0 %vm318_vm1, %v2937_v58  ;;  %v2911_v60 = vmul.f32 %v2900_v51, %v2869_v12  ;;  %v2949_v20 = vshll.u32 %v2937_v58, 16  ;;  %v7668_v4 = vld [vmem:[#allocation2] sm:$0xfe] }
 0x23d   : > { %2934 = vst.msk [vmem:[#allocation2 + $0x8] sm:$0xff] %vm318_vm1, %v2926_v40  ;;  %6388 = vmatprep.mubr.msk.bf16.mxu0 %vm6848_vm0, %v6847_v1  ;;  %6411 = vmatpush3.bf16.msra.mxu0 %v6805_v24  ;;  %v2947_v6 = vshrl.u32 %v2937_v58, 16  ;;  %v3213_v48 = vshrl.u32 %v7668_v4, 16  ;;  %v3216_v8 = vshll.u32 %v7668_v4, 16 }
 0x23e   : > { %v2912_v61 = vmul.f32 %v2905_v59, %v2870_v57  ;;  %6438 = vmatprep.subr.bf16.mxu0 %v6847_v1  ;;  %v2951_v50 = vrot.slane %v2949_v20, 1 }
 0x23f   : > { %v3215_v18 = vrot.slane %v3213_v48, 1  ;;  %v3218_v43 = vrot.slane %v3216_v8, 2  ;;  %v7783_v48 = vld [vmem:[#allocation2 + $0x20] sm:$0x1f] }
 0x240   : > { %v2920_v21 = vpack.c.bf16 %v2912_v61, %v2911_v60  ;;  %v2952_v56 = vor.u32 %v2951_v50, %v2947_v6  ;;  %v6806_v50 = vld [vmem:[%s8327_s4 + $0x20] sm:$0xff]  }
 0x241   : > { %v3219_v28 = vor.u32 %v3218_v43, %v3215_v18  ;;  %v4983_v18 = vshll.u32 %v7783_v48, 16  ;;  %v7803_v43 = vld [vmem:[#allocation2] sm:$0xf8] }
 0x242   : > { %v2927_v62 = vrot.slane %v2920_v21, 1 }
 0x244   : > { %v2928_v29 = vsel %vm461_vm5, %v2925_v55, %v2927_v62  ;;  %2936 = vst.msk [vmem:[#allocation2 + $0x18] sm:$0x7f] %vm2913_vm10, %v2927_v62  ;;  %v7654_v33 = vld [vmem:[#allocation2 + $0x8] sm:$0xff]  ;;  %v3123_v62 = vrot.slane %v7668_v4, 1 }
 0x245   : > { %2935 = vst.msk [vmem:[#allocation2 + $0x10] sm:$0xff] %vm318_vm1, %v2928_v29  ;;  %6389 = vmatmul.mubr.msk.bf16.gmra.mrb[160].mxu0 %vm318_vm1, %v7654_v33  ;;  %v7660_v13 = vshll.u32 %v7654_v33, 16  ;;  %v7671_v52 = vshrl.u32 %v7654_v33, 16  ;;  %v3124_v20 = vrot.slane %v7654_v33, 1 }
 0x246   : > { %6392 = vmatprep.mubr.msk.bf16.mxu0 %vm6848_vm0, %v6847_v1 }
 0x247   : > { %v2956_v3 = vrot.slane %v7660_v13, 1  ;;  %v3220_v53 = vrot.slane %v7671_v52, 1  ;;  %v3221_v2 = vrot.slane %v7660_v13, 2  ;;  %v3710_v17 = vrot.slane %v7671_v52, 4 }
 0x248   : > { %v3711_v32 = vrot.slane %v7660_v13, 5  ;;  %v3510_v34 = vrot.slane %v7671_v52, 3  ;;  %v3511_v35 = vrot.slane %v7660_v13, 4  ;;  %v4003_v24 = vrot.slane %v7671_v52, 6 }
 0x249   : > { %v2957_v7 = vsel %vm283_vm2, %v2952_v56, %v2956_v3  ;;  %v2960_v44 = vor.u32 %v7671_v52, %v2956_v3  ;;  %v3222_v63 = vor.u32 %v3221_v2, %v3220_v53  ;;  %v4004_v12 = vrot.slane %v7660_v13, 7 }
 0x24a   : > { %6371 = vmatmul.mubr.msk.bf16.vlgmr.msra.gmra.mrb[144].mxu1 %vm318_vm1, %v2957_v7  ;;  %v7721_v16 = vor.u32 %v3711_v32, %v3710_v17  ;;  %v7726_v54 = vor.u32 %v3511_v35, %v3510_v34  ;;  %v4199_v6 = vrot.slane %v7671_v52, 7  ;;  %v4980_v53 = vshrl.u32 %v7783_v48, 16  ;;  %v4867_v35 = vld [vmem:[#allocation2 + $0x8] sm:$0xf0] }
 0x24b   : > { %6397 = vmatpush3.bf16.msra.mxu1 %v6804_v22  ;;  %6374 = vmatprep.mubr.msk.bf16.mxu1 %vm6848_vm0, %v6847_v1  ;;  %v7693_v0 = vld [vmem:[#allocation2 + $0x18] sm:$0x1]  ;;  %v3223_v41 = vsel %vm554_vm3, %v3219_v28, %v3222_v63  ;;  %v7752_v57 = vor.u32 %v4004_v12, %v4003_v24  ;;  %v3125_v22 = vsel %vm461_vm5, %v3123_v62, %v3124_v20  ;;  %v3413_v28 = vrot.slane %v7803_v43, 3 }
 0x24c   : > { %v7679_v15 = vld [vmem:[#allocation2 + $0x10] sm:$0xff]  ;;  %6424 = vmatprep.subr.bf16.mxu1 %v6847_v1  ;;  %v2970_v31 = vshll.u32 %v7693_v0, 16  ;;  %v7716_v49 = vld [vmem:[#allocation2 + $0x18] sm:$0x3]  ;;  %v7777_v7 = vor.u32 %v4199_v6, %v7660_v13  ;;  %v3322_v62 = vrot.slane %v7654_v33, 2 }
 0x24d   : > { %6393 = vmatmul.mubr.msk.bf16.gmra.mrb[164].mxu0 %vm318_vm1, %v7679_v15  ;;  %v7687_v10 = vshll.u32 %v7679_v15, 16  ;;  %v7696_v23 = vshrl.u32 %v7679_v15, 16  ;;  %v3229_v5 = vshrl.u32 %v7716_v49, 16  ;;  %v3232_v11 = vshll.u32 %v7716_v49, 16  ;;  %v7800_v2 = vld [vmem:[#allocation2 + $0x18] sm:$0xff] }
 0x24e   : > { %6412 = vmatprep.mubr.msk.bf16.mxu0 %vm6848_vm0, %v6847_v1  ;;  %v2972_v38 = vrot.slane %v2970_v31, 1  ;;  %v7795_v8 = vrot.slane %v7679_v15, 1  ;;  %v7817_v17 = vshll.u32 %v7800_v2, 16  ;;  %v4985_v31 = vrot.slane %v4983_v18, 5  ;;  %v5265_v18 = vld [vmem:[#allocation2 + $0x8] sm:$0xc0] }
 0x24f   : > { %v2964_v26 = vrot.slane %v7687_v10, 1  ;;  %v3224_v25 = vrot.slane %v7696_v23, 1  ;;  %v3225_v37 = vrot.slane %v7687_v10, 2  ;;  %v3514_v9 = vrot.slane %v7696_v23, 3 }
 0x250   : > { %v3515_v36 = vrot.slane %v7687_v10, 4  ;;  %v3714_v42 = vrot.slane %v7696_v23, 4  ;;  %v3715_v46 = vrot.slane %v7687_v10, 5  ;;  %v4007_v58 = vrot.slane %v7696_v23, 6 }
 0x251   : > { %v2965_v19 = vsel %vm283_vm2, %v2960_v44, %v2964_v26  ;;  %v2968_v39 = vor.u32 %v7696_v23, %v2964_v26  ;;  %v7730_v45 = vor.u32 %v3225_v37, %v3224_v25  ;;  %v4008_v51 = vrot.slane %v7687_v10, 7 }
 0x252   : > { %6375 = vmatmul.mubr.msk.bf16.gmra.mrb[148].mxu1 %vm318_vm1, %v2965_v19  ;;  %v7728_v27 = vor.u32 %v3515_v36, %v3514_v9  ;;  %v7734_v55 = vor.u32 %v3715_v46, %v3714_v42  ;;  %v3231_v60 = vrot.slane %v3229_v5, 1  ;;  %v3234_v61 = vrot.slane %v3232_v11, 2 }
 0x253   : > { %6378 = vmatprep.mubr.msk.bf16.mxu1 %vm6848_vm0, %v6847_v1  ;;  %v2973_v14 = vsel %vm283_vm2, %v2968_v39, %v2972_v38  ;;  %v3227_v59 = vsel %vm554_vm3, %v3222_v63, %v7730_v45  ;;  %v7760_v21 = vor.u32 %v4008_v51, %v4007_v58  ;;  %v4202_v3 = vrot.slane %v7696_v23, 7 }
 0x254   : > { %v7740_v47 = vsel %vm855_vm4, %v7726_v54, %v7728_v27  ;;  %v7748_v40 = vsel %vm3701_vm11, %v7721_v16, %v7734_v55  ;;  %v3235_v56 = vor.u32 %v3234_v61, %v3231_v60  ;;  %v3414_v44 = vrot.slane %v7654_v33, 3 }
 0x255   : > { %6413 = vmatmul.mubr.msk.bf16.vlgmr.msra.gmra.mrb[168].mxu0 %vm318_vm1, %v3223_v41  ;;  %v7771_v29 = vsel %vm3994_vm12, %v7752_v57, %v7760_v21  ;;  %v4203_v4 = vor.u32 %v4202_v3, %v7687_v10  ;;  %v3127_v26 = vsel %vm461_vm5, %v3124_v20, %v7795_v8  ;;  %v7809_v63 = vshrl.u32 %v7800_v2, 16 }
 0x256   : > { %6416 = vmatprep.mubr.msk.bf16.mxu0 %vm6848_vm0, %v6847_v1  ;;  %6439 = vmatpush3.bf16.msra.mxu0 %v6807_v30  ;;  %v3236_v52 = vsel %vm554_vm3, %v7730_v45, %v3235_v56  ;;  %v4982_v19 = vrot.slane %v4980_v53, 4  ;;  %v6809_v30 = vld [vmem:[%s8327_s4 + $0x38] sm:$0xff]   ;;  %v4681_v32 = vrot.slane %v7696_v23, 2  ;;  %v4682_v34 = vrot.slane %v7687_v10, 3  ;;  %v7863_v56 = vld [vmem:[#allocation2 + $0x8] sm:$0xe0] }
 0x257   : > { %6466 = vmatprep.subr.bf16.mxu0 %v6847_v1  ;;  %v7791_v13 = vsel %vm4194_vm13, %v4199_v6, %v4203_v4  ;;  %v3415_v41 = vsel %vm762_vm6, %v3413_v28, %v3414_v44  ;;  %v3128_v25 = vrot.slane %v7693_v0, 1  ;;  %v7827_v37 = vrot.slane %v7679_v15, 4 }
 0x258   : > { %v7829_v9 = vor.u32 %v4682_v34, %v4681_v32  ;;  %v4685_v39 = vrot.slane %v7809_v63, 2  ;;  %v4686_v36 = vrot.slane %v7817_v17, 3  ;;  %v4964_v42 = vshrl.u32 %v4867_v35, 16 }
 0x259   : > { %v4967_v46 = vshll.u32 %v4867_v35, 16  ;;  %v4986_v38 = vor.u32 %v4985_v31, %v4982_v19  ;;  %v4975_v0 = vrot.slane %v7809_v63, 4  ;;  %v4976_v5 = vrot.slane %v7817_v17, 5  ;;  %v3315_v19 = vld [vmem:[#allocation2] sm:$0xfc] }
 0x25a   : > { %6379 = vmatmul.mubr.msk.bf16.gmra.mrb[152].mxu1 %vm318_vm1, %v2973_v14  ;;  %v4874_v11 = vrot.slane %v4867_v35, 4  ;;  %v4877_v14 = vrot.slane %v7800_v2, 4  ;;  %v7840_v24 = vrot.slane %v7679_v15, 3  ;;  %v7842_v12 = vor.u32 %v4686_v36, %v4685_v39  ;;  %v3407_v31 = vld [vmem:[#allocation2 + $0x18] sm:$0x7] }
 0x25b   : > { %6398 = vmatprep.mubr.msk.bf16.mxu1 %vm6848_vm0, %v6847_v1  ;;  %v4966_v58 = vrot.slane %v4964_v42, 4  ;;  %v4969_v51 = vrot.slane %v4967_v46, 5  ;;  %v4977_v60 = vor.u32 %v4976_v5, %v4975_v0  ;;  %vm3904_vm2 = vcmask 1041408   ;;  %v6808_v42 = vld [vmem:[%s8327_s4 + $0x30] sm:$0xff]  }
 0x25c   : > { %v7848_v61 = vsel %vm3611_vm14, %v4874_v11, %v7827_v37  ;;  %v7854_v20 = vsel %vm3611_vm14, %v7827_v37, %v4877_v14  ;;  %v5170_v53 = vrot.slane %v7696_v23, 5  ;;  %v7881_v28 = vrot.slane %v7679_v15, 6  ;;  %v6819_v23 = vld [vmem:[%s8327_s4 + $0x88] sm:$0xff]  }
 0x25d   : > { %6417 = vmatmul.mubr.msk.bf16.gmra.mrb[172].mxu0 %vm318_vm1, %v3227_v59  ;;  %v3129_v59 = vsel %vm461_vm5, %v7795_v8, %v3128_v25  ;;  %v4970_v6 = vor.u32 %v4969_v51, %v4966_v58  ;;  %v7872_v4 = vsel %vm3701_vm11, %v7734_v55, %v4977_v60  ;;  %v5171_v32 = vrot.slane %v7687_v10, 6 }
 0x25e   : > { %6420 = vmatprep.mubr.msk.bf16.mxu0 %vm6848_vm0, %v6847_v1  ;;  %v5174_v34 = vrot.slane %v7809_v63, 5  ;;  %v5175_v35 = vrot.slane %v7817_v17, 6  ;;  %v5271_v39 = vrot.slane %v5265_v18, 6  ;;  %v5274_v10 = vrot.slane %v7800_v2, 6 }
 0x25f   : > { %v7895_v25 = vor.u32 %v5171_v32, %v5170_v53  ;;  %v3321_v36 = vrot.slane %v3315_v19, 2  ;;  %v3418_v5 = vrot.slane %v3407_v31, 3  ;;  %v3605_v53 = vld [vmem:[#allocation2] sm:$0xf0]  ;;  %v3613_v18 = vrot.slane %v7654_v33, 4  ;;  %v6811_v32 = vld [vmem:[%s8327_s4 + $0x48] sm:$0xff]  }
 0x260   : > { %v7901_v46 = vor.u32 %v5175_v35, %v5174_v34  ;;  %v7915_v11 = vsel %vm3904_vm2, %v5271_v39, %v7881_v28  ;;  %v7921_v58 = vsel %vm3904_vm2, %v7881_v28, %v5274_v10  ;;  %v3612_v19 = vrot.slane %v3605_v53, 4 }
 0x261   : > { %v3323_v51 = vsel %vm665_vm7, %v3321_v36, %v3322_v62  ;;  %v3326_v34 = vrot.slane %v7716_v49, 2  ;;  %v3506_v35 = vshll.u32 %v7803_v43, 16  ;;  %v3616_v36 = vsel %vm3611_vm14, %v3613_v18, %v7827_v37 }
 0x262   : > { %6399 = vmatmul.mubr.msk.bf16.vlgmr.msra.gmra.mrb[156].mxu1 %vm318_vm1, %v3125_v22  ;;  %v7868_v22 = vrot.slane %v7679_v15, 5  ;;  %v3614_v31 = vsel %vm3611_vm14, %v3612_v19, %v3613_v18 }
 0x263   : > { %6425 = vmatpush3.bf16.msra.mxu1 %v6806_v50  ;;  %6402 = vmatprep.mubr.msk.bf16.mxu1 %vm6848_vm0, %v6847_v1  ;;  %v7861_v50 = vsel %vm1372_vm8, %v7829_v9, %v7842_v12  ;;  %v3508_v49 = vrot.slane %v3506_v35, 4 }
 0x264   : > { %6452 = vmatprep.subr.bf16.mxu1 %v6847_v1 }
 0x265   : > { %6421 = vmatmul.mubr.msk.bf16.gmra.mrb[176].mxu0 %vm318_vm1, %v3236_v52  ;;  %v7875_v52 = vsel %vm3701_vm11, %v4977_v60, %v4986_v38  ;;  %v3419_v60 = vsel %vm762_vm6, %v7840_v24, %v3418_v5  ;;  %v6810_v5 = vld [vmem:[%s8327_s4 + $0x40] sm:$0xff]  }
 0x266   : > { %6440 = vmatprep.mubr.msk.bf16.mxu0 %vm6848_vm0, %v6847_v1 }
 0x26a   : > { %6403 = vmatmul.mubr.msk.bf16.gmra.mrb[160].mxu1 %vm318_vm1, %v3127_v26  ;;  %v3417_v26 = vsel %vm762_vm6, %v3414_v44, %v7840_v24  ;;  %v5075_v44 = vrot.slane %v7800_v2, 5 }
 0x26b   : > { %6406 = vmatprep.mubr.msk.bf16.mxu1 %vm6848_vm0, %v6847_v1 }
 0x26c   : > { %v7911_v0 = vsel %vm3811_vm15, %v7868_v22, %v5075_v44 }
 0x26d   : > { %6441 = vmatmul.mubr.msk.bf16.vlgmr.msra.gmra.mrb[180].mxu0 %vm318_vm1, %v3415_v41  ;;  %v5072_v41 = vrot.slane %v7863_v56, 5 }
 0x26e   : > { %6444 = vmatprep.mubr.msk.bf16.mxu0 %vm6848_vm0, %v6847_v1  ;;  %6467 = vmatpush3.bf16.msra.mxu0 %v6809_v30  ;;  %v7885_v30 = vsel %vm3701_vm11, %v4970_v6, %v7734_v55  ;;  %v7937_v6 = vrot.slane %v7679_v15, 2 }
 0x26f   : > { %6494 = vmatprep.subr.bf16.mxu0 %v6847_v1  ;;  %v7905_v38 = vsel %vm3811_vm15, %v5072_v41, %v7868_v22 }
 0x270   : > { %v3327_v41 = vsel %vm665_vm7, %v7937_v6, %v3326_v34 }
 0x272   : > { %6407 = vmatmul.mubr.msk.bf16.gmra.mrb[164].mxu1 %vm318_vm1, %v3129_v59  ;;  %v7927_v59 = vsel %vm5161_vm9, %v7895_v25, %v7901_v46 }
 0x273   : > { %6426 = vmatprep.mubr.msk.bf16.mxu1 %vm6848_vm0, %v6847_v1 }
 0x275   : > { %6445 = vmatmul.mubr.msk.bf16.gmra.mrb[184].mxu0 %vm318_vm1, %v3417_v26  ;;  %v3325_v26 = vsel %vm665_vm7, %v3322_v62, %v7937_v6  ;;  %v3503_v62 = vshrl.u32 %v7803_v43, 16 }
 0x276   : > { %6448 = vmatprep.mubr.msk.bf16.mxu0 %vm6848_vm0, %v6847_v1 }
 0x277   : > { %v3505_v39 = vrot.slane %v3503_v62, 3 }
 0x279   : > { %v3509_v43 = vor.u32 %v3508_v49, %v3505_v39  ;;  %v3703_v39 = vshrl.u32 %v3605_v53, 16  ;;  %v3706_v49 = vshll.u32 %v3605_v53, 16 }
 0x27a   : > { %6427 = vmatmul.mubr.msk.bf16.vlgmr.msra.gmra.mrb[168].mxu1 %vm318_vm1, %v3323_v51 }
 0x27b   : > { %6453 = vmatpush3.bf16.msra.mxu1 %v6808_v42  ;;  %6430 = vmatprep.mubr.msk.bf16.mxu1 %vm6848_vm0, %v6847_v1  ;;  %v3498_v42 = vld [vmem:[#allocation2 + $0x18] sm:$0xf] }
 0x27c   : > { %6480 = vmatprep.subr.bf16.mxu1 %v6847_v1  ;;  %v3617_v51 = vrot.slane %v3498_v42, 4  ;;  %v3522_v19 = vshll.u32 %v3498_v42, 16 }
 0x27d   : > { %6449 = vmatmul.mubr.msk.bf16.gmra.mrb[188].mxu0 %vm318_vm1, %v3419_v60  ;;  %v3513_v60 = vsel %vm855_vm4, %v3509_v43, %v7726_v54  ;;  %v3813_v54 = vrot.slane %v7654_v33, 5 }
 0x27e   : > { %6468 = vmatprep.mubr.msk.bf16.mxu0 %vm6848_vm0, %v6847_v1  ;;  %v3618_v18 = vsel %vm3611_vm14, %v7827_v37, %v3617_v51  ;;  %v3524_v34 = vrot.slane %v3522_v19, 4  ;;  %v6813_v37 = vld [vmem:[%s8327_s4 + $0x58] sm:$0xff]   ;;  %v3897_v51 = vld [vmem:[#allocation2] sm:$0xc0] }
 0x27f   : > { %v3816_v43 = vsel %vm3811_vm15, %v3813_v54, %v7868_v22  ;;  %v3999_v19 = vshll.u32 %v3897_v51, 16 }
 0x282   : > { %6431 = vmatmul.mubr.msk.bf16.gmra.mrb[172].mxu1 %vm318_vm1, %v3325_v26  ;;  %v3519_v26 = vshrl.u32 %v3498_v42, 16  ;;  %v3708_v42 = vrot.slane %v3706_v49, 5  ;;  %v8029_v49 = vld [vmem:[#allocation2 + $0x18] sm:$0x7f] }
 0x283   : > { %6434 = vmatprep.mubr.msk.bf16.mxu1 %vm6848_vm0, %v6847_v1 }
 0x285   : > { %6469 = vmatmul.mubr.msk.bf16.vlgmr.msra.gmra.mrb[192].mxu0 %vm318_vm1, %v3614_v31  ;;  %v3521_v31 = vrot.slane %v3519_v26, 3  ;;  %v3996_v26 = vshrl.u32 %v3897_v51, 16 }
 0x286   : > { %6472 = vmatprep.mubr.msk.bf16.mxu0 %vm6848_vm0, %v6847_v1  ;;  %6495 = vmatpush3.bf16.msra.mxu0 %v6811_v32  ;;  %v3805_v32 = vld [vmem:[#allocation2] sm:$0xe0] }
 0x287   : > { %6522 = vmatprep.subr.bf16.mxu0 %v6847_v1  ;;  %v3812_v62 = vrot.slane %v3805_v32, 5 }
 0x289   : > { %v3814_v35 = vsel %vm3811_vm15, %v3812_v62, %v3813_v54 }
 0x28a   : > { %6435 = vmatmul.mubr.msk.bf16.gmra.mrb[176].mxu1 %vm318_vm1, %v3327_v41  ;;  %v3525_v41 = vor.u32 %v3524_v34, %v3521_v31  ;;  %v4001_v34 = vrot.slane %v3999_v19, 7  ;;  %v3898_v19 = vld [vmem:[#allocation2 + $0x18] sm:$0x3f] }
 0x28b   : > { %6454 = vmatprep.mubr.msk.bf16.mxu1 %vm6848_vm0, %v6847_v1 }
 0x28d   : > { %6473 = vmatmul.mubr.msk.bf16.gmra.mrb[196].mxu0 %vm318_vm1, %v3616_v36  ;;  %v3705_v36 = vrot.slane %v3703_v39, 4 }
 0x28e   : > { %6476 = vmatprep.mubr.msk.bf16.mxu0 %vm6848_vm0, %v6847_v1 }
 0x28f   : > { %v3709_v53 = vor.u32 %v3708_v42, %v3705_v36 }
 0x292   : > { %6455 = vmatmul.mubr.msk.bf16.vlgmr.msra.gmra.mrb[180].mxu1 %vm318_vm1, %v3513_v60 }
 0x293   : > { %6481 = vmatpush3.bf16.msra.mxu1 %v6810_v5  ;;  %6458 = vmatprep.mubr.msk.bf16.mxu1 %vm6848_vm0, %v6847_v1  ;;  %v3697_v5 = vld [vmem:[#allocation2 + $0x18] sm:$0x1f] }
 0x294   : > { %6508 = vmatprep.subr.bf16.mxu1 %v6847_v1  ;;  %v3817_v60 = vrot.slane %v3697_v5, 5  ;;  %v3719_v54 = vshrl.u32 %v3697_v5, 16  ;;  %v3722_v31 = vshll.u32 %v3697_v5, 16  ;;  %v3905_v5 = vrot.slane %v3897_v51, 6 }
 0x295   : > { %6477 = vmatmul.mubr.msk.bf16.gmra.mrb[200].mxu0 %vm318_vm1, %v3618_v18  ;;  %v3713_v18 = vsel %vm3701_vm11, %v3709_v53, %v7721_v16  ;;  %v3998_v16 = vrot.slane %v3996_v26, 6 }
 0x296   : > { %6496 = vmatprep.mubr.msk.bf16.mxu0 %vm6848_vm0, %v6847_v1  ;;  %v3818_v32 = vsel %vm3811_vm15, %v7868_v22, %v3817_v60  ;;  %v3721_v62 = vrot.slane %v3719_v54, 4  ;;  %v6815_v22 = vld [vmem:[%s8327_s4 + $0x68] sm:$0xff]   ;;  %v3910_v54 = vrot.slane %v3898_v19, 6 }
 0x29a   : > { %6459 = vmatmul.mubr.msk.bf16.gmra.mrb[184].mxu1 %vm318_vm1, %v7740_v47  ;;  %v3526_v47 = vsel %vm855_vm4, %v7728_v27, %v3525_v41  ;;  %v6812_v27 = vld [vmem:[%s8327_s4 + $0x50] sm:$0xff]   ;;  %vm4104_vm4 = vcmask 1040384  }
 0x29b   : > { %6462 = vmatprep.mubr.msk.bf16.mxu1 %vm6848_vm0, %v6847_v1 }
 0x29d   : > { %6497 = vmatmul.mubr.msk.bf16.vlgmr.msra.gmra.mrb[204].mxu0 %vm318_vm1, %v3814_v35  ;;  %v4002_v35 = vor.u32 %v4001_v34, %v3998_v16  ;;  %v4208_v16 = vrot.slane %v7809_v63, 7 }
 0x29e   : > { %6500 = vmatprep.mubr.msk.bf16.mxu0 %vm6848_vm0, %v6847_v1  ;;  %6523 = vmatpush3.bf16.msra.mxu0 %v6813_v37  ;;  %v3724_v37 = vrot.slane %v3722_v31, 5  ;;  %v3911_v31 = vsel %vm3904_vm2, %v7881_v28, %v3910_v54 }
 0x29f   : > { %6550 = vmatprep.subr.bf16.mxu0 %v6847_v1  ;;  %v4006_v41 = vsel %vm3994_vm12, %v4002_v35, %v7752_v57  ;;  %v4108_v35 = vrot.slane %v7679_v15, 7 }
 0x2a0   : > { %v3725_v39 = vor.u32 %v3724_v37, %v3721_v62  ;;  %v4211_v62 = vor.u32 %v7817_v17, %v4208_v16  ;;  %v4488_v16 = vrot.slane %v7817_v17, 2 }
 0x2a2   : > { %6463 = vmatmul.mubr.msk.bf16.gmra.mrb[188].mxu1 %vm318_vm1, %v3526_v47  ;;  %v4015_v47 = vshll.u32 %v8029_v49, 16  ;;  %v3726_v36 = vsel %vm3701_vm11, %v7734_v55, %v3725_v39  ;;  %v6814_v55 = vld [vmem:[%s8327_s4 + $0x60] sm:$0xff]  }
 0x2a3   : > { %6482 = vmatprep.mubr.msk.bf16.mxu1 %vm6848_vm0, %v6847_v1 }
 0x2a4   : > { %v4017_v42 = vrot.slane %v4015_v47, 7  ;;  %v4379_v47 = vrot.slane %v7800_v2, 1 }
 0x2a5   : > { %6501 = vmatmul.mubr.msk.bf16.gmra.mrb[208].mxu0 %vm318_vm1, %v3816_v43  ;;  %v3906_v43 = vrot.slane %v7654_v33, 6 }
 0x2a6   : > { %6504 = vmatprep.mubr.msk.bf16.mxu0 %vm6848_vm0, %v6847_v1 }
 0x2aa   : > { %6483 = vmatmul.mubr.msk.bf16.vlgmr.msra.gmra.mrb[192].mxu1 %vm318_vm1, %v3713_v18  ;;  %v3909_v18 = vsel %vm3904_vm2, %v3906_v43, %v7881_v28  ;;  %v6816_v28 = vld [vmem:[%s8327_s4 + $0x70] sm:$0xff]  }
 0x2ab   : > { %6509 = vmatpush3.bf16.msra.mxu1 %v6812_v27  ;;  %6486 = vmatprep.mubr.msk.bf16.mxu1 %vm6848_vm0, %v6847_v1  ;;  %v3907_v27 = vsel %vm3904_vm2, %v3905_v5, %v3906_v43  ;;  %v8136_v5 = vld [vmem:[#allocation2 + $0x8] sm:$0xfc] }
 0x2ac   : > { %6536 = vmatprep.subr.bf16.mxu1 %v6847_v1 }
 0x2ad   : > { %6505 = vmatmul.mubr.msk.bf16.gmra.mrb[212].mxu0 %vm318_vm1, %v3818_v32  ;;  %v6817_v32 = vld [vmem:[%s8327_s4 + $0x78] sm:$0xff]  }
 0x2ae   : > { %6524 = vmatprep.mubr.msk.bf16.mxu0 %vm6848_vm0, %v6847_v1 }
 0x2b2   : > { %6487 = vmatmul.mubr.msk.bf16.gmra.mrb[196].mxu1 %vm318_vm1, %v7748_v40  ;;  %v4012_v40 = vshrl.u32 %v8029_v49, 16 }
 0x2b3   : > { %6490 = vmatprep.mubr.msk.bf16.mxu1 %vm6848_vm0, %v6847_v1 }
 0x2b4   : > { %v4014_v57 = vrot.slane %v4012_v40, 6  ;;  %v4110_v40 = vrot.slane %v8029_v49, 7  ;;  %v4368_v49 = vld [vmem:[#allocation2 + $0x20] sm:$0x1] }
 0x2b5   : > { %6525 = vmatmul.mubr.msk.bf16.vlgmr.msra.gmra.mrb[216].mxu0 %vm318_vm1, %v4006_v41  ;;  %v4381_v43 = vrot.slane %v4368_v49, 1 }
 0x2b6   : > { %6528 = vmatprep.mubr.msk.bf16.mxu0 %vm6848_vm0, %v6847_v1  ;;  %6551 = vmatpush3.bf16.msra.mxu0 %v6815_v22  ;;  %v4018_v53 = vor.u32 %v4017_v42, %v4014_v57  ;;  %v4365_v22 = vld [vmem:[#allocation2 + $0x8] sm:$0xfe]  ;;  %v4380_v57 = vsel %vm461_vm5, %v7795_v8, %v4379_v47  ;;  %v6818_v42 = vld [vmem:[%s8327_s4 + $0x80] sm:$0xff]  }
 0x2b7   : > { %6578 = vmatprep.subr.bf16.mxu0 %v6847_v1  ;;  %v4376_v39 = vrot.slane %v4365_v22, 1 }
 0x2b8   : > { %v4019_v60 = vsel %vm3994_vm12, %v7760_v21, %v4018_v53 }
 0x2ba   : > { %6491 = vmatmul.mubr.msk.bf16.gmra.mrb[200].mxu1 %vm318_vm1, %v3726_v36  ;;  %v4111_v36 = vsel %vm4104_vm4, %v4108_v35, %v4110_v40  ;;  %v4674_v40 = vshrl.u32 %v8136_v5, 16 }
 0x2bb   : > { %6510 = vmatprep.mubr.msk.bf16.mxu1 %vm6848_vm0, %v6847_v1 }
 0x2bd   : > { %6529 = vmatmul.mubr.msk.bf16.gmra.mrb[220].mxu0 %vm318_vm1, %v7771_v29  ;;  %v4098_v29 = vld [vmem:[#allocation2] sm:$0x80] }
 0x2be   : > { %6532 = vmatprep.mubr.msk.bf16.mxu0 %vm6848_vm0, %v6847_v1  ;;  %v4196_v51 = vshrl.u32 %v4098_v29, 16  ;;  %v4105_v34 = vrot.slane %v4098_v29, 7  ;;  %v4587_v29 = vrot.slane %v7800_v2, 2 }
 0x2c0   : > { %v4198_v26 = vrot.slane %v4196_v51, 7 }
 0x2c2   : > { %6511 = vmatmul.mubr.msk.bf16.vlgmr.msra.gmra.mrb[204].mxu1 %vm318_vm1, %v3907_v27  ;;  %v4201_v21 = vsel %vm4194_vm13, %v4198_v26, %v7777_v7  ;;  %v4106_v7 = vrot.slane %v7654_v33, 7  ;;  %v4466_v27 = vshrl.u32 %v4365_v22, 16  ;;  %v4461_v26 = vld [vmem:[#allocation2 + $0x20] sm:$0x3] }
 0x2c3   : > { %6537 = vmatpush3.bf16.msra.mxu1 %v6814_v55  ;;  %6514 = vmatprep.mubr.msk.bf16.mxu1 %vm6848_vm0, %v6847_v1  ;;  %v6821_v55 = vld [vmem:[%s8327_s4 + $0x98] sm:$0xff]  }
 0x2c4   : > { %6564 = vmatprep.subr.bf16.mxu1 %v6847_v1  ;;  %v4107_v37 = vsel %vm4104_vm4, %v4105_v34, %v4106_v7  ;;  %v4109_v41 = vsel %vm4104_vm4, %v4106_v7, %v4108_v35  ;;  %v4492_v34 = vshrl.u32 %v4461_v26, 16 }
 0x2c5   : > { %6533 = vmatmul.mubr.msk.bf16.gmra.mrb[224].mxu0 %vm318_vm1, %v4019_v60  ;;  %v4468_v60 = vrot.slane %v4466_v27, 1  ;;  %v4669_v27 = vld [vmem:[#allocation2 + $0x20] sm:$0x7] }
 0x2c6   : > { %6552 = vmatprep.mubr.msk.bf16.mxu0 %vm6848_vm0, %v6847_v1 }
 0x2ca   : > { %6515 = vmatmul.mubr.msk.bf16.gmra.mrb[208].mxu1 %vm318_vm1, %v3909_v18  ;;  %v4588_v18 = vsel %vm665_vm7, %v7937_v6, %v4587_v29 }
 0x2cb   : > { %6518 = vmatprep.mubr.msk.bf16.mxu1 %vm6848_vm0, %v6847_v1 }
 0x2cd   : > { %6553 = vmatmul.mubr.msk.bf16.vlgmr.msra.gmra.mrb[228].mxu0 %vm318_vm1, %v4201_v21  ;;  %v4589_v21 = vrot.slane %v4461_v26, 2 }
 0x2ce   : > { %6556 = vmatprep.mubr.msk.bf16.mxu0 %vm6848_vm0, %v6847_v1  ;;  %6579 = vmatpush3.bf16.msra.mxu0 %v6817_v32  ;;  %v6820_v32 = vld [vmem:[%s8327_s4 + $0x90] sm:$0xff]  }
 0x2cf   : > { %6606 = vmatprep.subr.bf16.mxu0 %v6847_v1 }
 0x2d2   : > { %6519 = vmatmul.mubr.msk.bf16.gmra.mrb[212].mxu1 %vm318_vm1, %v3911_v31  ;;  %v4485_v31 = vrot.slane %v7809_v63, 1  ;;  %v4776_v63 = vld [vmem:[#allocation2 + $0x8] sm:$0xf8] }
 0x2d3   : > { %6538 = vmatprep.mubr.msk.bf16.mxu1 %vm6848_vm0, %v6847_v1 }
 0x2d4   : > { %v4489_v7 = vor.u32 %v4488_v16, %v4485_v31 }
 0x2d5   : > { %6557 = vmatmul.mubr.msk.bf16.gmra.mrb[232].mxu0 %vm318_vm1, %v7791_v13  ;;  %v4212_v13 = vsel %vm4194_vm13, %v4202_v3, %v4211_v62  ;;  %v4378_v3 = vsel %vm461_vm5, %v4376_v39, %v7795_v8  ;;  %v4382_v8 = vsel %vm461_vm5, %v4379_v47, %v4381_v43  ;;  %v6823_v39 = vld [vmem:[%s8327_s4 + $0xa8] sm:$0xff]   ;;  %v4677_v47 = vshll.u32 %v8136_v5, 16 }
 0x2d6   : > { %6560 = vmatprep.mubr.msk.bf16.mxu0 %vm6848_vm0, %v6847_v1 }
 0x2da   : > { %6539 = vmatmul.mubr.msk.bf16.vlgmr.msra.gmra.mrb[216].mxu1 %vm318_vm1, %v4107_v37  ;;  %v4490_v37 = vsel %vm554_vm3, %v7730_v45, %v4489_v7 }
 0x2db   : > { %6565 = vmatpush3.bf16.msra.mxu1 %v6816_v28  ;;  %6542 = vmatprep.mubr.msk.bf16.mxu1 %vm6848_vm0, %v6847_v1  ;;  %v4495_v28 = vshll.u32 %v4461_v26, 16 }
 0x2dc   : > { %6592 = vmatprep.subr.bf16.mxu1 %v6847_v1 }
 0x2dd   : > { %6561 = vmatmul.mubr.msk.bf16.gmra.mrb[236].mxu0 %vm318_vm1, %v4212_v13  ;;  %v4494_v13 = vrot.slane %v4492_v34, 1  ;;  %v4497_v35 = vrot.slane %v4495_v28, 2  ;;  %v4690_v34 = vshrl.u32 %v4669_v27, 16  ;;  %v4693_v28 = vshll.u32 %v4669_v27, 16 }
 0x2de   : > { %6580 = vmatprep.mubr.msk.bf16.mxu0 %vm6848_vm0, %v6847_v1 }
 0x2e2   : > { %6543 = vmatmul.mubr.msk.bf16.gmra.mrb[220].mxu1 %vm318_vm1, %v4109_v41  ;;  %v4782_v41 = vrot.slane %v4776_v63, 3 }
 0x2e3   : > { %6546 = vmatprep.mubr.msk.bf16.mxu1 %vm6848_vm0, %v6847_v1 }
 0x2e5   : > { %6581 = vmatmul.mubr.msk.bf16.vlgmr.msra.gmra.mrb[240].mxu0 %vm318_vm1, %v4378_v3  ;;  %v4784_v3 = vsel %vm762_vm6, %v4782_v41, %v7840_v24  ;;  %v4695_v41 = vrot.slane %v4693_v28, 3 }
 0x2e6   : > { %6584 = vmatprep.mubr.msk.bf16.mxu0 %vm6848_vm0, %v6847_v1  ;;  %6607 = vmatpush3.bf16.msra.mxu0 %v6819_v23 }
 0x2e7   : > { %6634 = vmatprep.subr.bf16.mxu0 %v6847_v1 }
 0x2ea   : > { %6547 = vmatmul.mubr.msk.bf16.gmra.mrb[224].mxu1 %vm318_vm1, %v4111_v36 }
 0x2eb   : > { %6566 = vmatprep.mubr.msk.bf16.mxu1 %vm6848_vm0, %v6847_v1 }
 0x2ed   : > { %6585 = vmatmul.mubr.msk.bf16.gmra.mrb[244].mxu0 %vm318_vm1, %v4380_v57  ;;  %v4785_v57 = vrot.slane %v7800_v2, 3 }
 0x2ee   : > { %6588 = vmatprep.mubr.msk.bf16.mxu0 %vm6848_vm0, %v6847_v1 }
 0x2f2   : > { %6567 = vmatmul.mubr.msk.bf16.vlgmr.msra.gmra.mrb[228].mxu1 %vm318_vm1, %v7654_v33  ;;  %v4584_v33 = vrot.slane %v8136_v5, 2  ;;  %v4786_v5 = vsel %vm762_vm6, %v7840_v24, %v4785_v57 }
 0x2f3   : > { %6593 = vmatpush3.bf16.msra.mxu1 %v6818_v42  ;;  %6570 = vmatprep.mubr.msk.bf16.mxu1 %vm6848_vm0, %v6847_v1 }
 0x2f4   : > { %6620 = vmatprep.subr.bf16.mxu1 %v6847_v1  ;;  %v4586_v53 = vsel %vm665_vm7, %v4584_v33, %v7937_v6  ;;  %v4590_v6 = vsel %vm665_vm7, %v4587_v29, %v4589_v21  ;;  %v4676_v33 = vrot.slane %v4674_v40, 2  ;;  %v4787_v21 = vrot.slane %v4669_v27, 3 }
 0x2f5   : > { %6589 = vmatmul.mubr.msk.bf16.gmra.mrb[248].mxu0 %vm318_vm1, %v4382_v8 }
 0x2f6   : > { %6608 = vmatprep.mubr.msk.bf16.mxu0 %vm6848_vm0, %v6847_v1 }
 0x2fa   : > { %6571 = vmatmul.mubr.msk.bf16.gmra.mrb[232].mxu1 %vm318_vm1, %v7679_v15  ;;  %v4469_v15 = vshll.u32 %v4365_v22, 16 }
 0x2fb   : > { %6574 = vmatprep.mubr.msk.bf16.mxu1 %vm6848_vm0, %v6847_v1 }
 0x2fc   : > { %v4471_v51 = vrot.slane %v4469_v15, 2 }
 0x2fd   : > { %6609 = vmatmul.mubr.msk.bf16.vlgmr.msra.gmra.mrb[252].mxu0 %vm318_vm1, %v4586_v53 }
 0x2fe   : > { %6612 = vmatprep.mubr.msk.bf16.mxu0 %vm6848_vm0, %v6847_v1  ;;  %6635 = vmatpush3.bf16.msra.mxu0 %v6821_v55  ;;  %v4472_v19 = vor.u32 %v4471_v51, %v4468_v60  ;;  %v4679_v55 = vrot.slane %v4677_v47, 3 }
 0x2ff   : > { %6662 = vmatprep.subr.bf16.mxu0 %v6847_v1 }
 0x300   : > { %v4481_v54 = vsel %vm554_vm3, %v4472_v19, %v7730_v45  ;;  %v4498_v45 = vor.u32 %v4497_v35, %v4494_v13  ;;  %v4680_v51 = vor.u32 %v4679_v55, %v4676_v33 }
 0x302   : > { %6575 = vmatmul.mubr.msk.bf16.gmra.mrb[236].mxu1 %vm318_vm1, %v7800_v2  ;;  %v4499_v42 = vsel %vm554_vm3, %v4489_v7, %v4498_v45 }
 0x303   : > { %6594 = vmatprep.mubr.msk.bf16.mxu1 %vm6848_vm0, %v6847_v1 }
 0x305   : > { %6613 = vmatmul.mubr.msk.bf16.gmra.mrb[0].mxu0 %vm318_vm1, %v4588_v18  ;;  %v6822_v18 = vld [vmem:[%s8327_s4 + $0xa0] sm:$0xff]  }
 0x306   : > { %6616 = vmatprep.mubr.msk.bf16.mxu0 %vm6848_vm0, %v6847_v1 }
 0x30a   : > { %6595 = vmatmul.mubr.msk.bf16.vlgmr.msra.gmra.mrb[240].mxu1 %vm318_vm1, %v4481_v54  ;;  %v4684_v54 = vsel %vm1372_vm8, %v4680_v51, %v7829_v9 }
 0x30b   : > { %6621 = vmatpush3.bf16.msra.mxu1 %v6820_v32  ;;  %6598 = vmatprep.mubr.msk.bf16.mxu1 %vm6848_vm0, %v6847_v1 }
 0x30c   : > { %6648 = vmatprep.subr.bf16.mxu1 %v6847_v1 }
 0x30d   : > { %6617 = vmatmul.mubr.msk.bf16.gmra.mrb[4].mxu0 %vm318_vm1, %v4590_v6  ;;  %v4788_v6 = vsel %vm762_vm6, %v4785_v57, %v4787_v21 }
 0x30e   : > { %6636 = vmatprep.mubr.msk.bf16.mxu0 %vm6848_vm0, %v6847_v1 }
 0x30f   : > { %v3092_v17 = vpop.f32.mrb[156].mxu0 }
 0x310   : > { %v6386_v62 = vpop.f32.mrb[157].mxu0 }
 0x311   : > { %v3095_v22 = vpop.f32.mrb[158].mxu0 }
 0x312   : > { %6599 = vmatmul.mubr.msk.bf16.gmra.mrb[244].mxu1 %vm318_vm1, %v4490_v37  ;;  %v6387_v23 = vpop.f32.mrb[159].mxu0 }
 0x313   : > { %6602 = vmatprep.mubr.msk.bf16.mxu1 %vm6848_vm0, %v6847_v1  ;;  %v6825_v23 = vld [vmem:[%s8327_s4 + $0xb8] sm:$0xff]  }
 0x315   : > { %6637 = vmatmul.mubr.msk.bf16.vlgmr.msra.gmra.mrb[8].mxu0 %vm318_vm1, %v4784_v3 }
 0x316   : > { %6640 = vmatprep.mubr.msk.bf16.mxu0 %vm6848_vm0, %v6847_v1  ;;  %6663 = vmatpush3.bf16.msra.mxu0 %v6823_v39 }
 0x317   : > { %6690 = vmatprep.subr.bf16.mxu0 %v6847_v1 }
 0x318   : > { %v3100_v36 = vpop.f32.mrb[160].mxu0 }
 0x319   : > { %v6390_v49 = vpop.f32.mrb[161].mxu0 }
 0x31a   : > { %v3103_v43 = vpop.f32.mrb[162].mxu0  ;;  %6603 = vmatmul.mubr.msk.bf16.gmra.mrb[248].mxu1 %vm318_vm1, %v4499_v42 }
 0x31b   : > { %v6391_v8 = vpop.f32.mrb[163].mxu0  ;;  %6622 = vmatprep.mubr.msk.bf16.mxu1 %vm6848_vm0, %v6847_v1 }
 0x31d   : > { %v3023_v53 = vpop.f32.mrb[144].mxu1  ;;  %6641 = vmatmul.mubr.msk.bf16.gmra.mrb[12].mxu0 %vm318_vm1, %v4786_v5 }
 0x31e   : > { %v3093_v15 = vadd.f32 %v3092_v17, %v3023_v53  ;;  %v6372_v29 = vpop.f32.mrb[145].mxu1  ;;  %6644 = vmatprep.mubr.msk.bf16.mxu0 %vm6848_vm0, %v6847_v1 }
 0x31f   : > { %v3026_v60 = vpop.f32.mrb[146].mxu1 }
 0x320   : > { %v3096_v26 = vadd.f32 %v3095_v22, %v3026_v60  ;;  %v6373_v19 = vpop.f32.mrb[147].mxu1  ;;  %v3108_v32 = vpop.f32.mrb[164].mxu0  ;;  %v4692_v22 = vrot.slane %v4690_v34, 2 }
 0x321   : > { %v6394_v24 = vpop.f32.mrb[165].mxu0 }
 0x322   : > { %v3111_v31 = vpop.f32.mrb[166].mxu0  ;;  %6623 = vmatmul.mubr.msk.bf16.vlgmr.msra.gmra.mrb[252].mxu1 %vm318_vm1, %v4684_v54  ;;  %v4696_v40 = vor.u32 %v4695_v41, %v4692_v22  ;;  %v8257_v41 = vld [vmem:[#allocation2 + $0x20] sm:$0x3f] }
 0x323   : > { %6649 = vmatpush3.bf16.msra.mxu1 %v6822_v18  ;;  %v6395_v16 = vpop.f32.mrb[167].mxu0  ;;  %6626 = vmatprep.mubr.msk.bf16.mxu1 %vm6848_vm0, %v6847_v1 }
 0x324   : > { %6676 = vmatprep.subr.bf16.mxu1 %v6847_v1  ;;  %v4697_v8 = vsel %vm1372_vm8, %v7842_v12, %v4696_v40  ;;  %v6824_v12 = vld [vmem:[%s8327_s4 + $0xb0] sm:$0xff]  }
 0x325   : > { %v3031_v7 = vpop.f32.mrb[148].mxu1  ;;  %6645 = vmatmul.mubr.msk.bf16.gmra.mrb[16].mxu0 %vm318_vm1, %v4788_v6 }
 0x326   : > { %v3101_v63 = vadd.f32 %v3100_v36, %v3031_v7  ;;  %v6376_v17 = vpop.f32.mrb[149].mxu1  ;;  %6664 = vmatprep.mubr.msk.bf16.mxu0 %vm6848_vm0, %v6847_v1 }
 0x327   : > { %v3034_v9 = vpop.f32.mrb[150].mxu1 }
 0x328   : > { %v3104_v62 = vadd.f32 %v3103_v43, %v3034_v9  ;;  %v6377_v37 = vpop.f32.mrb[151].mxu1  ;;  %v3286_v13 = vpop.f32.mrb[168].mxu0 }
 0x329   : > { %v6414_v35 = vpop.f32.mrb[169].mxu0 }
 0x32a   : > { %v3289_v39 = vpop.f32.mrb[170].mxu0  ;;  %6627 = vmatmul.mubr.msk.bf16.gmra.mrb[0].mxu1 %vm318_vm1, %v7861_v50 }
 0x32b   : > { %v6415_v3 = vpop.f32.mrb[171].mxu0  ;;  %6630 = vmatprep.mubr.msk.bf16.mxu1 %vm6848_vm0, %v6847_v1 }
 0x32d   : > { %v3039_v45 = vpop.f32.mrb[152].mxu1  ;;  %6665 = vmatmul.mubr.msk.bf16.vlgmr.msra.gmra.mrb[20].mxu0 %vm318_vm1, %v7885_v30 }
 0x32e   : > { %v3109_v47 = vadd.f32 %v3108_v32, %v3039_v45  ;;  %v6380_v36 = vpop.f32.mrb[153].mxu1  ;;  %6668 = vmatprep.mubr.msk.bf16.mxu0 %vm6848_vm0, %v6847_v1  ;;  %6691 = vmatpush3.bf16.msra.mxu0 %v6825_v23 }
 0x32f   : > { %v3042_v50 = vpop.f32.mrb[154].mxu1  ;;  %v5179_v36 = vshrl.u32 %v8257_v41, 16 }
 0x330   : > { %v3112_v57 = vadd.f32 %v3111_v31, %v3042_v50  ;;  %v6381_v49 = vpop.f32.mrb[155].mxu1  ;;  %v3294_v42 = vpop.f32.mrb[172].mxu0  ;;  %v5182_v50 = vshll.u32 %v8257_v41, 16 }
 0x331   : > { %v6418_v43 = vpop.f32.mrb[173].mxu0 }
 0x332   : > { %v3297_v33 = vpop.f32.mrb[174].mxu0  ;;  %6631 = vmatmul.mubr.msk.bf16.gmra.mrb[4].mxu1 %vm318_vm1, %v4697_v8 }
 0x333   : > { %v6419_v55 = vpop.f32.mrb[175].mxu0  ;;  %6650 = vmatprep.mubr.msk.bf16.mxu1 %vm6848_vm0, %v6847_v1 }
 0x335   : > { %v3179_v30 = vpop.f32.mrb[156].mxu1  ;;  %6669 = vmatmul.mubr.msk.bf16.gmra.mrb[24].mxu0 %vm318_vm1, %v7872_v4  ;;  %v5163_v4 = vshrl.u32 %v7863_v56, 16 }
 0x336   : > { %v3202_v5 = vadd.f32 %v3179_v30, %v3093_v15  ;;  %v6400_v53 = vpop.f32.mrb[157].mxu1  ;;  %6672 = vmatprep.mubr.msk.bf16.mxu0 %vm6848_vm0, %v6847_v1  ;;  %v5166_v15 = vshll.u32 %v7863_v56, 16 }
 0x337   : > { %v3182_v27 = vpop.f32.mrb[158].mxu1  ;;  %v6826_v53 = vld [vmem:[%s8327_s4 + $0xc0] sm:$0xff]  }
 0x338   : > { %v3203_v29 = vadd.f32 %v3182_v27, %v3096_v26  ;;  %v6401_v60 = vpop.f32.mrb[159].mxu1  ;;  %v3302_v51 = vpop.f32.mrb[176].mxu0  ;;  %v3309_v18 = vadd.f32 %v3286_v13, %v3202_v5  ;;  %v5168_v16 = vrot.slane %v5166_v15, 6  ;;  %v4868_v13 = vld [vmem:[#allocation2 + $0x20] sm:$0xf] }
 0x339   : > { %v6422_v19 = vpop.f32.mrb[177].mxu0 }
 0x33a   : > { %v3305_v32 = vpop.f32.mrb[178].mxu0  ;;  %6651 = vmatmul.mubr.msk.bf16.vlgmr.msra.gmra.mrb[8].mxu1 %vm318_vm1, %v7848_v61  ;;  %v3310_v21 = vadd.f32 %v3289_v39, %v3203_v29  ;;  %v5165_v61 = vrot.slane %v5163_v4, 5 }
 0x33b   : > { %6677 = vmatpush3.bf16.msra.mxu1 %v6824_v12  ;;  %v6423_v24 = vpop.f32.mrb[179].mxu0  ;;  %6654 = vmatprep.mubr.msk.bf16.mxu1 %vm6848_vm0, %v6847_v1 }
 0x33c   : > { %6704 = vmatprep.subr.bf16.mxu1 %v6847_v1  ;;  %v5169_v37 = vor.u32 %v5168_v16, %v5165_v61 }
 0x33d   : > { %v3187_v26 = vpop.f32.mrb[160].mxu1  ;;  %6673 = vmatmul.mubr.msk.bf16.gmra.mrb[28].mxu0 %vm318_vm1, %v7875_v52 }
 0x33e   : > { %v3204_v54 = vadd.f32 %v3187_v26, %v3101_v63  ;;  %v6404_v31 = vpop.f32.mrb[161].mxu1  ;;  %6692 = vmatprep.mubr.msk.bf16.mxu0 %vm6848_vm0, %v6847_v1  ;;  %v5173_v35 = vsel %vm5161_vm9, %v5169_v37, %v7895_v25 }
 0x33f   : > { %v3190_v56 = vpop.f32.mrb[162].mxu1 }
 0x340   : > { %v3205_v6 = vadd.f32 %v3190_v56, %v3104_v62  ;;  %v6405_v7 = vpop.f32.mrb[163].mxu1  ;;  %v3469_v34 = vpop.f32.mrb[180].mxu0  ;;  %v3311_v28 = vadd.f32 %v3294_v42, %v3204_v54  ;;  %v4879_v62 = vrot.slane %v4868_v13, 4 }
 0x341   : > { %v6442_v17 = vpop.f32.mrb[181].mxu0 }
 0x342   : > { %v3472_v9 = vpop.f32.mrb[182].mxu0  ;;  %6655 = vmatmul.mubr.msk.bf16.gmra.mrb[12].mxu1 %vm318_vm1, %v7854_v20  ;;  %v3312_v52 = vadd.f32 %v3297_v33, %v3205_v6  ;;  %v4880_v42 = vsel %vm3611_vm14, %v4877_v14, %v4879_v62  ;;  %v5184_v33 = vrot.slane %v5182_v50, 6 }
 0x343   : > { %v6443_v63 = vpop.f32.mrb[183].mxu0  ;;  %6658 = vmatprep.mubr.msk.bf16.mxu1 %vm6848_vm0, %v6847_v1 }
 0x345   : > { %v3195_v22 = vpop.f32.mrb[164].mxu1  ;;  %6693 = vmatmul.mubr.msk.bf16.vlgmr.msra.gmra.mrb[32].mxu0 %vm318_vm1, %v5173_v35 }
 0x346   : > { %v3206_v39 = vadd.f32 %v3195_v22, %v3109_v47  ;;  %v6408_v23 = vpop.f32.mrb[165].mxu1  ;;  %6696 = vmatprep.mubr.msk.bf16.mxu0 %vm6848_vm0, %v6847_v1 }
 0x347   : > { %v3198_v20 = vpop.f32.mrb[166].mxu1 }
 0x348   : > { %v3207_v3 = vadd.f32 %v3198_v20, %v3112_v57  ;;  %v6409_v45 = vpop.f32.mrb[167].mxu1  ;;  %v3477_v40 = vpop.f32.mrb[184].mxu0  ;;  %v3313_v25 = vadd.f32 %v3302_v51, %v3206_v39  ;;  %v5181_v57 = vrot.slane %v5179_v36, 5 }
 0x349   : > { %v6446_v49 = vpop.f32.mrb[185].mxu0 }
 0x34a   : > { %v3480_v43 = vpop.f32.mrb[186].mxu0  ;;  %6659 = vmatmul.mubr.msk.bf16.gmra.mrb[16].mxu1 %vm318_vm1, %v4880_v42  ;;  %v3314_v47 = vadd.f32 %v3305_v32, %v3207_v3  ;;  %v5185_v60 = vor.u32 %v5184_v33, %v5181_v57 }
 0x34b   : > { %v6447_v8 = vpop.f32.mrb[187].mxu0  ;;  %6678 = vmatprep.mubr.msk.bf16.mxu1 %vm6848_vm0, %v6847_v1 }
 0x34c   : > { %v5186_v4 = vsel %vm5161_vm9, %v7901_v46, %v5185_v60 }
 0x34d   : > { %v3377_v55 = vpop.f32.mrb[168].mxu1  ;;  %6697 = vmatmul.mubr.msk.bf16.gmra.mrb[36].mxu0 %vm318_vm1, %v7927_v59 }
 0x34e   : > { %v3400_v30 = vadd.f32 %v3377_v55, %v3309_v18  ;;  %v6428_v5 = vpop.f32.mrb[169].mxu1  ;;  %6700 = vmatprep.mubr.msk.bf16.mxu0 %vm6848_vm0, %v6847_v1 }
 0x34f   : > { %v3380_v14 = vpop.f32.mrb[170].mxu1 }
 0x350   : > { %v3401_v27 = vadd.f32 %v3380_v14, %v3310_v21  ;;  %v6429_v12 = vpop.f32.mrb[171].mxu1  ;;  %v3485_v29 = vpop.f32.mrb[188].mxu0  ;;  %v3492_v51 = vadd.f32 %v3469_v34, %v3400_v30  ;;  %v5077_v34 = vrot.slane %v7783_v48, 5 }
 0x351   : > { %v6450_v19 = vpop.f32.mrb[189].mxu0 }
 0x352   : > { %v3488_v32 = vpop.f32.mrb[190].mxu0  ;;  %6679 = vmatmul.mubr.msk.bf16.vlgmr.msra.gmra.mrb[20].mxu1 %vm318_vm1, %v7905_v38  ;;  %v3493_v59 = vadd.f32 %v3472_v9, %v3401_v27 }
 0x353   : > { %6705 = vmatpush3.bf16.msra.mxu1 %v6826_v53  ;;  %v6451_v18 = vpop.f32.mrb[191].mxu0  ;;  %6682 = vmatprep.mubr.msk.bf16.mxu1 %vm6848_vm0, %v6847_v1 }
 0x355   : > { %v3385_v15 = vpop.f32.mrb[172].mxu1  ;;  %6701 = vmatmul.mubr.msk.bf16.gmra.mrb[40].mxu0 %vm318_vm1, %v5186_v4 }
 0x356   : > { %v3402_v21 = vadd.f32 %v3385_v15, %v3311_v28  ;;  %v6432_v24 = vpop.f32.mrb[173].mxu1 }
 0x357   : > { %v3388_v26 = vpop.f32.mrb[174].mxu1 }
 0x358   : > { %v3403_v54 = vadd.f32 %v3388_v26, %v3312_v52  ;;  %v6433_v31 = vpop.f32.mrb[175].mxu1  ;;  %v3668_v61 = vpop.f32.mrb[192].mxu0  ;;  %v3494_v16 = vadd.f32 %v3477_v40, %v3402_v21 }
 0x359   : > { %v6470_v38 = vpop.f32.mrb[193].mxu0 }
 0x35a   : > { %v3671_v56 = vpop.f32.mrb[194].mxu0  ;;  %6683 = vmatmul.mubr.msk.bf16.gmra.mrb[24].mxu1 %vm318_vm1, %v7911_v0  ;;  %v3495_v6 = vadd.f32 %v3480_v43, %v3403_v54  ;;  %v5078_v0 = vsel %vm3811_vm15, %v5075_v44, %v5077_v34 }
 0x35b   : > { %v6471_v7 = vpop.f32.mrb[195].mxu0  ;;  %6686 = vmatprep.mubr.msk.bf16.mxu1 %vm6848_vm0, %v6847_v1 }
 0x35d   : > { %v3393_v46 = vpop.f32.mrb[176].mxu1 }
 0x35e   : > { %v3404_v28 = vadd.f32 %v3393_v46, %v3313_v25  ;;  %v6436_v17 = vpop.f32.mrb[177].mxu1 }
 0x35f   : > { %v3396_v9 = vpop.f32.mrb[178].mxu1 }
 0x360   : > { %v3405_v37 = vadd.f32 %v3396_v9, %v3314_v47  ;;  %v6437_v13 = vpop.f32.mrb[179].mxu1  ;;  %v3676_v52 = vpop.f32.mrb[196].mxu0  ;;  %v3496_v63 = vadd.f32 %v3485_v29, %v3404_v28  ;;  %v5276_v29 = vrot.slane %v8257_v41, 6 }
 0x361   : > { %v6474_v35 = vpop.f32.mrb[197].mxu0 }
 0x362   : > { %v3679_v22 = vpop.f32.mrb[198].mxu0  ;;  %6687 = vmatmul.mubr.msk.bf16.gmra.mrb[28].mxu1 %vm318_vm1, %v5078_v0  ;;  %v3497_v62 = vadd.f32 %v3488_v32, %v3405_v37 }
 0x363   : > { %v6475_v39 = vpop.f32.mrb[199].mxu0  ;;  %6706 = vmatprep.mubr.msk.bf16.mxu1 %vm6848_vm0, %v6847_v1 }
 0x365   : > { %v3576_v48 = vpop.f32.mrb[180].mxu1 }
 0x366   : > { %v3599_v23 = vadd.f32 %v3576_v48, %v3492_v51  ;;  %v6456_v20 = vpop.f32.mrb[181].mxu1 }
 0x367   : > { %v3579_v3 = vpop.f32.mrb[182].mxu1 }
 0x368   : > { %v3600_v45 = vadd.f32 %v3579_v3, %v3493_v59  ;;  %v6457_v40 = vpop.f32.mrb[183].mxu1  ;;  %v3684_v36 = vpop.f32.mrb[200].mxu0  ;;  %v3691_v50 = vadd.f32 %v3668_v61, %v3599_v23 }
 0x369   : > { %v6478_v25 = vpop.f32.mrb[201].mxu0 }
 0x36a   : > { %v3687_v49 = vpop.f32.mrb[202].mxu0  ;;  %6707 = vmatmul.mubr.msk.bf16.vlgmr.msra.gmra.mrb[32].mxu1 %vm318_vm1, %v7915_v11  ;;  %v3692_v44 = vadd.f32 %v3671_v56, %v3600_v45 }
 0x36b   : > { %v6479_v42 = vpop.f32.mrb[203].mxu0  ;;  %6710 = vmatprep.mubr.msk.bf16.mxu1 %vm6848_vm0, %v6847_v1 }
 0x36d   : > { %v3584_v43 = vpop.f32.mrb[184].mxu1 }
 0x36e   : > { %v3601_v47 = vadd.f32 %v3584_v43, %v3494_v16  ;;  %v6460_v8 = vpop.f32.mrb[185].mxu1 }
 0x36f   : > { %v3587_v57 = vpop.f32.mrb[186].mxu1 }
 0x370   : > { %v3602_v33 = vadd.f32 %v3587_v57, %v3495_v6  ;;  %v6461_v55 = vpop.f32.mrb[187].mxu1  ;;  %v3868_v30 = vpop.f32.mrb[204].mxu0  ;;  %v3693_v5 = vadd.f32 %v3676_v52, %v3601_v47 }
 0x371   : > { %v6498_v14 = vpop.f32.mrb[205].mxu0 }
 0x372   : > { %v3871_v53 = vpop.f32.mrb[206].mxu0  ;;  %6711 = vmatmul.mubr.msk.bf16.gmra.mrb[36].mxu1 %vm318_vm1, %v7921_v58  ;;  %v3694_v27 = vadd.f32 %v3679_v22, %v3602_v33  ;;  %v5277_v58 = vsel %vm3904_vm2, %v5274_v10, %v5276_v29 }
 0x373   : > { %v6499_v11 = vpop.f32.mrb[207].mxu0  ;;  %6714 = vmatprep.mubr.msk.bf16.mxu1 %vm6848_vm0, %v6847_v1  ;;  %vm5393_vm0 = vcmask 125952  }
 0x375   : > { %v3592_v12 = vpop.f32.mrb[188].mxu1 }
 0x376   : > { %v3603_v60 = vadd.f32 %v3592_v12, %v3496_v63  ;;  %v6464_v51 = vpop.f32.mrb[189].mxu1 }
 0x377   : > { %v3595_v19 = vpop.f32.mrb[190].mxu1 }
 0x378   : > { %v3604_v32 = vadd.f32 %v3595_v19, %v3497_v62  ;;  %v6465_v59 = vpop.f32.mrb[191].mxu1  ;;  %v3876_v18 = vpop.f32.mrb[208].mxu0  ;;  %v3695_v4 = vadd.f32 %v3684_v36, %v3603_v60 }
 0x379   : > { %v6502_v15 = vpop.f32.mrb[209].mxu0 }
 0x37a   : > { %v3879_v21 = vpop.f32.mrb[210].mxu0  ;;  %6715 = vmatmul.mubr.msk.bf16.gmra.mrb[40].mxu1 %vm318_vm1, %v5277_v58  ;;  %v3696_v24 = vadd.f32 %v3687_v49, %v3604_v32 }
 0x37b   : > { %v6503_v1 = vpop.f32.mrb[211].mxu0 }
 0x37d   : > { %v3776_v26 = vpop.f32.mrb[192].mxu1 }
 0x37e   : > { %v3799_v54 = vadd.f32 %v3776_v26, %v3691_v50  ;;  %v6484_v41 = vpop.f32.mrb[193].mxu1 }
 0x37f   : > { %v3779_v31 = vpop.f32.mrb[194].mxu1 }
 0x380   : > { %v3800_v61 = vadd.f32 %v3779_v31, %v3692_v44  ;;  %v6485_v16 = vpop.f32.mrb[195].mxu1  ;;  %v3884_v38 = vpop.f32.mrb[212].mxu0  ;;  %v3891_v56 = vadd.f32 %v3868_v30, %v3799_v54 }
 0x381   : > { %v6506_v6 = vpop.f32.mrb[213].mxu0 }
 0x382   : > { %v3887_v7 = vpop.f32.mrb[214].mxu0  ;;  %v3892_v46 = vadd.f32 %v3871_v53, %v3800_v61 }
 0x383   : > { %v6507_v34 = vpop.f32.mrb[215].mxu0 }
 0x385   : > { %v3784_v2 = vpop.f32.mrb[196].mxu1 }
 0x386   : > { %v3801_v28 = vadd.f32 %v3784_v2, %v3693_v5  ;;  %v6488_v10 = vpop.f32.mrb[197].mxu1 }
 0x387   : > { %v3787_v17 = vpop.f32.mrb[198].mxu1 }
 0x388   : > { %v3802_v9 = vadd.f32 %v3787_v17, %v3694_v27  ;;  %v6489_v37 = vpop.f32.mrb[199].mxu1  ;;  %v4069_v13 = vpop.f32.mrb[216].mxu0  ;;  %v3893_v52 = vadd.f32 %v3876_v18, %v3801_v28 }
 0x389   : > { %v6526_v63 = vpop.f32.mrb[217].mxu0 }
 0x38a   : > { %v4072_v35 = vpop.f32.mrb[218].mxu0  ;;  %v3894_v0 = vadd.f32 %v3879_v21, %v3802_v9 }
 0x38b   : > { %v6527_v22 = vpop.f32.mrb[219].mxu0 }
 0x38d   : > { %v3792_v62 = vpop.f32.mrb[200].mxu1 }
 0x38e   : > { %v3803_v39 = vadd.f32 %v3792_v62, %v3695_v4  ;;  %v6492_v48 = vpop.f32.mrb[201].mxu1 }
 0x38f   : > { %v3795_v23 = vpop.f32.mrb[202].mxu1 }
 0x390   : > { %v3804_v20 = vadd.f32 %v3795_v23, %v3696_v24  ;;  %v6493_v3 = vpop.f32.mrb[203].mxu1  ;;  %v4077_v45 = vpop.f32.mrb[220].mxu0  ;;  %v3895_v40 = vadd.f32 %v3884_v38, %v3803_v39 }
 0x391   : > { %v6530_v36 = vpop.f32.mrb[221].mxu0 }
 0x392   : > { %v4080_v50 = vpop.f32.mrb[222].mxu0  ;;  %v3896_v25 = vadd.f32 %v3887_v7, %v3804_v20 }
 0x393   : > { %v6531_v49 = vpop.f32.mrb[223].mxu0 }
 0x395   : > { %v3961_v44 = vpop.f32.mrb[204].mxu1 }
 0x396   : > { %v3984_v42 = vadd.f32 %v3961_v44, %v3891_v56  ;;  %v6512_v43 = vpop.f32.mrb[205].mxu1 }
 0x397   : > { %v3964_v47 = vpop.f32.mrb[206].mxu1 }
 0x398   : > { %v3985_v8 = vadd.f32 %v3964_v47, %v3892_v46  ;;  %v6513_v57 = vpop.f32.mrb[207].mxu1  ;;  %v4085_v33 = vpop.f32.mrb[224].mxu0  ;;  %v4092_v55 = vadd.f32 %v4069_v13, %v3984_v42 }
 0x399   : > { %v6534_v30 = vpop.f32.mrb[225].mxu0 }
 0x39a   : > { %v4088_v5 = vpop.f32.mrb[226].mxu0  ;;  %v4093_v14 = vadd.f32 %v4072_v35, %v3985_v8 }
 0x39b   : > { %v6535_v53 = vpop.f32.mrb[227].mxu0 }
 0x39d   : > { %v3969_v27 = vpop.f32.mrb[208].mxu1 }
 0x39e   : > { %v3986_v11 = vadd.f32 %v3969_v27, %v3893_v52  ;;  %v6516_v12 = vpop.f32.mrb[209].mxu1 }
 0x39f   : > { %v3972_v29 = vpop.f32.mrb[210].mxu1 }
 0x3a0   : > { %v3987_v60 = vadd.f32 %v3972_v29, %v3894_v0  ;;  %v6517_v51 = vpop.f32.mrb[211].mxu1  ;;  %v4262_v19 = vpop.f32.mrb[228].mxu0  ;;  %v4094_v32 = vadd.f32 %v4077_v45, %v3986_v11 }
 0x3a1   : > { %v6554_v59 = vpop.f32.mrb[229].mxu0 }
 0x3a2   : > { %v4265_v18 = vpop.f32.mrb[230].mxu0  ;;  %v4095_v4 = vadd.f32 %v4080_v50, %v3987_v60 }
 0x3a3   : > { %v6555_v15 = vpop.f32.mrb[231].mxu0 }
 0x3a5   : > { %v3977_v58 = vpop.f32.mrb[212].mxu1 }
 0x3a6   : > { %v3988_v21 = vadd.f32 %v3977_v58, %v3895_v40  ;;  %v6520_v24 = vpop.f32.mrb[213].mxu1 }
 0x3a7   : > { %v3980_v1 = vpop.f32.mrb[214].mxu1 }
 0x3a8   : > { %v3989_v26 = vadd.f32 %v3980_v1, %v3896_v25  ;;  %v6521_v54 = vpop.f32.mrb[215].mxu1  ;;  %v4270_v41 = vpop.f32.mrb[232].mxu0  ;;  %v4096_v31 = vadd.f32 %v4085_v33, %v3988_v21 }
 0x3a9   : > { %v6558_v61 = vpop.f32.mrb[233].mxu0 }
 0x3aa   : > { %v4273_v16 = vpop.f32.mrb[234].mxu0  ;;  %v4097_v38 = vadd.f32 %v4088_v5, %v3989_v26 }
 0x3ab   : > { %v6559_v56 = vpop.f32.mrb[235].mxu0 }
 0x3ad   : > { %v4161_v6 = vpop.f32.mrb[216].mxu1 }
 0x3ae   : > { %v4184_v7 = vadd.f32 %v4161_v6, %v4092_v55  ;;  %v6540_v46 = vpop.f32.mrb[217].mxu1 }
 0x3af   : > { %v4164_v34 = vpop.f32.mrb[218].mxu1 }
 0x3b0   : > { %v4185_v2 = vadd.f32 %v4164_v34, %v4093_v14  ;;  %v6541_v28 = vpop.f32.mrb[219].mxu1  ;;  %v4278_v10 = vpop.f32.mrb[236].mxu0  ;;  %v4285_v17 = vadd.f32 %v4262_v19, %v4184_v7 }
 0x3b1   : > { %v6562_v9 = vpop.f32.mrb[237].mxu0 }
 0x3b2   : > { %v4281_v37 = vpop.f32.mrb[238].mxu0  ;;  %v4286_v13 = vadd.f32 %v4265_v18, %v4185_v2 }
 0x3b3   : > { %v6563_v52 = vpop.f32.mrb[239].mxu0 }
 0x3b5   : > { %v4169_v63 = vpop.f32.mrb[220].mxu1 }
 0x3b6   : > { %v4186_v35 = vadd.f32 %v4169_v63, %v4094_v32  ;;  %v6544_v0 = vpop.f32.mrb[221].mxu1 }
 0x3b7   : > { %v4172_v22 = vpop.f32.mrb[222].mxu1 }
 0x3b8   : > { %v4187_v62 = vadd.f32 %v4172_v22, %v4095_v4  ;;  %v6545_v39 = vpop.f32.mrb[223].mxu1  ;;  %v4432_v48 = vpop.f32.mrb[240].mxu0  ;;  %v4287_v23 = vadd.f32 %v4270_v41, %v4186_v35 }
 0x3b9   : > { %v6582_v20 = vpop.f32.mrb[241].mxu0 }
 0x3ba   : > { %v4435_v3 = vpop.f32.mrb[242].mxu0  ;;  %v4288_v45 = vadd.f32 %v4273_v16, %v4187_v62 }
 0x3bb   : > { %v6583_v40 = vpop.f32.mrb[243].mxu0 }
 0x3bd   : > { %v4177_v36 = vpop.f32.mrb[224].mxu1 }
 0x3be   : > { %v4188_v50 = vadd.f32 %v4177_v36, %v4096_v31  ;;  %v6548_v25 = vpop.f32.mrb[225].mxu1 }
 0x3bf   : > { %v4180_v49 = vpop.f32.mrb[226].mxu1 }
 0x3c0   : > { %v4189_v44 = vadd.f32 %v4180_v49, %v4097_v38  ;;  %v6549_v42 = vpop.f32.mrb[227].mxu1  ;;  %v4440_v43 = vpop.f32.mrb[244].mxu0  ;;  %v4289_v47 = vadd.f32 %v4278_v10, %v4188_v50 }
 0x3c1   : > { %v6586_v8 = vpop.f32.mrb[245].mxu0 }
 0x3c2   : > { %v4443_v57 = vpop.f32.mrb[246].mxu0  ;;  %v4290_v33 = vadd.f32 %v4281_v37, %v4189_v44 }
 0x3c3   : > { %v6587_v55 = vpop.f32.mrb[247].mxu0 }
 0x3c5   : > { %v4336_v30 = vpop.f32.mrb[228].mxu1 }
 0x3c6   : > { %v4359_v5 = vadd.f32 %v4336_v30, %v4285_v17  ;;  %v6568_v14 = vpop.f32.mrb[229].mxu1 }
 0x3c7   : > { %v4339_v53 = vpop.f32.mrb[230].mxu1 }
 0x3c8   : > { %v4360_v27 = vadd.f32 %v4339_v53, %v4286_v13  ;;  %v6569_v11 = vpop.f32.mrb[231].mxu1  ;;  %v4448_v12 = vpop.f32.mrb[248].mxu0  ;;  %v4455_v29 = vadd.f32 %v4432_v48, %v4359_v5 }
 0x3c9   : > { %v6590_v60 = vpop.f32.mrb[249].mxu0 }
 0x3ca   : > { %v4451_v51 = vpop.f32.mrb[250].mxu0  ;;  %v4456_v19 = vadd.f32 %v4435_v3, %v4360_v27 }
 0x3cb   : > { %v6591_v32 = vpop.f32.mrb[251].mxu0 }
 0x3cd   : > { %v4344_v59 = vpop.f32.mrb[232].mxu1 }
 0x3ce   : > { %v4361_v18 = vadd.f32 %v4344_v59, %v4287_v23  ;;  %v6572_v4 = vpop.f32.mrb[233].mxu1 }
 0x3cf   : > { %v4347_v15 = vpop.f32.mrb[234].mxu1 }
 0x3d0   : > { %v4362_v58 = vadd.f32 %v4347_v15, %v4288_v45  ;;  %v6573_v21 = vpop.f32.mrb[235].mxu1  ;;  %v4640_v24 = vpop.f32.mrb[252].mxu0  ;;  %v4457_v1 = vadd.f32 %v4440_v43, %v4361_v18 }
 0x3d1   : > { %v6610_v26 = vpop.f32.mrb[253].mxu0 }
 0x3d2   : > { %v4643_v54 = vpop.f32.mrb[254].mxu0  ;;  %v4458_v41 = vadd.f32 %v4443_v57, %v4362_v58 }
 0x3d3   : > { %v6611_v31 = vpop.f32.mrb[255].mxu0 }
 0x3d5   : > { %v4352_v61 = vpop.f32.mrb[236].mxu1 }
 0x3d6   : > { %v4363_v16 = vadd.f32 %v4352_v61, %v4289_v47  ;;  %v6576_v38 = vpop.f32.mrb[237].mxu1 }
 0x3d7   : > { %v4355_v56 = vpop.f32.mrb[238].mxu1 }
 0x3d8   : > { %v4364_v6 = vadd.f32 %v4355_v56, %v4290_v33  ;;  %v6577_v7 = vpop.f32.mrb[239].mxu1  ;;  %v4648_v46 = vpop.f32.mrb[0].mxu0  ;;  %v4459_v34 = vadd.f32 %v4448_v12, %v4363_v16 }
 0x3d9   : > { %v6614_v2 = vpop.f32.mrb[1].mxu0 }
 0x3da   : > { %v4651_v28 = vpop.f32.mrb[2].mxu0  ;;  %v4460_v10 = vadd.f32 %v4451_v51, %v4364_v6 }
 0x3db   : > { %v6615_v17 = vpop.f32.mrb[3].mxu0 }
 0x3dd   : > { %v4549_v9 = vpop.f32.mrb[240].mxu1 }
 0x3de   : > { %v4572_v37 = vadd.f32 %v4549_v9, %v4455_v29  ;;  %v6596_v13 = vpop.f32.mrb[241].mxu1 }
 0x3df   : > { %v4552_v52 = vpop.f32.mrb[242].mxu1 }
 0x3e0   : > { %v4573_v63 = vadd.f32 %v4552_v52, %v4456_v19  ;;  %v6597_v35 = vpop.f32.mrb[243].mxu1  ;;  %v4656_v0 = vpop.f32.mrb[4].mxu0  ;;  %v4663_v22 = vadd.f32 %v4640_v24, %v4572_v37 }
 0x3e1   : > { %v6618_v62 = vpop.f32.mrb[5].mxu0 }
 0x3e2   : > { %v4659_v39 = vpop.f32.mrb[6].mxu0  ;;  %v4664_v48 = vadd.f32 %v4643_v54, %v4573_v63 }
 0x3e3   : > { %v6619_v23 = vpop.f32.mrb[7].mxu0 }
 0x3e5   : > { %v4557_v20 = vpop.f32.mrb[244].mxu1 }
 0x3e6   : > { %v4574_v3 = vadd.f32 %v4557_v20, %v4457_v1  ;;  %v6600_v45 = vpop.f32.mrb[245].mxu1 }
 0x3e7   : > { %v4560_v40 = vpop.f32.mrb[246].mxu1 }
 0x3e8   : > { %v4575_v36 = vadd.f32 %v4560_v40, %v4458_v41  ;;  %v6601_v50 = vpop.f32.mrb[247].mxu1  ;;  %v4838_v25 = vpop.f32.mrb[8].mxu0  ;;  %v4665_v49 = vadd.f32 %v4648_v46, %v4574_v3 }
 0x3e9   : > { %v6638_v44 = vpop.f32.mrb[9].mxu0 }
 0x3ea   : > { %v4841_v42 = vpop.f32.mrb[10].mxu0  ;;  %v4666_v43 = vadd.f32 %v4651_v28, %v4575_v36 }
 0x3eb   : > { %v6639_v47 = vpop.f32.mrb[11].mxu0 }
 0x3ed   : > { %v4565_v8 = vpop.f32.mrb[248].mxu1 }
 0x3ee   : > { %v4576_v57 = vadd.f32 %v4565_v8, %v4459_v34  ;;  %v6604_v33 = vpop.f32.mrb[249].mxu1 }
 0x3ef   : > { %v4568_v55 = vpop.f32.mrb[250].mxu1 }
 0x3f0   : > { %v4577_v30 = vadd.f32 %v4568_v55, %v4460_v10  ;;  %v6605_v5 = vpop.f32.mrb[251].mxu1  ;;  %v4846_v14 = vpop.f32.mrb[12].mxu0  ;;  %v4667_v53 = vadd.f32 %v4656_v0, %v4576_v57 }
 0x3f1   : > { %v6642_v27 = vpop.f32.mrb[13].mxu0 }
 0x3f2   : > { %v4849_v11 = vpop.f32.mrb[14].mxu0  ;;  %v4668_v12 = vadd.f32 %v4659_v39, %v4577_v30 }
 0x3f3   : > { %v6643_v29 = vpop.f32.mrb[15].mxu0 }
 0x3f5   : > { %v4747_v60 = vpop.f32.mrb[252].mxu1 }
 0x3f6   : > { %v4770_v51 = vadd.f32 %v4747_v60, %v4663_v22  ;;  %v6624_v19 = vpop.f32.mrb[253].mxu1 }
 0x3f7   : > { %v4750_v32 = vpop.f32.mrb[254].mxu1 }
 0x3f8   : > { %v4771_v59 = vadd.f32 %v4750_v32, %v4664_v48  ;;  %v6625_v18 = vpop.f32.mrb[255].mxu1  ;;  %v4854_v4 = vpop.f32.mrb[16].mxu0  ;;  %v4861_v15 = vadd.f32 %v4838_v25, %v4770_v51 }
 0x3f9   : > { %v6646_v58 = vpop.f32.mrb[17].mxu0 }
 0x3fa   : > { %v4857_v21 = vpop.f32.mrb[18].mxu0  ;;  %v4862_v24 = vadd.f32 %v4841_v42, %v4771_v59 }
 0x3fb   : > { %v6647_v1 = vpop.f32.mrb[19].mxu0 }
 0x3fd   : > { %v4755_v26 = vpop.f32.mrb[0].mxu1 }
 0x3fe   : > { %v4772_v54 = vadd.f32 %v4755_v26, %v4665_v49  ;;  %v6628_v41 = vpop.f32.mrb[1].mxu1 }
 0x3ff   : > { %v4758_v31 = vpop.f32.mrb[2].mxu1 }
 0x400   : > { %v4773_v61 = vadd.f32 %v4758_v31, %v4666_v43  ;;  %v6629_v16 = vpop.f32.mrb[3].mxu1  ;;  %v5037_v38 = vpop.f32.mrb[20].mxu0  ;;  %v4863_v56 = vadd.f32 %v4846_v14, %v4772_v54 }
 0x401   : > { %v6666_v6 = vpop.f32.mrb[21].mxu0 }
 0x402   : > { %v5040_v7 = vpop.f32.mrb[22].mxu0  ;;  %v4864_v46 = vadd.f32 %v4849_v11, %v4773_v61 }
 0x403   : > { %v6667_v34 = vpop.f32.mrb[23].mxu0 }
 0x405   : > { %v4763_v2 = vpop.f32.mrb[4].mxu1 }
 0x406   : > { %v4774_v28 = vadd.f32 %v4763_v2, %v4667_v53  ;;  %v6632_v10 = vpop.f32.mrb[5].mxu1 }
 0x407   : > { %v4766_v17 = vpop.f32.mrb[6].mxu1 }
 0x408   : > { %v4775_v9 = vadd.f32 %v4766_v17, %v4668_v12  ;;  %v6633_v37 = vpop.f32.mrb[7].mxu1  ;;  %v5045_v13 = vpop.f32.mrb[24].mxu0  ;;  %v4865_v52 = vadd.f32 %v4854_v4, %v4774_v28 }
 0x409   : > { %v6670_v63 = vpop.f32.mrb[25].mxu0 }
 0x40a   : > { %v5048_v35 = vpop.f32.mrb[26].mxu0  ;;  %v4866_v0 = vadd.f32 %v4857_v21, %v4775_v9 }
 0x40b   : > { %v6671_v22 = vpop.f32.mrb[27].mxu0 }
 0x40d   : > { %v4930_v62 = vpop.f32.mrb[8].mxu1 }
 0x40e   : > { %v4953_v39 = vadd.f32 %v4930_v62, %v4861_v15  ;;  %v6652_v48 = vpop.f32.mrb[9].mxu1 }
 0x40f   : > { %v4933_v23 = vpop.f32.mrb[10].mxu1 }
 0x410   : > { %v4954_v20 = vadd.f32 %v4933_v23, %v4862_v24  ;;  %v6653_v3 = vpop.f32.mrb[11].mxu1  ;;  %v5053_v45 = vpop.f32.mrb[28].mxu0  ;;  %v5060_v40 = vadd.f32 %v5037_v38, %v4953_v39  ;;  %v5803_v39 = vld [vmem:[%s8328_s5] ss:$0 sm:$0xff] }
 0x411   : > { %v6674_v36 = vpop.f32.mrb[29].mxu0 }
 0x412   : > { %v5056_v50 = vpop.f32.mrb[30].mxu0  ;;  %v5061_v25 = vadd.f32 %v5040_v7, %v4954_v20 }
 0x413   : > { %v6675_v49 = vpop.f32.mrb[31].mxu0 }
 0x415   : > { %v4938_v44 = vpop.f32.mrb[12].mxu1 }
 0x416   : > { %v4955_v42 = vadd.f32 %v4938_v44, %v4863_v56  ;;  %v6656_v43 = vpop.f32.mrb[13].mxu1 }
 0x417   : > { %v4941_v47 = vpop.f32.mrb[14].mxu1 }
 0x418   : > { %v4956_v8 = vadd.f32 %v4941_v47, %v4864_v46  ;;  %v6657_v57 = vpop.f32.mrb[15].mxu1  ;;  %v5236_v33 = vpop.f32.mrb[32].mxu0  ;;  %v5062_v55 = vadd.f32 %v5045_v13, %v4955_v42 }
 0x419   : > { %v6694_v30 = vpop.f32.mrb[33].mxu0 }
 0x41a   : > { %v5239_v5 = vpop.f32.mrb[34].mxu0  ;;  %v5063_v14 = vadd.f32 %v5048_v35, %v4956_v8 }
 0x41b   : > { %v6695_v53 = vpop.f32.mrb[35].mxu0 }
 0x41d   : > { %v4946_v27 = vpop.f32.mrb[16].mxu1 }
 0x41e   : > { %v4957_v11 = vadd.f32 %v4946_v27, %v4865_v52  ;;  %v6660_v12 = vpop.f32.mrb[17].mxu1 }
 0x41f   : > { %v4949_v29 = vpop.f32.mrb[18].mxu1 }
 0x420   : > { %v4958_v60 = vadd.f32 %v4949_v29, %v4866_v0  ;;  %v6661_v51 = vpop.f32.mrb[19].mxu1  ;;  %v5244_v19 = vpop.f32.mrb[36].mxu0  ;;  %v5064_v32 = vadd.f32 %v5053_v45, %v4957_v11 }
 0x421   : > { %v6698_v59 = vpop.f32.mrb[37].mxu0 }
 0x422   : > { %v5247_v18 = vpop.f32.mrb[38].mxu0  ;;  %v5065_v4 = vadd.f32 %v5056_v50, %v4958_v60 }
 0x423   : > { %v6699_v15 = vpop.f32.mrb[39].mxu0 }
 0x425   : > { %v5128_v58 = vpop.f32.mrb[20].mxu1 }
 0x426   : > { %v5151_v21 = vadd.f32 %v5128_v58, %v5060_v40  ;;  %v6680_v24 = vpop.f32.mrb[21].mxu1 }
 0x427   : > { %v5131_v1 = vpop.f32.mrb[22].mxu1 }
 0x428   : > { %v5152_v26 = vadd.f32 %v5131_v1, %v5061_v25  ;;  %v6681_v54 = vpop.f32.mrb[23].mxu1  ;;  %v5252_v41 = vpop.f32.mrb[40].mxu0  ;;  %v5259_v31 = vadd.f32 %v5236_v33, %v5151_v21 }
 0x429   : > { %v6702_v61 = vpop.f32.mrb[41].mxu0 }
 0x42a   : > { %v5255_v16 = vpop.f32.mrb[42].mxu0  ;;  %v5260_v38 = vadd.f32 %v5239_v5, %v5152_v26 }
 0x42b   : > { %v6703_v56 = vpop.f32.mrb[43].mxu0 }
 0x42d   : > { %v5136_v6 = vpop.f32.mrb[24].mxu1 }
 0x42e   : > { %v5153_v7 = vadd.f32 %v5136_v6, %v5062_v55  ;;  %v6684_v46 = vpop.f32.mrb[25].mxu1 }
 0x42f   : > { %v5139_v34 = vpop.f32.mrb[26].mxu1 }
 0x430   : > { %v5154_v2 = vadd.f32 %v5139_v34, %v5063_v14  ;;  %v6685_v28 = vpop.f32.mrb[27].mxu1  ;;  %v5261_v10 = vadd.f32 %v5244_v19, %v5153_v7 }
 0x432   : > { %v5262_v17 = vadd.f32 %v5247_v18, %v5154_v2 }
 0x435   : > { %v5144_v9 = vpop.f32.mrb[28].mxu1 }
 0x436   : > { %v5155_v37 = vadd.f32 %v5144_v9, %v5064_v32  ;;  %v6688_v13 = vpop.f32.mrb[29].mxu1 }
 0x437   : > { %v5147_v52 = vpop.f32.mrb[30].mxu1 }
 0x438   : > { %v5156_v63 = vadd.f32 %v5147_v52, %v5065_v4  ;;  %v6689_v35 = vpop.f32.mrb[31].mxu1  ;;  %v5263_v0 = vadd.f32 %v5252_v41, %v5155_v37 }
 0x43a   : > { %v5264_v22 = vadd.f32 %v5255_v16, %v5156_v63 }
 0x43d   : > { %v5327_v62 = vpop.f32.mrb[32].mxu1 }
 0x43e   : > { %v5350_v48 = vadd.f32 %v5327_v62, %v5259_v31  ;;  %v6708_v23 = vpop.f32.mrb[33].mxu1 }
 0x43f   : > { %v5330_v20 = vpop.f32.mrb[34].mxu1 }
 0x440   : > { %v5363_v3 = vadd.f32 %v5803_v39, %v5350_v48  ;;  %v5351_v45 = vadd.f32 %v5330_v20, %v5260_v38  ;;  %v6709_v40 = vpop.f32.mrb[35].mxu1 }
 0x442   : > { %v5812_v36 = vpack.c.bf16 %v5363_v3, %v5363_v3  ;;  %v5364_v50 = vadd.f32 %v5803_v39, %v5351_v45 }
 0x444   : > { %5394 = vst.msk [vmem:[%s251_s14] sm:$0xf] %vm5393_vm0, %v5812_v36  ;;  %v5813_v25 = vpack.c.bf16 %v5364_v50, %v5364_v50 }
 0x445   : > { %v5335_v49 = vpop.f32.mrb[36].mxu1 }
 0x446   : > { %5395 = vst.msk [vmem:[%s251_s14 + $0x4] sm:$0xf] %vm5393_vm0, %v5813_v25  ;;  %v5352_v44 = vadd.f32 %v5335_v49, %v5261_v10  ;;  %v6712_v42 = vpop.f32.mrb[37].mxu1 }
 0x447   : > { %v5338_v43 = vpop.f32.mrb[38].mxu1 }
 0x448   : > { %v5365_v47 = vadd.f32 %v5803_v39, %v5352_v44  ;;  %v5353_v8 = vadd.f32 %v5338_v43, %v5262_v17  ;;  %v6713_v57 = vpop.f32.mrb[39].mxu1 }
 0x44a   : > { %v5814_v33 = vpack.c.bf16 %v5365_v47, %v5365_v47  ;;  %v5366_v55 = vadd.f32 %v5803_v39, %v5353_v8 }
 0x44c   : > { %5396 = vst.msk [vmem:[%s251_s14 + $0x8] sm:$0xf] %vm5393_vm0, %v5814_v33  ;;  %v5815_v30 = vpack.c.bf16 %v5366_v55, %v5366_v55 }
 0x44d   : > { %v5343_v5 = vpop.f32.mrb[40].mxu1 }
 0x44e   : > { %5397 = vst.msk [vmem:[%s251_s14 + $0xc] sm:$0xf] %vm5393_vm0, %v5815_v30  ;;  %v5354_v14 = vadd.f32 %v5343_v5, %v5263_v0  ;;  %v6716_v53 = vpop.f32.mrb[41].mxu1 }
 0x44f   : > { %v5346_v27 = vpop.f32.mrb[42].mxu1 }
 0x450   : > { %v5367_v11 = vadd.f32 %v5803_v39, %v5354_v14  ;;  %v5355_v12 = vadd.f32 %v5346_v27, %v5264_v22  ;;  %v6717_v29 = vpop.f32.mrb[43].mxu1 }
 0x452   : > { %v5816_v60 = vpack.c.bf16 %v5367_v11, %v5367_v11  ;;  %v5368_v51 = vadd.f32 %v5803_v39, %v5355_v12 }
 0x454   : > { %5398 = vst.msk [vmem:[%s251_s14 + $0x10] sm:$0xf] %vm5393_vm0, %v5816_v60  ;;  %v5817_v19 = vpack.c.bf16 %v5368_v51, %v5368_v51 }
 0x456   : > { %5399 = vst.msk [vmem:[%s251_s14 + $0x14] sm:$0xf] %vm5393_vm0, %v5817_v19 }
 0x457 PF: > { %s16_s21 = sadd.s32 1, %s6845_s21  }
 0x458   : > { %p13_p4 = scmp.ge.s32.totalorder %s16_s21, 4  }
 0x45a   :  { %15 = sbr.rel (!%p13_p4) target bundleno = 1 (0x1), region = 122 }

</bundles_post_ra>
